<compile_context>
chip_gen: v7x
topology: tpu7x:2x2x1
jax: 0.10.0
libtpu: 0.0.40
codegen_flags: <defaults>
</compile_context>

<pallas_src>
import numpy as np
import jax
import jax.numpy as jnp
from jax.experimental import pallas as pl
from jax.experimental.pallas import tpu as pltpu

HID = 2048   # hard-coded in BCNet.__init__: FCNet([v_dim, 2048])
NQ = 14      # h_net = weight_norm(nn.Linear(14, 1)) forces 14 question tokens
NQP = 16     # question tokens zero-padded to a sublane multiple (zero h_net weight on pads)
TH = 512     # hidden-channel tile: bf16 weight block = 2 MiB, 4 parallel tiles per call
TN = 512     # output-column tile for the final h_net2 linear


# ----------------------------- Pallas kernels --------------------------------

def _fused_front_kernel(v_ref, q_ref, wv_ref, bv_ref, wq_ref, bq_ref,
                        w14_ref, b14_ref, o_ref):
    """v_net + q_net + bilinear outer product + h_net for one tile of the 2048 hidden dim.

    v:(M,v_dim)bf16  q:(Mq,q_dim)bf16  wv:(1,v_dim,TH)bf16  wq:(1,q_dim,TH)bf16
    bv,bq:(1,TH)f32  w14:(M,Mq)f32 batch-block-diagonal  b14:(1,1)f32  o:(M,TH)bf16
    o[b*Nv+i, h] = relu(v@Wv+bv)[b,i,h] * sum_j w14[j]*relu(q@Wq+bq)[b,j,h] + b14
    """
    v_h = jnp.maximum(
        jnp.dot(v_ref[...], wv_ref[0], preferred_element_type=jnp.float32)
        + bv_ref[...], 0.0)
    q_h = jnp.maximum(
        jnp.dot(q_ref[...], wq_ref[0], preferred_element_type=jnp.float32)
        + bq_ref[...], 0.0)
    # W14big folds the Linear(14,1) reduction over question tokens and the broadcast of the
    # per-batch scale over the Nv image rows into one tiny matmul.
    s_rows = jnp.dot(w14_ref[...], q_h, preferred_element_type=jnp.float32)
    o_ref[...] = (v_h * s_rows + b14_ref[0, 0]).astype(o_ref.dtype)


def _linear_out_kernel(x_ref, w_ref, b_ref, o_ref):
    """h_net2: out = x @ W + b for one tile of output columns.
    x:(M,HID)bf16  w:(1,HID,TN)bf16 (tile-major)  b:(1,TN)f32  o:(M,TN)f32"""
    o_ref[...] = (jnp.dot(x_ref[...], w_ref[0], preferred_element_type=jnp.float32)
                  + b_ref[...]).astype(o_ref.dtype)


# --------------------------- parameters (synthetic) ---------------------------

def _wn_linear_params(key, in_dim, out_dim):
    """weight_norm(nn.Linear(in,out), dim=None): W_eff = g * V / ||V||_F.
    At PyTorch init g = ||W||_F and V = W, so W_eff == W; reproduced here."""
    kw, kb = jax.random.split(key)
    w_raw = jax.random.normal(kw, (out_dim, in_dim), jnp.float32) / np.sqrt(in_dim)
    g = jnp.sqrt(jnp.sum(w_raw * w_raw))
    w_eff = g * w_raw / jnp.sqrt(jnp.sum(w_raw * w_raw))
    b = 0.1 * jax.random.normal(kb, (out_dim,), jnp.float32)
    return w_eff, b


def _bf16_round(w):
    # Big weights live in bf16 in HBM (dominant DMA cost halves); keep the reference on the
    # identical bf16-representable values so kernel vs reference comparison stays exact.
    return w.astype(jnp.bfloat16).astype(jnp.float32)


def init_bcnet_params(key, v_dim, q_dim):
    kv, kq, kh, kh2 = jax.random.split(key, 4)
    Wv, bv = _wn_linear_params(kv, v_dim, HID)      # v_net FCNet linear
    Wq, bq = _wn_linear_params(kq, q_dim, HID)      # q_net FCNet linear
    W14, b14 = _wn_linear_params(kh, NQ, 1)         # h_net  = Linear(14, 1)
    W2, b2 = _wn_linear_params(kh2, v_dim, v_dim)   # h_net2 = Linear(v_dim, v_dim)
    # h_mat / h_bias / p_net (AvgPool1d) only appear in forward_with_weights; unused here.
    return dict(
        Wv=_bf16_round(Wv.T), bv=bv[None, :],     # (v_dim, HID), (1, HID)
        Wq=_bf16_round(Wq.T), bq=bq[None, :],     # (q_dim, HID), (1, HID)
        w14=W14, b14=b14[0],                      # (1, 14), scalar
        W2=_bf16_round(W2.T), b2=b2[None, :],     # (HID, v_dim), (1, v_dim)
    )


def prep_kernel_params(p):
    """Kernel-side weight layout: bf16, tile-major (n_tiles, K, tile) so each grid step's
    weight block is one contiguous HBM region (near-peak DMA on the mem-bound path)."""
    def tile_major(w, t):
        k, n = w.shape
        return w.reshape(k, n // t, t).transpose(1, 0, 2).astype(jnp.bfloat16)
    return dict(
        Wv_t=tile_major(p['Wv'], TH), bv=p['bv'],
        Wq_t=tile_major(p['Wq'], TH), bq=p['bq'],
        w14=p['w14'], b14=jnp.reshape(p['b14'], (1, 1)).astype(jnp.float32),
        W2_t=tile_major(p['W2'], TN), b2=p['b2'],
    )


# ------------------------------- forward pass ---------------------------------

def bcnet_forward(v, q, kp):
    """Pallas implementation of BCNet.forward (eval mode: both Dropouts are identity)."""
    B, Nv, v_dim = v.shape
    _, Nq, q_dim = q.shape
    assert v_dim == HID and Nq == NQ and HID % TH == 0 and v_dim % TN == 0

    M = B * Nv
    Mp = M + (-M) % 8
    Mq = B * NQP

    # Activations in bf16 (weights are bf16); every matmul accumulates in f32.
    v_flat = v.reshape(M, v_dim)
    if Mp != M:
        v_flat = jnp.pad(v_flat, ((0, Mp - M), (0, 0)))
    v_flat = v_flat.astype(jnp.bfloat16)
    q_flat = jnp.pad(q, ((0, 0), (0, NQP - Nq), (0, 0))).reshape(Mq, q_dim).astype(jnp.bfloat16)

    # Batch-block-diagonal h_net weight: (W14big @ q_h)[b*Nv+i, h] = sum_j w14[j] * q_h[b,j,h].
    # Zero columns cancel the zero-padded question rows; zero rows cover padded v rows.
    r = jnp.arange(Mp)[:, None]
    c = jnp.arange(Mq)[None, :]
    w14_row = jnp.tile(jnp.pad(kp['w14'], ((0, 0), (0, NQP - NQ))), (1, B))
    w14big = jnp.where((r // Nv) == (c // NQP), w14_row, 0.0).astype(jnp.float32)

    # Kernel 1: fused v_net + q_net + bilinear outer product + h_net, tiled over hidden dim.
    logits = pl.pallas_call(
        _fused_front_kernel,
        out_shape=jax.ShapeDtypeStruct((Mp, HID), jnp.bfloat16),
        grid_spec=pltpu.PrefetchScalarGridSpec(
            num_scalar_prefetch=0,
            grid=(HID // TH,),
            in_specs=[
                pl.BlockSpec((Mp, v_dim), lambda j: (0, 0)),
                pl.BlockSpec((Mq, q_dim), lambda j: (0, 0)),
                pl.BlockSpec((1, v_dim, TH), lambda j: (j, 0, 0)),   # contiguous weight tile
                pl.BlockSpec((1, TH), lambda j: (0, j)),
                pl.BlockSpec((1, q_dim, TH), lambda j: (j, 0, 0)),   # contiguous weight tile
                pl.BlockSpec((1, TH), lambda j: (0, j)),
                pl.BlockSpec((Mp, Mq), lambda j: (0, 0)),
                pl.BlockSpec((1, 1), lambda j: (0, 0)),
            ],
            out_specs=pl.BlockSpec((Mp, TH), lambda j: (0, j)),
        ),
        compiler_params=pltpu.CompilerParams(dimension_semantics=("parallel",)),
    )(v_flat, q_flat, kp['Wv_t'], kp['bv'], kp['Wq_t'], kp['bq'], w14big, kp['b14'])

    # Kernel 2: h_net2 = Linear(v_dim, v_dim), tiled over output columns (valid: v_dim == HID).
    out = pl.pallas_call(
        _linear_out_kernel,
        out_shape=jax.ShapeDtypeStruct((Mp, v_dim), jnp.float32),
        grid_spec=pltpu.PrefetchScalarGridSpec(
            num_scalar_prefetch=0,
            grid=(v_dim // TN,),
            in_specs=[
                pl.BlockSpec((Mp, HID), lambda j: (0, 0)),
                pl.BlockSpec((1, HID, TN), lambda j: (j, 0, 0)),     # contiguous weight tile
                pl.BlockSpec((1, TN), lambda j: (0, j)),
            ],
            out_specs=pl.BlockSpec((Mp, TN), lambda j: (0, j)),
        ),
        compiler_params=pltpu.CompilerParams(dimension_semantics=("parallel",)),
    )(logits, kp['W2_t'], kp['b2'])

    out = out[:M] if Mp != M else out
    return out.reshape(B, Nv, v_dim)


def bcnet_forward_ref(v, q, p):
    """Pure-JAX reference mirroring the PyTorch forward literally."""
    hp = jax.lax.Precision.HIGHEST
    vh = jax.nn.relu(jnp.einsum('bnd,dh->bnh', v, p['Wv'], precision=hp) + p['bv'])
    qh = jax.nn.relu(jnp.einsum('bmd,dh->bmh', q, p['Wq'], precision=hp) + p['bq'])
    v_ = jnp.transpose(vh, (0, 2, 1))[..., None]          # (B, H, Nv, 1)
    q_ = jnp.transpose(qh, (0, 2, 1))[:, :, None, :]      # (B, H, 1, Nq)
    d = jnp.einsum('bhnx,bhxm->bhnm', v_, q_, precision=hp)          # (B, H, Nv, Nq)
    lg = jnp.einsum('bhnm,m->bhn', d, p['w14'][0], precision=hp) + p['b14']
    lg = jnp.transpose(lg, (0, 2, 1))                     # (B, Nv, H)
    return jnp.einsum('bnh,hd->bnd', lg, p['W2'], precision=hp) + p['b2']


if __name__ == "__main__":
    B, Nv = 2, 8
    v_dim = HID          # forward() requires v_dim == 2048 (h_net2 consumes the 2048 hidden)
    q_dim = 128
    key = jax.random.PRNGKey(0)
    k_param, k_v, k_q = jax.random.split(key, 3)
    params = init_bcnet_params(k_param, v_dim, q_dim)
    kparams = prep_kernel_params(params)
    v = jax.random.normal(k_v, (B, Nv, v_dim), jnp.float32)
    q = jax.random.normal(k_q, (B, NQ, q_dim), jnp.float32)

    fwd = jax.jit(bcnet_forward)
    out = jax.block_until_ready(fwd(v, q, kparams))
    ref = jax.block_until_ready(bcnet_forward_ref(v, q, params))
    assert out.shape == (B, Nv, v_dim)
    np.testing.assert_allclose(np.asarray(out), np.asarray(ref), rtol=3e-2, atol=3e-2)
    print("KERNEL_OK")
</pallas_src>

<mosaic_0001>
module attributes {stable_mosaic.version = 11 : i64} {
  func.func @_fused_front_kernel(%arg0: i32, %arg1: memref<16x2048xbf16, #tpu.memory_space<vmem>>, %arg2: memref<32x128xbf16, #tpu.memory_space<vmem>>, %arg3: memref<1x2048x512xbf16, #tpu.memory_space<vmem>>, %arg4: memref<1x512xf32, #tpu.memory_space<vmem>>, %arg5: memref<1x128x512xbf16, #tpu.memory_space<vmem>>, %arg6: memref<1x512xf32, #tpu.memory_space<vmem>>, %arg7: memref<16x32xf32, #tpu.memory_space<vmem>>, %arg8: memref<1x1xf32, #tpu.memory_space<vmem>>, %arg9: memref<16x512xbf16, #tpu.memory_space<vmem>>) attributes {dimension_semantics = [#tpu.dimension_semantics<parallel>], iteration_bounds = array<i64: 4>, scalar_prefetch = 0 : i64, scratch_operands = 0 : i64, tpu.core_type = #tpu.core_type<tc>, window_params = [{pipeline_mode = #tpu.pipeline_mode<synchronous>, transform_indices = @transform_0, window_bounds = array<i64: 16, 2048>}, {pipeline_mode = #tpu.pipeline_mode<synchronous>, transform_indices = @transform_1, window_bounds = array<i64: 32, 128>}, {transform_indices = @transform_2, window_bounds = array<i64: 1, 2048, 512>}, {transform_indices = @transform_3, window_bounds = array<i64: 1, 512>}, {transform_indices = @transform_4, window_bounds = array<i64: 1, 128, 512>}, {transform_indices = @transform_5, window_bounds = array<i64: 1, 512>}, {pipeline_mode = #tpu.pipeline_mode<synchronous>, transform_indices = @transform_6, window_bounds = array<i64: 16, 32>}, {pipeline_mode = #tpu.pipeline_mode<synchronous>, transform_indices = @transform_7, window_bounds = array<i64: 1, 1>}, {transform_indices = @transform_8, window_bounds = array<i64: 16, 512>}]} {
    %c0 = arith.constant 0 : index
    %c0_0 = arith.constant 0 : index
    %0 = vector.load %arg1[%c0, %c0_0] : memref<16x2048xbf16, #tpu.memory_space<vmem>>, vector<16x2048xbf16>
    %c0_1 = arith.constant 0 : index
    %c0_2 = arith.constant 0 : index
    %c0_3 = arith.constant 0 : index
    %1 = vector.load %arg3[%c0_1, %c0_2, %c0_3] : memref<1x2048x512xbf16, #tpu.memory_space<vmem>>, vector<1x2048x512xbf16>
    %2 = vector.shape_cast %1 : vector<1x2048x512xbf16> to vector<2048x512xbf16>
    %cst = arith.constant dense<0.000000e+00> : vector<16x512xf32>
    %3 = tpu.matmul %0, %2, %cst {dimension_numbers = #tpu.dot_dimension_numbers<[1], [0], [0], [1], [0, 0, 1, 1], [], []>} : vector<16x2048xbf16>, vector<2048x512xbf16>, vector<16x512xf32> -> vector<16x512xf32>
    %c0_4 = arith.constant 0 : index
    %c0_5 = arith.constant 0 : index
    %4 = vector.load %arg4[%c0_4, %c0_5] : memref<1x512xf32, #tpu.memory_space<vmem>>, vector<1x512xf32>
    %5 = vector.broadcast %4 : vector<1x512xf32> to vector<16x512xf32>
    %6 = arith.addf %3, %5 : vector<16x512xf32>
    %cst_6 = arith.constant 0.000000e+00 : f32
    %7 = vector.broadcast %cst_6 : f32 to vector<16x512xf32>
    %8 = arith.maximumf %6, %7 : vector<16x512xf32>
    %c0_7 = arith.constant 0 : index
    %c0_8 = arith.constant 0 : index
    %9 = vector.load %arg2[%c0_7, %c0_8] : memref<32x128xbf16, #tpu.memory_space<vmem>>, vector<32x128xbf16>
    %c0_9 = arith.constant 0 : index
    %c0_10 = arith.constant 0 : index
    %c0_11 = arith.constant 0 : index
    %10 = vector.load %arg5[%c0_9, %c0_10, %c0_11] : memref<1x128x512xbf16, #tpu.memory_space<vmem>>, vector<1x128x512xbf16>
    %11 = vector.shape_cast %10 : vector<1x128x512xbf16> to vector<128x512xbf16>
    %cst_12 = arith.constant dense<0.000000e+00> : vector<32x512xf32>
    %12 = tpu.matmul %9, %11, %cst_12 {dimension_numbers = #tpu.dot_dimension_numbers<[1], [0], [0], [1], [0, 0, 1, 1], [], []>} : vector<32x128xbf16>, vector<128x512xbf16>, vector<32x512xf32> -> vector<32x512xf32>
    %c0_13 = arith.constant 0 : index
    %c0_14 = arith.constant 0 : index
    %13 = vector.load %arg6[%c0_13, %c0_14] : memref<1x512xf32, #tpu.memory_space<vmem>>, vector<1x512xf32>
    %14 = vector.broadcast %13 : vector<1x512xf32> to vector<32x512xf32>
    %15 = arith.addf %12, %14 : vector<32x512xf32>
    %cst_15 = arith.constant 0.000000e+00 : f32
    %16 = vector.broadcast %cst_15 : f32 to vector<32x512xf32>
    %17 = arith.maximumf %15, %16 : vector<32x512xf32>
    %c0_16 = arith.constant 0 : index
    %c0_17 = arith.constant 0 : index
    %18 = vector.load %arg7[%c0_16, %c0_17] : memref<16x32xf32, #tpu.memory_space<vmem>>, vector<16x32xf32>
    %cst_18 = arith.constant dense<0.000000e+00> : vector<16x512xf32>
    %19 = tpu.matmul %18, %17, %cst_18 {dimension_numbers = #tpu.dot_dimension_numbers<[1], [0], [0], [1], [0, 0, 1, 1], [], []>} : vector<16x32xf32>, vector<32x512xf32>, vector<16x512xf32> -> vector<16x512xf32>
    %20 = arith.mulf %8, %19 : vector<16x512xf32>
    %c0_19 = arith.constant 0 : index
    %c0_20 = arith.constant 0 : index
    %21 = vector.load %arg8[%c0_19, %c0_20] : memref<1x1xf32, #tpu.memory_space<vmem>>, vector<1x1xf32>
    %22 = vector.extract %21[0, 0] : f32 from vector<1x1xf32>
    %23 = vector.broadcast %22 : f32 to vector<16x512xf32>
    %24 = arith.addf %20, %23 : vector<16x512xf32>
    %25 = arith.truncf %24 : vector<16x512xf32> to vector<16x512xbf16>
    %c0_21 = arith.constant 0 : index
    %c0_22 = arith.constant 0 : index
    %26 = vector.load %arg9[%c0_21, %c0_22] : memref<16x512xbf16, #tpu.memory_space<vmem>>, vector<16x512xbf16>
    tpu.vector_store %arg9[%c0_21, %c0_22], %25 {strides = array<i32>} : memref<16x512xbf16, #tpu.memory_space<vmem>>, vector<16x512xbf16>,
    return
  }
  func.func @transform_0(%arg0: i32) -> (i32, i32) {
    %c0_i32 = arith.constant 0 : i32
    %c0_i32_0 = arith.constant 0 : i32
    %c0_i32_1 = arith.constant 0 : i32
    return %c0_i32, %c0_i32_0 : i32, i32
  }
  func.func @transform_1(%arg0: i32) -> (i32, i32) {
    %c0_i32 = arith.constant 0 : i32
    %c0_i32_0 = arith.constant 0 : i32
    %c0_i32_1 = arith.constant 0 : i32
    return %c0_i32, %c0_i32_0 : i32, i32
  }
  func.func @transform_2(%arg0: i32) -> (i32, i32, i32) {
    %c0_i32 = arith.constant 0 : i32
    %c0_i32_0 = arith.constant 0 : i32
    %c0_i32_1 = arith.constant 0 : i32
    return %arg0, %c0_i32, %c0_i32_0 : i32, i32, i32
  }
  func.func @transform_3(%arg0: i32) -> (i32, i32) {
    %c0_i32 = arith.constant 0 : i32
    %c0_i32_0 = arith.constant 0 : i32
    return %c0_i32, %arg0 : i32, i32
  }
  func.func @transform_4(%arg0: i32) -> (i32, i32, i32) {
    %c0_i32 = arith.constant 0 : i32
    %c0_i32_0 = arith.constant 0 : i32
    %c0_i32_1 = arith.constant 0 : i32
    return %arg0, %c0_i32, %c0_i32_0 : i32, i32, i32
  }
  func.func @transform_5(%arg0: i32) -> (i32, i32) {
    %c0_i32 = arith.constant 0 : i32
    %c0_i32_0 = arith.constant 0 : i32
    return %c0_i32, %arg0 : i32, i32
  }
  func.func @transform_6(%arg0: i32) -> (i32, i32) {
    %c0_i32 = arith.constant 0 : i32
    %c0_i32_0 = arith.constant 0 : i32
    %c0_i32_1 = arith.constant 0 : i32
    return %c0_i32, %c0_i32_0 : i32, i32
  }
  func.func @transform_7(%arg0: i32) -> (i32, i32) {
    %c0_i32 = arith.constant 0 : i32
    %c0_i32_0 = arith.constant 0 : i32
    %c0_i32_1 = arith.constant 0 : i32
    return %c0_i32, %c0_i32_0 : i32, i32
  }
  func.func @transform_8(%arg0: i32) -> (i32, i32) {
    %c0_i32 = arith.constant 0 : i32
    %c0_i32_0 = arith.constant 0 : i32
    return %c0_i32, %arg0 : i32, i32
  }
}

module attributes {stable_mosaic.version = 11 : i64} {
  func.func @_linear_out_kernel(%arg0: i32, %arg1: memref<16x2048xbf16, #tpu.memory_space<vmem>>, %arg2: memref<1x2048x512xbf16, #tpu.memory_space<vmem>>, %arg3: memref<1x512xf32, #tpu.memory_space<vmem>>, %arg4: memref<16x512xf32, #tpu.memory_space<vmem>>) attributes {dimension_semantics = [#tpu.dimension_semantics<parallel>], iteration_bounds = array<i64: 4>, scalar_prefetch = 0 : i64, scratch_operands = 0 : i64, tpu.core_type = #tpu.core_type<tc>, window_params = [{pipeline_mode = #tpu.pipeline_mode<synchronous>, transform_indices = @transform_0, window_bounds = array<i64: 16, 2048>}, {transform_indices = @transform_1, window_bounds = array<i64: 1, 2048, 512>}, {transform_indices = @transform_2, window_bounds = array<i64: 1, 512>}, {transform_indices = @transform_3, window_bounds = array<i64: 16, 512>}]} {
    %c0 = arith.constant 0 : index
    %c0_0 = arith.constant 0 : index
    %0 = vector.load %arg1[%c0, %c0_0] : memref<16x2048xbf16, #tpu.memory_space<vmem>>, vector<16x2048xbf16>
    %c0_1 = arith.constant 0 : index
    %c0_2 = arith.constant 0 : index
    %c0_3 = arith.constant 0 : index
    %1 = vector.load %arg2[%c0_1, %c0_2, %c0_3] : memref<1x2048x512xbf16, #tpu.memory_space<vmem>>, vector<1x2048x512xbf16>
    %2 = vector.shape_cast %1 : vector<1x2048x512xbf16> to vector<2048x512xbf16>
    %cst = arith.constant dense<0.000000e+00> : vector<16x512xf32>
    %3 = tpu.matmul %0, %2, %cst {dimension_numbers = #tpu.dot_dimension_numbers<[1], [0], [0], [1], [0, 0, 1, 1], [], []>} : vector<16x2048xbf16>, vector<2048x512xbf16>, vector<16x512xf32> -> vector<16x512xf32>
    %c0_4 = arith.constant 0 : index
    %c0_5 = arith.constant 0 : index
    %4 = vector.load %arg3[%c0_4, %c0_5] : memref<1x512xf32, #tpu.memory_space<vmem>>, vector<1x512xf32>
    %5 = vector.broadcast %4 : vector<1x512xf32> to vector<16x512xf32>
    %6 = arith.addf %3, %5 : vector<16x512xf32>
    %c0_6 = arith.constant 0 : index
    %c0_7 = arith.constant 0 : index
    %7 = vector.load %arg4[%c0_6, %c0_7] : memref<16x512xf32, #tpu.memory_space<vmem>>, vector<16x512xf32>
    tpu.vector_store %arg4[%c0_6, %c0_7], %6 {strides = array<i32>} : memref<16x512xf32, #tpu.memory_space<vmem>>, vector<16x512xf32>,
    return
  }
  func.func @transform_0(%arg0: i32) -> (i32, i32) {
    %c0_i32 = arith.constant 0 : i32
    %c0_i32_0 = arith.constant 0 : i32
    %c0_i32_1 = arith.constant 0 : i32
    return %c0_i32, %c0_i32_0 : i32, i32
  }
  func.func @transform_1(%arg0: i32) -> (i32, i32, i32) {
    %c0_i32 = arith.constant 0 : i32
    %c0_i32_0 = arith.constant 0 : i32
    %c0_i32_1 = arith.constant 0 : i32
    return %arg0, %c0_i32, %c0_i32_0 : i32, i32, i32
  }
  func.func @transform_2(%arg0: i32) -> (i32, i32) {
    %c0_i32 = arith.constant 0 : i32
    %c0_i32_0 = arith.constant 0 : i32
    return %c0_i32, %arg0 : i32, i32
  }
  func.func @transform_3(%arg0: i32) -> (i32, i32) {
    %c0_i32 = arith.constant 0 : i32
    %c0_i32_0 = arith.constant 0 : i32
    return %c0_i32, %arg0 : i32, i32
  }
}

</mosaic_0001>

<bundles_post_ra>
// kernel: bcnet_forward.3
= control target key start
LH: loop header
LB: loop body
LE: loop exit
PB: predicated region body
PF: predicated region fallthrough
CT: control target
= control target key end

     0   :  { %8 = vsyncpa [#allocation3], 0  ;;  %s6398_s0 = inlined_call_operand.vmem [shape: bf16[16,2048], index: 0, kind: input, shape index: {}]   ;;  %s6399_s1 = inlined_call_operand.vmem [shape: bf16[4,2048,512], index: 1, kind: input, shape index: {}]   ;;  %s6400_s2 = inlined_call_operand.vmem [shape: f32[1,2048], index: 2, kind: input, shape index: {}]   ;;  %s6401_s3 = inlined_call_operand.hbm [shape: f32[16,2048], index: 3, kind: output, shape index: {}]  }
   0x1   :  { %10 = vsyncpa [#allocation3 + $0x1], 0  ;;  %s5665_s12 = smov 0   ;;  %s5667_s13 = smov 0  }
   0x2   :  { %s5669_s14 = smov 0   ;;  %s5671_s15 = smov 0  }
   0x3 LB: > { %s5686_s16 = sadd.s32 4294967295, %s5639_s15   ;;  %s4160_s17 = sadd.s32 4294967294, %s5639_s15   ;;  %s5639_s15 = sphi %s5671_s15, %s6407_s15   ;;  %s5635_s14 = sphi %s5669_s14, %s6406_s14   ;;  %s5631_s13 = sphi %s5667_s13, %s6405_s13   ;;  %s5627_s12 = sphi %s5665_s12, %s6404_s12  }
   0x4   : > { %s5690_s18 = sadd.s32 1, %s5639_s15   ;;  %s96_s19 = sadd.s32 1, %s5635_s14 }
   0x5   : > { %s93_s20 = ssub.s32 %s5639_s15, %s5690_s18  ;;  %p106_p0 = scmp.ne.s32.totalorder %s5635_s14, %s5631_s13 }
   0x6   : > { %p94_p1 = scmp.eq.s32.totalorder %s93_s20, 0  ;;  %p107_p2 = scmp.eq.s32.totalorder %s5686_s16, 3 }
   0x7   : > { %p112_p3 = scmp.ne.s32.totalorder %s5631_s13, %s5627_s12  ;;  %p113_p4 = scmp.eq.s32.totalorder %s4160_s17, 3 }
   0x8   : > { %s5701_s21 = scalar_select %p94_p1, %s5635_s14, %s96_s19  }
   0x9   : > { %p5703_p5 = por %p107_p2, %p106_p0  ;;  %p5707_p6 = por %p113_p4, %p112_p3 }
   0xa   : > { %p4163_p7 = scmp.ge.s32.totalorder %s5639_s15, 1  ;;  %p150_p8 = scmp.lt.s32.totalorder %s5639_s15, 5 }
   0xc   : > { %p151_p9 = pnand %p4163_p7, %p150_p8 }
   0xd   : > { %p178_p10 = scmp.lt.s32.totalorder (!%p151_p9), %s5686_s16, 3  ;;  %v189_v0 = vld [vmem:[%s6398_s0] sm:$0xff] (!%p151_p9)  ;;  %s4167_s26 = sshll.u32 (!%p151_p9), %s5686_s16, 2 }
   0xe   : > { %154 = sbr.rel (%p151_p9) target bundleno = 771 (0x303), region = 32  ;;  %v197_v1 = vld [vmem:[%s6398_s0 + $0x40] sm:$0xff] (!%p151_p9)  ;;  %p184_p11 = scmp.lt.s32.totalorder (!%p151_p9), %s4167_s26, 15 }
   0xf   : > { %v5720_v2 = vcombine.low (!%p151_p9), %v189_v0, %v197_v1  ;;  %v4169_v3 = vcombine.high (!%p151_p9), %v189_v0, %v197_v1  ;;  %s4702_s7 = sshll.u32 (!%p151_p9), %s5686_s16, 9  ;;  %s5641_s17 = smov (!%p151_p9), [#allocation2]  }
  0x10   : > { %s6353_s9 = scalar_lea.hbm (!%p151_p9), %s6401_s3, %s4702_s7  ;;  %s5581_s19 = sshll.u32 (!%p151_p9), %s5641_s17, 4  ;;  %s5582_s19 = int_to_ptr.vmem [resolvable:$false] %s5581_s19 }
  0x11   : > { %3411 = vmatprep.mubr.bf16.mxu0 (!%p151_p9), %v4169_v3  ;;  %3755 = vmatprep.mubr.bf16.mxu1 (!%p151_p9), %v4169_v3  ;;  %s5583_s20 = scalar_lea.vmem (!%p151_p9), %s5582_s19, 2048 }
  0x15   : > { %s179_s28 = scalar_select %p178_p10, %s5686_s16, 3 }
  0x16   : > { %s6409_s26 = smov (!%p184_p11, %s4167_s26), 15 }
  0x17   : > { %s4701_s29 = sshll.u32 %s179_s28, 12 }
  0x18   : > { %s5726_s5 = scalar_lea.vmem %s6399_s1, %s4701_s29  ;;  %s186_s29 = scalar_lea.vmem %s6400_s2, %s6409_s26 }
  0x19   : > { %v4809_v4 = vld [vmem:[%s5726_s5 + $0x4] ss:$16 sps:$4 sm:$0xff]   ;;  %v4811_v5 = vld [vmem:[%s5726_s5 + $0xc] ss:$16 sps:$4 sm:$0xff]   ;;  %v4813_v6 = vld [vmem:[%s5726_s5] ss:$16 sps:$4 sm:$0xff]  }
  0x1a   : > { %3379 = vmatprep.subr.bf16.mxu0 %v4809_v4  ;;  %v4814_v7 = vld [vmem:[%s5726_s5 + $0x8] ss:$16 sps:$4 sm:$0xff]   ;;  %3723 = vmatprep.subr.bf16.mxu1 %v4811_v5  ;;  %v4815_v8 = vld [vmem:[%s5726_s5 + $0x24] ss:$16 sps:$4 sm:$0xff]   ;;  %v4817_v9 = vld [vmem:[%s5726_s5 + $0x2c] ss:$16 sps:$4 sm:$0xff]  }
  0x1b   : > { %3380 = vmatpush1.bf16.msra.mxu0 %v4813_v6  ;;  %3724 = vmatpush1.bf16.msra.mxu1 %v4814_v7  ;;  %v4819_v10 = vld [vmem:[%s5726_s5 + $0x20] ss:$16 sps:$4 sm:$0xff]   ;;  %v4820_v11 = vld [vmem:[%s5726_s5 + $0x28] ss:$16 sps:$4 sm:$0xff]   ;;  %v4821_v12 = vld [vmem:[%s5726_s5 + $0x44] ss:$16 sps:$4 sm:$0xff]  }
  0x1c   : > { %3381 = vmatprep.subr.bf16.mxu0 %v4815_v8  ;;  %3725 = vmatprep.subr.bf16.mxu1 %v4817_v9  ;;  %v4823_v13 = vld [vmem:[%s5726_s5 + $0x4c] ss:$16 sps:$4 sm:$0xff]   ;;  %v4825_v14 = vld [vmem:[%s5726_s5 + $0x40] ss:$16 sps:$4 sm:$0xff]   ;;  %v4826_v15 = vld [vmem:[%s5726_s5 + $0x48] ss:$16 sps:$4 sm:$0xff]  }
  0x1d   : > { %v4827_v16 = vld [vmem:[%s5726_s5 + $0x64] ss:$16 sps:$4 sm:$0xff]   ;;  %v4829_v17 = vld [vmem:[%s5726_s5 + $0x6c] ss:$16 sps:$4 sm:$0xff]   ;;  %v4831_v18 = vld [vmem:[%s5726_s5 + $0x60] ss:$16 sps:$4 sm:$0xff]  }
  0x1e   : > { %v4832_v19 = vld [vmem:[%s5726_s5 + $0x68] ss:$16 sps:$4 sm:$0xff]   ;;  %v4833_v20 = vld [vmem:[%s5726_s5 + $0x84] ss:$16 sps:$4 sm:$0xff]   ;;  %v4835_v21 = vld [vmem:[%s5726_s5 + $0x8c] ss:$16 sps:$4 sm:$0xff]  }
  0x1f   : > { %3382 = vmatpush1.bf16.msra.mxu0 %v4819_v10  ;;  %3726 = vmatpush1.bf16.msra.mxu1 %v4820_v11  ;;  %v4837_v22 = vld [vmem:[%s5726_s5 + $0x80] ss:$16 sps:$4 sm:$0xff]   ;;  %v4838_v23 = vld [vmem:[%s5726_s5 + $0x88] ss:$16 sps:$4 sm:$0xff]   ;;  %v4839_v24 = vld [vmem:[%s5726_s5 + $0xa4] ss:$16 sps:$4 sm:$0xff]  }
  0x20   : > { %3383 = vmatprep.subr.bf16.mxu0 %v4821_v12  ;;  %3727 = vmatprep.subr.bf16.mxu1 %v4823_v13  ;;  %v4841_v25 = vld [vmem:[%s5726_s5 + $0xac] ss:$16 sps:$4 sm:$0xff]   ;;  %v4843_v26 = vld [vmem:[%s5726_s5 + $0xa0] ss:$16 sps:$4 sm:$0xff]   ;;  %v4844_v27 = vld [vmem:[%s5726_s5 + $0xa8] ss:$16 sps:$4 sm:$0xff]  }
  0x21   : > { %v4845_v28 = vld [vmem:[%s5726_s5 + $0xc4] ss:$16 sps:$4 sm:$0xff]   ;;  %v4847_v29 = vld [vmem:[%s5726_s5 + $0xcc] ss:$16 sps:$4 sm:$0xff]   ;;  %v4849_v30 = vld [vmem:[%s5726_s5 + $0xc0] ss:$16 sps:$4 sm:$0xff]  }
  0x22   : > { %v4850_v31 = vld [vmem:[%s5726_s5 + $0xc8] ss:$16 sps:$4 sm:$0xff]   ;;  %v4851_v32 = vld [vmem:[%s5726_s5 + $0xe4] ss:$16 sps:$4 sm:$0xff]   ;;  %v4853_v33 = vld [vmem:[%s5726_s5 + $0xec] ss:$16 sps:$4 sm:$0xff]  }
  0x23   : > { %3384 = vmatpush1.bf16.msra.mxu0 %v4825_v14  ;;  %3728 = vmatpush1.bf16.msra.mxu1 %v4826_v15  ;;  %v4855_v34 = vld [vmem:[%s5726_s5 + $0xe0] ss:$16 sps:$4 sm:$0xff]   ;;  %v4856_v35 = vld [vmem:[%s5726_s5 + $0xe8] ss:$16 sps:$4 sm:$0xff]   ;;  %v4857_v36 = vld [vmem:[%s5726_s5 + $0x104] ss:$16 sps:$4 sm:$0xff]  }
  0x24   : > { %3385 = vmatprep.subr.bf16.mxu0 %v4827_v16  ;;  %3729 = vmatprep.subr.bf16.mxu1 %v4829_v17  ;;  %v4859_v37 = vld [vmem:[%s5726_s5 + $0x10c] ss:$16 sps:$4 sm:$0xff]   ;;  %v4861_v38 = vld [vmem:[%s5726_s5 + $0x100] ss:$16 sps:$4 sm:$0xff]   ;;  %v4862_v39 = vld [vmem:[%s5726_s5 + $0x108] ss:$16 sps:$4 sm:$0xff]  }
  0x25   : > { %v4863_v40 = vld [vmem:[%s5726_s5 + $0x124] ss:$16 sps:$4 sm:$0xff]   ;;  %v4865_v41 = vld [vmem:[%s5726_s5 + $0x12c] ss:$16 sps:$4 sm:$0xff]   ;;  %v4867_v42 = vld [vmem:[%s5726_s5 + $0x120] ss:$16 sps:$4 sm:$0xff]  }
  0x26   : > { %v4868_v43 = vld [vmem:[%s5726_s5 + $0x128] ss:$16 sps:$4 sm:$0xff]   ;;  %v4869_v44 = vld [vmem:[%s5726_s5 + $0x144] ss:$16 sps:$4 sm:$0xff]   ;;  %v4871_v45 = vld [vmem:[%s5726_s5 + $0x14c] ss:$16 sps:$4 sm:$0xff]  }
  0x27   : > { %3386 = vmatpush1.bf16.msra.mxu0 %v4831_v18  ;;  %3730 = vmatpush1.bf16.msra.mxu1 %v4832_v19  ;;  %v4873_v46 = vld [vmem:[%s5726_s5 + $0x140] ss:$16 sps:$4 sm:$0xff]   ;;  %v4874_v47 = vld [vmem:[%s5726_s5 + $0x148] ss:$16 sps:$4 sm:$0xff]   ;;  %v4875_v48 = vld [vmem:[%s5726_s5 + $0x164] ss:$16 sps:$4 sm:$0xff]  }
  0x28   : > { %3387 = vmatprep.subr.bf16.mxu0 %v4833_v20  ;;  %3731 = vmatprep.subr.bf16.mxu1 %v4835_v21  ;;  %v4877_v49 = vld [vmem:[%s5726_s5 + $0x16c] ss:$16 sps:$4 sm:$0xff]   ;;  %v4879_v50 = vld [vmem:[%s5726_s5 + $0x160] ss:$16 sps:$4 sm:$0xff]   ;;  %v4880_v51 = vld [vmem:[%s5726_s5 + $0x168] ss:$16 sps:$4 sm:$0xff]  }
  0x29   : > { %v4881_v52 = vld [vmem:[%s5726_s5 + $0x184] ss:$16 sps:$4 sm:$0xff]   ;;  %v4883_v53 = vld [vmem:[%s5726_s5 + $0x18c] ss:$16 sps:$4 sm:$0xff]   ;;  %v4885_v54 = vld [vmem:[%s5726_s5 + $0x180] ss:$16 sps:$4 sm:$0xff]  }
  0x2a   : > { %v4886_v55 = vld [vmem:[%s5726_s5 + $0x188] ss:$16 sps:$4 sm:$0xff]   ;;  %v4887_v56 = vld [vmem:[%s5726_s5 + $0x1a4] ss:$16 sps:$4 sm:$0xff]   ;;  %v4889_v57 = vld [vmem:[%s5726_s5 + $0x1ac] ss:$16 sps:$4 sm:$0xff]  }
  0x2b   : > { %3388 = vmatpush1.bf16.msra.mxu0 %v4837_v22  ;;  %3732 = vmatpush1.bf16.msra.mxu1 %v4838_v23  ;;  %v4891_v58 = vld [vmem:[%s5726_s5 + $0x1a0] ss:$16 sps:$4 sm:$0xff]   ;;  %v4892_v59 = vld [vmem:[%s5726_s5 + $0x1a8] ss:$16 sps:$4 sm:$0xff]   ;;  %v4893_v60 = vld [vmem:[%s5726_s5 + $0x1c4] ss:$16 sps:$4 sm:$0xff]  }
  0x2c   : > { %3389 = vmatprep.subr.bf16.mxu0 %v4839_v24  ;;  %3733 = vmatprep.subr.bf16.mxu1 %v4841_v25  ;;  %v4895_v61 = vld [vmem:[%s5726_s5 + $0x1cc] ss:$16 sps:$4 sm:$0xff]   ;;  %v4897_v62 = vld [vmem:[%s5726_s5 + $0x1c0] ss:$16 sps:$4 sm:$0xff]   ;;  %v4898_v63 = vld [vmem:[%s5726_s5 + $0x1c8] ss:$16 sps:$4 sm:$0xff]  }
  0x2d   : > { %v4899_v0 = vld [vmem:[%s5726_s5 + $0x1e4] ss:$16 sps:$4 sm:$0xff]   ;;  %v4901_v1 = vld [vmem:[%s5726_s5 + $0x1ec] ss:$16 sps:$4 sm:$0xff]   ;;  %v4903_v3 = vld [vmem:[%s5726_s5 + $0x1e0] ss:$16 sps:$4 sm:$0xff]  }
  0x2e   : > { %v4904_v4 = vld [vmem:[%s5726_s5 + $0x1e8] ss:$16 sps:$4 sm:$0xff]   ;;  %v4907_v5 = vld [vmem:[%s5726_s5 + $0x204] ss:$16 sps:$4 sm:$0xff]   ;;  %v4910_v6 = vld [vmem:[%s5726_s5 + $0x20c] ss:$16 sps:$4 sm:$0xff]  }
  0x2f   : > { %3390 = vmatpush1.bf16.msra.mxu0 %v4843_v26  ;;  %3734 = vmatpush1.bf16.msra.mxu1 %v4844_v27  ;;  %v4905_v7 = vld [vmem:[%s5726_s5 + $0x200] ss:$16 sps:$4 sm:$0xff]   ;;  %v4908_v8 = vld [vmem:[%s5726_s5 + $0x208] ss:$16 sps:$4 sm:$0xff]   ;;  %v4913_v9 = vld [vmem:[%s5726_s5 + $0x224] ss:$16 sps:$4 sm:$0xff]  }
  0x30   : > { %3391 = vmatprep.subr.bf16.mxu0 %v4845_v28  ;;  %3735 = vmatprep.subr.bf16.mxu1 %v4847_v29  ;;  %v4916_v10 = vld [vmem:[%s5726_s5 + $0x22c] ss:$16 sps:$4 sm:$0xff]   ;;  %v4911_v11 = vld [vmem:[%s5726_s5 + $0x220] ss:$16 sps:$4 sm:$0xff]   ;;  %v4914_v12 = vld [vmem:[%s5726_s5 + $0x228] ss:$16 sps:$4 sm:$0xff]  }
  0x31   : > { %v4919_v13 = vld [vmem:[%s5726_s5 + $0x244] ss:$16 sps:$4 sm:$0xff]   ;;  %v4922_v14 = vld [vmem:[%s5726_s5 + $0x24c] ss:$16 sps:$4 sm:$0xff]   ;;  %v4917_v15 = vld [vmem:[%s5726_s5 + $0x240] ss:$16 sps:$4 sm:$0xff]  }
  0x32   : > { %v4920_v16 = vld [vmem:[%s5726_s5 + $0x248] ss:$16 sps:$4 sm:$0xff]   ;;  %v4928_v17 = vld [vmem:[%s5726_s5 + $0x26c] ss:$16 sps:$4 sm:$0xff]   ;;  %v4923_v18 = vld [vmem:[%s5726_s5 + $0x260] ss:$16 sps:$4 sm:$0xff]  }
  0x33   : > { %3392 = vmatpush1.bf16.msra.mxu0 %v4849_v30  ;;  %3736 = vmatpush1.bf16.msra.mxu1 %v4850_v31  ;;  %v4926_v19 = vld [vmem:[%s5726_s5 + $0x268] ss:$16 sps:$4 sm:$0xff]   ;;  %v4931_v20 = vld [vmem:[%s5726_s5 + $0x284] ss:$16 sps:$4 sm:$0xff]   ;;  %v4934_v21 = vld [vmem:[%s5726_s5 + $0x28c] ss:$16 sps:$4 sm:$0xff]  }
  0x34   : > { %3393 = vmatprep.subr.bf16.mxu0 %v4851_v32  ;;  %3737 = vmatprep.subr.bf16.mxu1 %v4853_v33  ;;  %v4929_v22 = vld [vmem:[%s5726_s5 + $0x280] ss:$16 sps:$4 sm:$0xff]   ;;  %v4932_v23 = vld [vmem:[%s5726_s5 + $0x288] ss:$16 sps:$4 sm:$0xff]   ;;  %v4937_v24 = vld [vmem:[%s5726_s5 + $0x2a4] ss:$16 sps:$4 sm:$0xff]  }
  0x35   : > { %v4940_v25 = vld [vmem:[%s5726_s5 + $0x2ac] ss:$16 sps:$4 sm:$0xff]   ;;  %v4935_v26 = vld [vmem:[%s5726_s5 + $0x2a0] ss:$16 sps:$4 sm:$0xff]   ;;  %v4938_v27 = vld [vmem:[%s5726_s5 + $0x2a8] ss:$16 sps:$4 sm:$0xff]  }
  0x36   : > { %v4943_v28 = vld [vmem:[%s5726_s5 + $0x2c4] ss:$16 sps:$4 sm:$0xff]   ;;  %v4946_v29 = vld [vmem:[%s5726_s5 + $0x2cc] ss:$16 sps:$4 sm:$0xff]   ;;  %v4941_v33 = vld [vmem:[%s5726_s5 + $0x2c0] ss:$16 sps:$4 sm:$0xff]  }
  0x37   : > { %3394 = vmatpush1.bf16.msra.mxu0 %v4855_v34  ;;  %3738 = vmatpush1.bf16.msra.mxu1 %v4856_v35  ;;  %v5823_v30 = vld [vmem:[%s6398_s0 + $0x8] sm:$0xff]  ;;  %v4949_v35 = vld [vmem:[%s5726_s5 + $0x2e4] ss:$16 sps:$4 sm:$0xff]  }
  0x38   : > { %3395 = vmatprep.subr.bf16.mxu0 %v4857_v36  ;;  %3739 = vmatprep.subr.bf16.mxu1 %v4859_v37  ;;  %v5828_v31 = vld [vmem:[%s6398_s0 + $0x48] sm:$0xff]  ;;  %v4947_v37 = vld [vmem:[%s5726_s5 + $0x2e0] ss:$16 sps:$4 sm:$0xff]  }
  0x39   : > { %v4171_v32 = vcombine.high %v5823_v30, %v5828_v31  ;;  %v4944_v34 = vld [vmem:[%s5726_s5 + $0x2c8] ss:$16 sps:$4 sm:$0xff]   ;;  %v4952_v36 = vld [vmem:[%s5726_s5 + $0x2ec] ss:$16 sps:$4 sm:$0xff]  }
  0x3b   : > { %3396 = vmatpush1.bf16.msra.mxu0 %v4861_v38  ;;  %3740 = vmatpush1.bf16.msra.mxu1 %v4862_v39  ;;  %v4950_v38 = vld [vmem:[%s5726_s5 + $0x2e8] ss:$16 sps:$4 sm:$0xff]   ;;  %v4955_v39 = vld [vmem:[%s5726_s5 + $0x304] ss:$16 sps:$4 sm:$0xff]  }
  0x3c   : > { %3397 = vmatprep.subr.bf16.mxu0 %v4863_v40  ;;  %3741 = vmatprep.subr.bf16.mxu1 %v4865_v41  ;;  %v4958_v40 = vld [vmem:[%s5726_s5 + $0x30c] ss:$16 sps:$4 sm:$0xff]   ;;  %v4953_v41 = vld [vmem:[%s5726_s5 + $0x300] ss:$16 sps:$4 sm:$0xff]  }
  0x3f   : > { %3398 = vmatpush1.bf16.msra.mxu0 %v4867_v42  ;;  %3742 = vmatpush1.bf16.msra.mxu1 %v4868_v43  ;;  %v4956_v42 = vld [vmem:[%s5726_s5 + $0x308] ss:$16 sps:$4 sm:$0xff]   ;;  %v4961_v43 = vld [vmem:[%s5726_s5 + $0x324] ss:$16 sps:$4 sm:$0xff]  }
  0x40   : > { %3399 = vmatprep.subr.bf16.mxu0 %v4869_v44  ;;  %3743 = vmatprep.subr.bf16.mxu1 %v4871_v45  ;;  %v4964_v44 = vld [vmem:[%s5726_s5 + $0x32c] ss:$16 sps:$4 sm:$0xff]   ;;  %v4959_v45 = vld [vmem:[%s5726_s5 + $0x320] ss:$16 sps:$4 sm:$0xff]  }
  0x43   : > { %3400 = vmatpush1.bf16.msra.mxu0 %v4873_v46  ;;  %3744 = vmatpush1.bf16.msra.mxu1 %v4874_v47  ;;  %v4962_v46 = vld [vmem:[%s5726_s5 + $0x328] ss:$16 sps:$4 sm:$0xff]   ;;  %v4967_v47 = vld [vmem:[%s5726_s5 + $0x344] ss:$16 sps:$4 sm:$0xff]  }
  0x44   : > { %3401 = vmatprep.subr.bf16.mxu0 %v4875_v48  ;;  %3745 = vmatprep.subr.bf16.mxu1 %v4877_v49  ;;  %v4970_v48 = vld [vmem:[%s5726_s5 + $0x34c] ss:$16 sps:$4 sm:$0xff]   ;;  %v4965_v49 = vld [vmem:[%s5726_s5 + $0x340] ss:$16 sps:$4 sm:$0xff]  }
  0x47   : > { %3402 = vmatpush1.bf16.msra.mxu0 %v4879_v50  ;;  %3746 = vmatpush1.bf16.msra.mxu1 %v4880_v51  ;;  %v4968_v50 = vld [vmem:[%s5726_s5 + $0x348] ss:$16 sps:$4 sm:$0xff]   ;;  %v4973_v51 = vld [vmem:[%s5726_s5 + $0x364] ss:$16 sps:$4 sm:$0xff]  }
  0x48   : > { %3403 = vmatprep.subr.bf16.mxu0 %v4881_v52  ;;  %3747 = vmatprep.subr.bf16.mxu1 %v4883_v53  ;;  %v4976_v52 = vld [vmem:[%s5726_s5 + $0x36c] ss:$16 sps:$4 sm:$0xff]   ;;  %v4971_v53 = vld [vmem:[%s5726_s5 + $0x360] ss:$16 sps:$4 sm:$0xff]  }
  0x4b   : > { %3404 = vmatpush1.bf16.msra.mxu0 %v4885_v54  ;;  %3748 = vmatpush1.bf16.msra.mxu1 %v4886_v55  ;;  %v4974_v54 = vld [vmem:[%s5726_s5 + $0x368] ss:$16 sps:$4 sm:$0xff]   ;;  %v4979_v55 = vld [vmem:[%s5726_s5 + $0x384] ss:$16 sps:$4 sm:$0xff]  }
  0x4c   : > { %3405 = vmatprep.subr.bf16.mxu0 %v4887_v56  ;;  %3749 = vmatprep.subr.bf16.mxu1 %v4889_v57  ;;  %v4982_v56 = vld [vmem:[%s5726_s5 + $0x38c] ss:$16 sps:$4 sm:$0xff]   ;;  %v4977_v57 = vld [vmem:[%s5726_s5 + $0x380] ss:$16 sps:$4 sm:$0xff]  }
  0x4f   : > { %3406 = vmatpush1.bf16.msra.mxu0 %v4891_v58  ;;  %3750 = vmatpush1.bf16.msra.mxu1 %v4892_v59  ;;  %v4980_v58 = vld [vmem:[%s5726_s5 + $0x388] ss:$16 sps:$4 sm:$0xff]   ;;  %v4985_v59 = vld [vmem:[%s5726_s5 + $0x3a4] ss:$16 sps:$4 sm:$0xff]  }
  0x50   : > { %3407 = vmatprep.subr.bf16.mxu0 %v4893_v60  ;;  %3751 = vmatprep.subr.bf16.mxu1 %v4895_v61  ;;  %v4988_v60 = vld [vmem:[%s5726_s5 + $0x3ac] ss:$16 sps:$4 sm:$0xff]   ;;  %v4983_v61 = vld [vmem:[%s5726_s5 + $0x3a0] ss:$16 sps:$4 sm:$0xff]  }
  0x53   : > { %3408 = vmatpush1.bf16.msra.mxu0 %v4897_v62  ;;  %3752 = vmatpush1.bf16.msra.mxu1 %v4898_v63  ;;  %v4986_v62 = vld [vmem:[%s5726_s5 + $0x3a8] ss:$16 sps:$4 sm:$0xff]   ;;  %v4991_v63 = vld [vmem:[%s5726_s5 + $0x3c4] ss:$16 sps:$4 sm:$0xff]  }
  0x54   : > { %3409 = vmatprep.subr.bf16.mxu0 %v4899_v0  ;;  %3753 = vmatprep.subr.bf16.mxu1 %v4901_v1  ;;  %v4994_v0 = vld [vmem:[%s5726_s5 + $0x3cc] ss:$16 sps:$4 sm:$0xff]   ;;  %v4989_v1 = vld [vmem:[%s5726_s5 + $0x3c0] ss:$16 sps:$4 sm:$0xff]  }
  0x57   : > { %3410 = vmatpush1.bf16.msra.mxu0 %v4903_v3  ;;  %3754 = vmatpush1.bf16.msra.mxu1 %v4904_v4  ;;  %v4992_v3 = vld [vmem:[%s5726_s5 + $0x3c8] ss:$16 sps:$4 sm:$0xff]   ;;  %v4997_v4 = vld [vmem:[%s5726_s5 + $0x3e4] ss:$16 sps:$4 sm:$0xff]  }
  0x58   : > { %3422 = vmatprep.subr.bf16.mxu0 %v4907_v5  ;;  %3766 = vmatprep.subr.bf16.mxu1 %v4910_v6  ;;  %v5000_v5 = vld [vmem:[%s5726_s5 + $0x3ec] ss:$16 sps:$4 sm:$0xff]   ;;  %v4995_v6 = vld [vmem:[%s5726_s5 + $0x3e0] ss:$16 sps:$4 sm:$0xff]  }
  0x5a   : > { %3412 = vmatmul.mubr.bf16.vlgmr.msra.gmra.mrb[0].mxu0 %v5720_v2  ;;  %3756 = vmatmul.mubr.bf16.vlgmr.msra.gmra.mrb[0].mxu1 %v5720_v2  ;;  %v4925_v2 = vld [vmem:[%s5726_s5 + $0x264] ss:$16 sps:$4 sm:$0xff]  }
  0x5b   : > { %3423 = vmatpush1.bf16.msra.mxu0 %v4905_v7  ;;  %3767 = vmatpush1.bf16.msra.mxu1 %v4908_v8  ;;  %v4998_v7 = vld [vmem:[%s5726_s5 + $0x3e8] ss:$16 sps:$4 sm:$0xff]   ;;  %v5003_v8 = vld [vmem:[%s5726_s5 + $0x404] ss:$16 sps:$4 sm:$0xff]  }
  0x5c   : > { %3424 = vmatprep.subr.bf16.mxu0 %v4913_v9  ;;  %3768 = vmatprep.subr.bf16.mxu1 %v4916_v10  ;;  %v5006_v9 = vld [vmem:[%s5726_s5 + $0x40c] ss:$16 sps:$4 sm:$0xff]   ;;  %v5001_v10 = vld [vmem:[%s5726_s5 + $0x400] ss:$16 sps:$4 sm:$0xff]  }
  0x5d   : > { %3454 = vmatprep.mubr.bf16.mxu0 %v4171_v32  ;;  %3798 = vmatprep.mubr.bf16.mxu1 %v4171_v32  ;;  %v5036_v32 = vld [vmem:[%s5726_s5 + $0x4ac] ss:$16 sps:$4 sm:$0xff]  }
  0x5f   : > { %3425 = vmatpush1.bf16.msra.mxu0 %v4911_v11  ;;  %3769 = vmatpush1.bf16.msra.mxu1 %v4914_v12  ;;  %v4170_v11 = vcombine.low %v5823_v30, %v5828_v31  ;;  %v5004_v12 = vld [vmem:[%s5726_s5 + $0x408] ss:$16 sps:$4 sm:$0xff]   ;;  %v5033_v31 = vld [vmem:[%s5726_s5 + $0x4a4] ss:$16 sps:$4 sm:$0xff]  }
  0x60   : > { %3426 = vmatprep.subr.bf16.mxu0 %v4919_v13  ;;  %3770 = vmatprep.subr.bf16.mxu1 %v4922_v14  ;;  %v5009_v13 = vld [vmem:[%s5726_s5 + $0x424] ss:$16 sps:$4 sm:$0xff]   ;;  %v5012_v14 = vld [vmem:[%s5726_s5 + $0x42c] ss:$16 sps:$4 sm:$0xff]   ;;  %v5028_v30 = vld [vmem:[%s5726_s5 + $0x488] ss:$16 sps:$4 sm:$0xff]  }
  0x63   : > { %3427 = vmatpush1.bf16.msra.mxu0 %v4917_v15  ;;  %3771 = vmatpush1.bf16.msra.mxu1 %v4920_v16  ;;  %v5881_v15 = vld [vmem:[%s6398_s0 + $0x10] sm:$0xff] }
  0x64   : > { %3428 = vmatprep.subr.bf16.mxu0 %v4925_v2  ;;  %3772 = vmatprep.subr.bf16.mxu1 %v4928_v17  ;;  %v5886_v16 = vld [vmem:[%s6398_s0 + $0x50] sm:$0xff] }
  0x65   : > { %v4173_v2 = vcombine.high %v5881_v15, %v5886_v16  ;;  %v5007_v17 = vld [vmem:[%s5726_s5 + $0x420] ss:$16 sps:$4 sm:$0xff]  }
  0x67   : > { %3429 = vmatpush1.bf16.msra.mxu0 %v4923_v18  ;;  %3773 = vmatpush1.bf16.msra.mxu1 %v4926_v19  ;;  %v5010_v18 = vld [vmem:[%s5726_s5 + $0x428] ss:$16 sps:$4 sm:$0xff]   ;;  %v5015_v19 = vld [vmem:[%s5726_s5 + $0x444] ss:$16 sps:$4 sm:$0xff]  }
  0x68   : > { %3430 = vmatprep.subr.bf16.mxu0 %v4931_v20  ;;  %3774 = vmatprep.subr.bf16.mxu1 %v4934_v21  ;;  %v5018_v20 = vld [vmem:[%s5726_s5 + $0x44c] ss:$16 sps:$4 sm:$0xff]   ;;  %v5013_v21 = vld [vmem:[%s5726_s5 + $0x440] ss:$16 sps:$4 sm:$0xff]  }
  0x6b   : > { %3431 = vmatpush1.bf16.msra.mxu0 %v4929_v22  ;;  %3775 = vmatpush1.bf16.msra.mxu1 %v4932_v23  ;;  %v5016_v22 = vld [vmem:[%s5726_s5 + $0x448] ss:$16 sps:$4 sm:$0xff]   ;;  %v5021_v23 = vld [vmem:[%s5726_s5 + $0x464] ss:$16 sps:$4 sm:$0xff]  }
  0x6c   : > { %3432 = vmatprep.subr.bf16.mxu0 %v4937_v24  ;;  %3776 = vmatprep.subr.bf16.mxu1 %v4940_v25  ;;  %v5024_v24 = vld [vmem:[%s5726_s5 + $0x46c] ss:$16 sps:$4 sm:$0xff]   ;;  %v5019_v25 = vld [vmem:[%s5726_s5 + $0x460] ss:$16 sps:$4 sm:$0xff]  }
  0x6f   : > { %3433 = vmatpush1.bf16.msra.mxu0 %v4935_v26  ;;  %3777 = vmatpush1.bf16.msra.mxu1 %v4938_v27  ;;  %v5022_v26 = vld [vmem:[%s5726_s5 + $0x468] ss:$16 sps:$4 sm:$0xff]   ;;  %v5027_v27 = vld [vmem:[%s5726_s5 + $0x484] ss:$16 sps:$4 sm:$0xff]  }
  0x70   : > { %3434 = vmatprep.subr.bf16.mxu0 %v4943_v28  ;;  %3778 = vmatprep.subr.bf16.mxu1 %v4946_v29  ;;  %v5030_v28 = vld [vmem:[%s5726_s5 + $0x48c] ss:$16 sps:$4 sm:$0xff]   ;;  %v5025_v29 = vld [vmem:[%s5726_s5 + $0x480] ss:$16 sps:$4 sm:$0xff]  }
  0x73   : > { %3435 = vmatpush1.bf16.msra.mxu0 %v4941_v33  ;;  %3779 = vmatpush1.bf16.msra.mxu1 %v4944_v34  ;;  %v5031_v33 = vld [vmem:[%s5726_s5 + $0x4a0] ss:$16 sps:$4 sm:$0xff]   ;;  %v5034_v34 = vld [vmem:[%s5726_s5 + $0x4a8] ss:$16 sps:$4 sm:$0xff]  }
  0x74   : > { %3436 = vmatprep.subr.bf16.mxu0 %v4949_v35  ;;  %3780 = vmatprep.subr.bf16.mxu1 %v4952_v36  ;;  %v5039_v35 = vld [vmem:[%s5726_s5 + $0x4c4] ss:$16 sps:$4 sm:$0xff]   ;;  %v5042_v36 = vld [vmem:[%s5726_s5 + $0x4cc] ss:$16 sps:$4 sm:$0xff]  }
  0x77   : > { %3437 = vmatpush1.bf16.msra.mxu0 %v4947_v37  ;;  %3781 = vmatpush1.bf16.msra.mxu1 %v4950_v38  ;;  %v5037_v37 = vld [vmem:[%s5726_s5 + $0x4c0] ss:$16 sps:$4 sm:$0xff]   ;;  %v5040_v38 = vld [vmem:[%s5726_s5 + $0x4c8] ss:$16 sps:$4 sm:$0xff]  }
  0x78   : > { %3438 = vmatprep.subr.bf16.mxu0 %v4955_v39  ;;  %3782 = vmatprep.subr.bf16.mxu1 %v4958_v40  ;;  %v5045_v39 = vld [vmem:[%s5726_s5 + $0x4e4] ss:$16 sps:$4 sm:$0xff]   ;;  %v5048_v40 = vld [vmem:[%s5726_s5 + $0x4ec] ss:$16 sps:$4 sm:$0xff]  }
  0x7b   : > { %3439 = vmatpush1.bf16.msra.mxu0 %v4953_v41  ;;  %3783 = vmatpush1.bf16.msra.mxu1 %v4956_v42  ;;  %v5043_v41 = vld [vmem:[%s5726_s5 + $0x4e0] ss:$16 sps:$4 sm:$0xff]   ;;  %v5046_v42 = vld [vmem:[%s5726_s5 + $0x4e8] ss:$16 sps:$4 sm:$0xff]  }
  0x7c   : > { %3440 = vmatprep.subr.bf16.mxu0 %v4961_v43  ;;  %3784 = vmatprep.subr.bf16.mxu1 %v4964_v44  ;;  %v5051_v43 = vld [vmem:[%s5726_s5 + $0x504] ss:$16 sps:$4 sm:$0xff]   ;;  %v5054_v44 = vld [vmem:[%s5726_s5 + $0x50c] ss:$16 sps:$4 sm:$0xff]  }
  0x7f   : > { %3441 = vmatpush1.bf16.msra.mxu0 %v4959_v45  ;;  %3785 = vmatpush1.bf16.msra.mxu1 %v4962_v46  ;;  %v5049_v45 = vld [vmem:[%s5726_s5 + $0x500] ss:$16 sps:$4 sm:$0xff]   ;;  %v5052_v46 = vld [vmem:[%s5726_s5 + $0x508] ss:$16 sps:$4 sm:$0xff]  }
  0x80   : > { %3442 = vmatprep.subr.bf16.mxu0 %v4967_v47  ;;  %3786 = vmatprep.subr.bf16.mxu1 %v4970_v48  ;;  %v5057_v47 = vld [vmem:[%s5726_s5 + $0x524] ss:$16 sps:$4 sm:$0xff]   ;;  %v5060_v48 = vld [vmem:[%s5726_s5 + $0x52c] ss:$16 sps:$4 sm:$0xff]  }
  0x83   : > { %3443 = vmatpush1.bf16.msra.mxu0 %v4965_v49  ;;  %3787 = vmatpush1.bf16.msra.mxu1 %v4968_v50  ;;  %v5055_v49 = vld [vmem:[%s5726_s5 + $0x520] ss:$16 sps:$4 sm:$0xff]   ;;  %v5058_v50 = vld [vmem:[%s5726_s5 + $0x528] ss:$16 sps:$4 sm:$0xff]  }
  0x84   : > { %3444 = vmatprep.subr.bf16.mxu0 %v4973_v51  ;;  %3788 = vmatprep.subr.bf16.mxu1 %v4976_v52  ;;  %v5063_v51 = vld [vmem:[%s5726_s5 + $0x544] ss:$16 sps:$4 sm:$0xff]   ;;  %v5066_v52 = vld [vmem:[%s5726_s5 + $0x54c] ss:$16 sps:$4 sm:$0xff]  }
  0x87   : > { %3445 = vmatpush1.bf16.msra.mxu0 %v4971_v53  ;;  %3789 = vmatpush1.bf16.msra.mxu1 %v4974_v54  ;;  %v5061_v53 = vld [vmem:[%s5726_s5 + $0x540] ss:$16 sps:$4 sm:$0xff]   ;;  %v5064_v54 = vld [vmem:[%s5726_s5 + $0x548] ss:$16 sps:$4 sm:$0xff]  }
  0x88   : > { %3446 = vmatprep.subr.bf16.mxu0 %v4979_v55  ;;  %3790 = vmatprep.subr.bf16.mxu1 %v4982_v56  ;;  %v5069_v55 = vld [vmem:[%s5726_s5 + $0x564] ss:$16 sps:$4 sm:$0xff]   ;;  %v5072_v56 = vld [vmem:[%s5726_s5 + $0x56c] ss:$16 sps:$4 sm:$0xff]  }
  0x8b   : > { %3447 = vmatpush1.bf16.msra.mxu0 %v4977_v57  ;;  %3791 = vmatpush1.bf16.msra.mxu1 %v4980_v58  ;;  %v5067_v57 = vld [vmem:[%s5726_s5 + $0x560] ss:$16 sps:$4 sm:$0xff]   ;;  %v5070_v58 = vld [vmem:[%s5726_s5 + $0x568] ss:$16 sps:$4 sm:$0xff]  }
  0x8c   : > { %3448 = vmatprep.subr.bf16.mxu0 %v4985_v59  ;;  %3792 = vmatprep.subr.bf16.mxu1 %v4988_v60  ;;  %v5075_v59 = vld [vmem:[%s5726_s5 + $0x584] ss:$16 sps:$4 sm:$0xff]   ;;  %v5078_v60 = vld [vmem:[%s5726_s5 + $0x58c] ss:$16 sps:$4 sm:$0xff]  }
  0x8f   : > { %3449 = vmatpush1.bf16.msra.mxu0 %v4983_v61  ;;  %3793 = vmatpush1.bf16.msra.mxu1 %v4986_v62  ;;  %v5073_v61 = vld [vmem:[%s5726_s5 + $0x580] ss:$16 sps:$4 sm:$0xff]   ;;  %v5076_v62 = vld [vmem:[%s5726_s5 + $0x588] ss:$16 sps:$4 sm:$0xff]  }
  0x90   : > { %3450 = vmatprep.subr.bf16.mxu0 %v4991_v63  ;;  %3794 = vmatprep.subr.bf16.mxu1 %v4994_v0  ;;  %v5081_v63 = vld [vmem:[%s5726_s5 + $0x5a4] ss:$16 sps:$4 sm:$0xff]   ;;  %v5084_v0 = vld [vmem:[%s5726_s5 + $0x5ac] ss:$16 sps:$4 sm:$0xff]  }
  0x93   : > { %3451 = vmatpush1.bf16.msra.mxu0 %v4989_v1  ;;  %3795 = vmatpush1.bf16.msra.mxu1 %v4992_v3  ;;  %v5079_v1 = vld [vmem:[%s5726_s5 + $0x5a0] ss:$16 sps:$4 sm:$0xff]   ;;  %v5082_v3 = vld [vmem:[%s5726_s5 + $0x5a8] ss:$16 sps:$4 sm:$0xff]  }
  0x94   : > { %3452 = vmatprep.subr.bf16.mxu0 %v4997_v4  ;;  %3796 = vmatprep.subr.bf16.mxu1 %v5000_v5  ;;  %v5087_v4 = vld [vmem:[%s5726_s5 + $0x5c4] ss:$16 sps:$4 sm:$0xff]   ;;  %v5090_v5 = vld [vmem:[%s5726_s5 + $0x5cc] ss:$16 sps:$4 sm:$0xff]  }
  0x97   : > { %3453 = vmatpush1.bf16.msra.mxu0 %v4995_v6  ;;  %3797 = vmatpush1.bf16.msra.mxu1 %v4998_v7  ;;  %v5085_v6 = vld [vmem:[%s5726_s5 + $0x5c0] ss:$16 sps:$4 sm:$0xff]   ;;  %v5088_v7 = vld [vmem:[%s5726_s5 + $0x5c8] ss:$16 sps:$4 sm:$0xff]  }
  0x98   : > { %3465 = vmatprep.subr.bf16.mxu0 %v5003_v8  ;;  %3809 = vmatprep.subr.bf16.mxu1 %v5006_v9  ;;  %v5093_v8 = vld [vmem:[%s5726_s5 + $0x5e4] ss:$16 sps:$4 sm:$0xff]   ;;  %v5096_v9 = vld [vmem:[%s5726_s5 + $0x5ec] ss:$16 sps:$4 sm:$0xff]  }
  0x9a   : > { %3455 = vmatmul.mubr.bf16.vlgmr.msra.gmra.mrb[0].mxu0 %v4170_v11  ;;  %3799 = vmatmul.mubr.bf16.vlgmr.msra.gmra.mrb[0].mxu1 %v4170_v11  ;;  %v5094_v11 = vld [vmem:[%s5726_s5 + $0x5e8] ss:$16 sps:$4 sm:$0xff]  }
  0x9b   : > { %3466 = vmatpush1.bf16.msra.mxu0 %v5001_v10  ;;  %3810 = vmatpush1.bf16.msra.mxu1 %v5004_v12  ;;  %v5091_v10 = vld [vmem:[%s5726_s5 + $0x5e0] ss:$16 sps:$4 sm:$0xff]   ;;  %v5099_v12 = vld [vmem:[%s5726_s5 + $0x604] ss:$16 sps:$4 sm:$0xff]  }
  0x9c   : > { %3467 = vmatprep.subr.bf16.mxu0 %v5009_v13  ;;  %3811 = vmatprep.subr.bf16.mxu1 %v5012_v14  ;;  %v5102_v13 = vld [vmem:[%s5726_s5 + $0x60c] ss:$16 sps:$4 sm:$0xff]  }
  0x9d   : > { %3497 = vmatprep.mubr.bf16.mxu0 %v4173_v2  ;;  %3841 = vmatprep.mubr.bf16.mxu1 %v4173_v2  ;;  %v5953_v14 = vld [vmem:[%s6398_s0 + $0x18] sm:$0xff]  ;;  %v4172_v2 = vcombine.low %v5881_v15, %v5886_v16  ;;  %v5103_v16 = vld [vmem:[%s5726_s5 + $0x620] ss:$16 sps:$4 sm:$0xff]  }
  0x9f   : > { %3468 = vmatpush1.bf16.msra.mxu0 %v5007_v17  ;;  %3812 = vmatpush1.bf16.msra.mxu1 %v5010_v18  ;;  %v5960_v17 = vld [vmem:[%s6398_s0 + $0x58] sm:$0xff]  ;;  %v5097_v18 = vld [vmem:[%s5726_s5 + $0x600] ss:$16 sps:$4 sm:$0xff]  }
  0xa0   : > { %3469 = vmatprep.subr.bf16.mxu0 %v5015_v19  ;;  %3813 = vmatprep.subr.bf16.mxu1 %v5018_v20  ;;  %v5100_v19 = vld [vmem:[%s5726_s5 + $0x608] ss:$16 sps:$4 sm:$0xff]   ;;  %v5105_v20 = vld [vmem:[%s5726_s5 + $0x624] ss:$16 sps:$4 sm:$0xff]   ;;  %v4175_v15 = vcombine.high %v5953_v14, %v5960_v17 }
  0xa3   : > { %3470 = vmatpush1.bf16.msra.mxu0 %v5013_v21  ;;  %3814 = vmatpush1.bf16.msra.mxu1 %v5016_v22  ;;  %v5108_v21 = vld [vmem:[%s5726_s5 + $0x62c] ss:$16 sps:$4 sm:$0xff]   ;;  %v5106_v22 = vld [vmem:[%s5726_s5 + $0x628] ss:$16 sps:$4 sm:$0xff]  }
  0xa4   : > { %3471 = vmatprep.subr.bf16.mxu0 %v5021_v23  ;;  %3815 = vmatprep.subr.bf16.mxu1 %v5024_v24  ;;  %v5111_v23 = vld [vmem:[%s5726_s5 + $0x644] ss:$16 sps:$4 sm:$0xff]   ;;  %v5114_v24 = vld [vmem:[%s5726_s5 + $0x64c] ss:$16 sps:$4 sm:$0xff]  }
  0xa7   : > { %3472 = vmatpush1.bf16.msra.mxu0 %v5019_v25  ;;  %3816 = vmatpush1.bf16.msra.mxu1 %v5022_v26  ;;  %v5109_v25 = vld [vmem:[%s5726_s5 + $0x640] ss:$16 sps:$4 sm:$0xff]   ;;  %v5112_v26 = vld [vmem:[%s5726_s5 + $0x648] ss:$16 sps:$4 sm:$0xff]  }
  0xa8   : > { %3473 = vmatprep.subr.bf16.mxu0 %v5027_v27  ;;  %3817 = vmatprep.subr.bf16.mxu1 %v5030_v28  ;;  %v5117_v27 = vld [vmem:[%s5726_s5 + $0x664] ss:$16 sps:$4 sm:$0xff]   ;;  %v5120_v28 = vld [vmem:[%s5726_s5 + $0x66c] ss:$16 sps:$4 sm:$0xff]  }
  0xab   : > { %3474 = vmatpush1.bf16.msra.mxu0 %v5025_v29  ;;  %3818 = vmatpush1.bf16.msra.mxu1 %v5028_v30  ;;  %v5115_v29 = vld [vmem:[%s5726_s5 + $0x660] ss:$16 sps:$4 sm:$0xff]   ;;  %v5118_v30 = vld [vmem:[%s5726_s5 + $0x668] ss:$16 sps:$4 sm:$0xff]  }
  0xac   : > { %3475 = vmatprep.subr.bf16.mxu0 %v5033_v31  ;;  %3819 = vmatprep.subr.bf16.mxu1 %v5036_v32  ;;  %v5123_v31 = vld [vmem:[%s5726_s5 + $0x684] ss:$16 sps:$4 sm:$0xff]   ;;  %v5126_v32 = vld [vmem:[%s5726_s5 + $0x68c] ss:$16 sps:$4 sm:$0xff]  }
  0xaf   : > { %3476 = vmatpush1.bf16.msra.mxu0 %v5031_v33  ;;  %3820 = vmatpush1.bf16.msra.mxu1 %v5034_v34  ;;  %v5121_v33 = vld [vmem:[%s5726_s5 + $0x680] ss:$16 sps:$4 sm:$0xff]   ;;  %v5124_v34 = vld [vmem:[%s5726_s5 + $0x688] ss:$16 sps:$4 sm:$0xff]  }
  0xb0   : > { %3477 = vmatprep.subr.bf16.mxu0 %v5039_v35  ;;  %3821 = vmatprep.subr.bf16.mxu1 %v5042_v36  ;;  %v5129_v35 = vld [vmem:[%s5726_s5 + $0x6a4] ss:$16 sps:$4 sm:$0xff]   ;;  %v5132_v36 = vld [vmem:[%s5726_s5 + $0x6ac] ss:$16 sps:$4 sm:$0xff]  }
  0xb3   : > { %3478 = vmatpush1.bf16.msra.mxu0 %v5037_v37  ;;  %3822 = vmatpush1.bf16.msra.mxu1 %v5040_v38  ;;  %v5127_v37 = vld [vmem:[%s5726_s5 + $0x6a0] ss:$16 sps:$4 sm:$0xff]   ;;  %v5130_v38 = vld [vmem:[%s5726_s5 + $0x6a8] ss:$16 sps:$4 sm:$0xff]  }
  0xb4   : > { %3479 = vmatprep.subr.bf16.mxu0 %v5045_v39  ;;  %3823 = vmatprep.subr.bf16.mxu1 %v5048_v40  ;;  %v5135_v39 = vld [vmem:[%s5726_s5 + $0x6c4] ss:$16 sps:$4 sm:$0xff]   ;;  %v5138_v40 = vld [vmem:[%s5726_s5 + $0x6cc] ss:$16 sps:$4 sm:$0xff]  }
  0xb7   : > { %3480 = vmatpush1.bf16.msra.mxu0 %v5043_v41  ;;  %3824 = vmatpush1.bf16.msra.mxu1 %v5046_v42  ;;  %v5133_v41 = vld [vmem:[%s5726_s5 + $0x6c0] ss:$16 sps:$4 sm:$0xff]   ;;  %v5136_v42 = vld [vmem:[%s5726_s5 + $0x6c8] ss:$16 sps:$4 sm:$0xff]  }
  0xb8   : > { %3481 = vmatprep.subr.bf16.mxu0 %v5051_v43  ;;  %3825 = vmatprep.subr.bf16.mxu1 %v5054_v44  ;;  %v5141_v43 = vld [vmem:[%s5726_s5 + $0x6e4] ss:$16 sps:$4 sm:$0xff]   ;;  %v5144_v44 = vld [vmem:[%s5726_s5 + $0x6ec] ss:$16 sps:$4 sm:$0xff]  }
  0xbb   : > { %3482 = vmatpush1.bf16.msra.mxu0 %v5049_v45  ;;  %3826 = vmatpush1.bf16.msra.mxu1 %v5052_v46  ;;  %v5139_v45 = vld [vmem:[%s5726_s5 + $0x6e0] ss:$16 sps:$4 sm:$0xff]   ;;  %v5142_v46 = vld [vmem:[%s5726_s5 + $0x6e8] ss:$16 sps:$4 sm:$0xff]  }
  0xbc   : > { %3483 = vmatprep.subr.bf16.mxu0 %v5057_v47  ;;  %3827 = vmatprep.subr.bf16.mxu1 %v5060_v48  ;;  %v5147_v47 = vld [vmem:[%s5726_s5 + $0x704] ss:$16 sps:$4 sm:$0xff]   ;;  %v5150_v48 = vld [vmem:[%s5726_s5 + $0x70c] ss:$16 sps:$4 sm:$0xff]  }
  0xbf   : > { %3484 = vmatpush1.bf16.msra.mxu0 %v5055_v49  ;;  %3828 = vmatpush1.bf16.msra.mxu1 %v5058_v50  ;;  %v5145_v49 = vld [vmem:[%s5726_s5 + $0x700] ss:$16 sps:$4 sm:$0xff]   ;;  %v5148_v50 = vld [vmem:[%s5726_s5 + $0x708] ss:$16 sps:$4 sm:$0xff]  }
  0xc0   : > { %3485 = vmatprep.subr.bf16.mxu0 %v5063_v51  ;;  %3829 = vmatprep.subr.bf16.mxu1 %v5066_v52  ;;  %v5153_v51 = vld [vmem:[%s5726_s5 + $0x724] ss:$16 sps:$4 sm:$0xff]   ;;  %v5156_v52 = vld [vmem:[%s5726_s5 + $0x72c] ss:$16 sps:$4 sm:$0xff]  }
  0xc3   : > { %3486 = vmatpush1.bf16.msra.mxu0 %v5061_v53  ;;  %3830 = vmatpush1.bf16.msra.mxu1 %v5064_v54  ;;  %v5151_v53 = vld [vmem:[%s5726_s5 + $0x720] ss:$16 sps:$4 sm:$0xff]   ;;  %v5154_v54 = vld [vmem:[%s5726_s5 + $0x728] ss:$16 sps:$4 sm:$0xff]  }
  0xc4   : > { %3487 = vmatprep.subr.bf16.mxu0 %v5069_v55  ;;  %3831 = vmatprep.subr.bf16.mxu1 %v5072_v56  ;;  %v5159_v55 = vld [vmem:[%s5726_s5 + $0x744] ss:$16 sps:$4 sm:$0xff]   ;;  %v5162_v56 = vld [vmem:[%s5726_s5 + $0x74c] ss:$16 sps:$4 sm:$0xff]  }
  0xc7   : > { %3488 = vmatpush1.bf16.msra.mxu0 %v5067_v57  ;;  %3832 = vmatpush1.bf16.msra.mxu1 %v5070_v58  ;;  %v5157_v57 = vld [vmem:[%s5726_s5 + $0x740] ss:$16 sps:$4 sm:$0xff]   ;;  %v5160_v58 = vld [vmem:[%s5726_s5 + $0x748] ss:$16 sps:$4 sm:$0xff]  }
  0xc8   : > { %3489 = vmatprep.subr.bf16.mxu0 %v5075_v59  ;;  %3833 = vmatprep.subr.bf16.mxu1 %v5078_v60  ;;  %v5165_v59 = vld [vmem:[%s5726_s5 + $0x764] ss:$16 sps:$4 sm:$0xff]   ;;  %v5168_v60 = vld [vmem:[%s5726_s5 + $0x76c] ss:$16 sps:$4 sm:$0xff]  }
  0xcb   : > { %3490 = vmatpush1.bf16.msra.mxu0 %v5073_v61  ;;  %3834 = vmatpush1.bf16.msra.mxu1 %v5076_v62  ;;  %v5163_v61 = vld [vmem:[%s5726_s5 + $0x760] ss:$16 sps:$4 sm:$0xff]   ;;  %v5166_v62 = vld [vmem:[%s5726_s5 + $0x768] ss:$16 sps:$4 sm:$0xff]  }
  0xcc   : > { %3491 = vmatprep.subr.bf16.mxu0 %v5081_v63  ;;  %3835 = vmatprep.subr.bf16.mxu1 %v5084_v0  ;;  %v5171_v63 = vld [vmem:[%s5726_s5 + $0x784] ss:$16 sps:$4 sm:$0xff]   ;;  %v5174_v0 = vld [vmem:[%s5726_s5 + $0x78c] ss:$16 sps:$4 sm:$0xff]  }
  0xcf   : > { %3492 = vmatpush1.bf16.msra.mxu0 %v5079_v1  ;;  %3836 = vmatpush1.bf16.msra.mxu1 %v5082_v3  ;;  %v5169_v1 = vld [vmem:[%s5726_s5 + $0x780] ss:$16 sps:$4 sm:$0xff]   ;;  %v5172_v3 = vld [vmem:[%s5726_s5 + $0x788] ss:$16 sps:$4 sm:$0xff]  }
  0xd0   : > { %3493 = vmatprep.subr.bf16.mxu0 %v5087_v4  ;;  %3837 = vmatprep.subr.bf16.mxu1 %v5090_v5  ;;  %v5177_v4 = vld [vmem:[%s5726_s5 + $0x7a4] ss:$16 sps:$4 sm:$0xff]   ;;  %v5180_v5 = vld [vmem:[%s5726_s5 + $0x7ac] ss:$16 sps:$4 sm:$0xff]  }
  0xd3   : > { %3494 = vmatpush1.bf16.msra.mxu0 %v5085_v6  ;;  %3838 = vmatpush1.bf16.msra.mxu1 %v5088_v7  ;;  %v5175_v6 = vld [vmem:[%s5726_s5 + $0x7a0] ss:$16 sps:$4 sm:$0xff]   ;;  %v5178_v7 = vld [vmem:[%s5726_s5 + $0x7a8] ss:$16 sps:$4 sm:$0xff]  }
  0xd4   : > { %3495 = vmatprep.subr.bf16.mxu0 %v5093_v8  ;;  %3839 = vmatprep.subr.bf16.mxu1 %v5096_v9  ;;  %v5183_v8 = vld [vmem:[%s5726_s5 + $0x7c4] ss:$16 sps:$4 sm:$0xff]   ;;  %v5186_v9 = vld [vmem:[%s5726_s5 + $0x7cc] ss:$16 sps:$4 sm:$0xff]  }
  0xd7   : > { %3496 = vmatpush1.bf16.msra.mxu0 %v5091_v10  ;;  %3840 = vmatpush1.bf16.msra.mxu1 %v5094_v11  ;;  %v5181_v10 = vld [vmem:[%s5726_s5 + $0x7c0] ss:$16 sps:$4 sm:$0xff]   ;;  %v5184_v11 = vld [vmem:[%s5726_s5 + $0x7c8] ss:$16 sps:$4 sm:$0xff]  }
  0xd8   : > { %3508 = vmatprep.subr.bf16.mxu0 %v5099_v12  ;;  %3852 = vmatprep.subr.bf16.mxu1 %v5102_v13  ;;  %v5189_v12 = vld [vmem:[%s5726_s5 + $0x7e4] ss:$16 sps:$4 sm:$0xff]   ;;  %v5192_v13 = vld [vmem:[%s5726_s5 + $0x7ec] ss:$16 sps:$4 sm:$0xff]  }
  0xda   : > { %3498 = vmatmul.mubr.bf16.vlgmr.msra.gmra.mrb[0].mxu0 %v4172_v2  ;;  %3842 = vmatmul.mubr.bf16.vlgmr.msra.gmra.mrb[0].mxu1 %v4172_v2  ;;  %v5187_v2 = vld [vmem:[%s5726_s5 + $0x7e0] ss:$16 sps:$4 sm:$0xff]  }
  0xdb   : > { %3509 = vmatpush1.bf16.msra.mxu0 %v5097_v18  ;;  %3853 = vmatpush1.bf16.msra.mxu1 %v5100_v19  ;;  %v5190_v18 = vld [vmem:[%s5726_s5 + $0x7e8] ss:$16 sps:$4 sm:$0xff]   ;;  %v5195_v19 = vld [vmem:[%s5726_s5 + $0x804] ss:$16 sps:$4 sm:$0xff]  }
  0xdc   : > { %3510 = vmatprep.subr.bf16.mxu0 %v5105_v20  ;;  %3854 = vmatprep.subr.bf16.mxu1 %v5108_v21  ;;  %v5198_v20 = vld [vmem:[%s5726_s5 + $0x80c] ss:$16 sps:$4 sm:$0xff]   ;;  %v5193_v21 = vld [vmem:[%s5726_s5 + $0x800] ss:$16 sps:$4 sm:$0xff]  }
  0xdd   : > { %3540 = vmatprep.mubr.bf16.mxu0 %v4175_v15  ;;  %3884 = vmatprep.mubr.bf16.mxu1 %v4175_v15  ;;  %v5196_v15 = vld [vmem:[%s5726_s5 + $0x808] ss:$16 sps:$4 sm:$0xff]  }
  0xdf   : > { %3511 = vmatpush1.bf16.msra.mxu0 %v5103_v16  ;;  %3855 = vmatpush1.bf16.msra.mxu1 %v5106_v22  ;;  %v4174_v16 = vcombine.low %v5953_v14, %v5960_v17  ;;  %v6035_v22 = vld [vmem:[%s6398_s0 + $0x20] sm:$0xff] }
  0xe0   : > { %3512 = vmatprep.subr.bf16.mxu0 %v5111_v23  ;;  %3856 = vmatprep.subr.bf16.mxu1 %v5114_v24  ;;  %v6040_v23 = vld [vmem:[%s6398_s0 + $0x60] sm:$0xff] }
  0xe1   : > { %v5201_v24 = vld [vmem:[%s5726_s5 + $0x824] ss:$16 sps:$4 sm:$0xff]   ;;  %v4177_v14 = vcombine.high %v6035_v22, %v6040_v23  ;;  %v5199_v17 = vld [vmem:[%s5726_s5 + $0x820] ss:$16 sps:$4 sm:$0xff]  }
  0xe3   : > { %3513 = vmatpush1.bf16.msra.mxu0 %v5109_v25  ;;  %3857 = vmatpush1.bf16.msra.mxu1 %v5112_v26  ;;  %v5204_v25 = vld [vmem:[%s5726_s5 + $0x82c] ss:$16 sps:$4 sm:$0xff]   ;;  %v5202_v26 = vld [vmem:[%s5726_s5 + $0x828] ss:$16 sps:$4 sm:$0xff]  }
  0xe4   : > { %3514 = vmatprep.subr.bf16.mxu0 %v5117_v27  ;;  %3858 = vmatprep.subr.bf16.mxu1 %v5120_v28  ;;  %v5207_v27 = vld [vmem:[%s5726_s5 + $0x844] ss:$16 sps:$4 sm:$0xff]   ;;  %v5210_v28 = vld [vmem:[%s5726_s5 + $0x84c] ss:$16 sps:$4 sm:$0xff]  }
  0xe7   : > { %3515 = vmatpush1.bf16.msra.mxu0 %v5115_v29  ;;  %3859 = vmatpush1.bf16.msra.mxu1 %v5118_v30  ;;  %v5205_v29 = vld [vmem:[%s5726_s5 + $0x840] ss:$16 sps:$4 sm:$0xff]   ;;  %v5208_v30 = vld [vmem:[%s5726_s5 + $0x848] ss:$16 sps:$4 sm:$0xff]  }
  0xe8   : > { %3516 = vmatprep.subr.bf16.mxu0 %v5123_v31  ;;  %3860 = vmatprep.subr.bf16.mxu1 %v5126_v32  ;;  %v5213_v31 = vld [vmem:[%s5726_s5 + $0x864] ss:$16 sps:$4 sm:$0xff]   ;;  %v5216_v32 = vld [vmem:[%s5726_s5 + $0x86c] ss:$16 sps:$4 sm:$0xff]  }
  0xeb   : > { %3517 = vmatpush1.bf16.msra.mxu0 %v5121_v33  ;;  %3861 = vmatpush1.bf16.msra.mxu1 %v5124_v34  ;;  %v5211_v33 = vld [vmem:[%s5726_s5 + $0x860] ss:$16 sps:$4 sm:$0xff]   ;;  %v5214_v34 = vld [vmem:[%s5726_s5 + $0x868] ss:$16 sps:$4 sm:$0xff]  }
  0xec   : > { %3518 = vmatprep.subr.bf16.mxu0 %v5129_v35  ;;  %3862 = vmatprep.subr.bf16.mxu1 %v5132_v36  ;;  %v5219_v35 = vld [vmem:[%s5726_s5 + $0x884] ss:$16 sps:$4 sm:$0xff]   ;;  %v5222_v36 = vld [vmem:[%s5726_s5 + $0x88c] ss:$16 sps:$4 sm:$0xff]  }
  0xef   : > { %3519 = vmatpush1.bf16.msra.mxu0 %v5127_v37  ;;  %3863 = vmatpush1.bf16.msra.mxu1 %v5130_v38  ;;  %v5217_v37 = vld [vmem:[%s5726_s5 + $0x880] ss:$16 sps:$4 sm:$0xff]   ;;  %v5220_v38 = vld [vmem:[%s5726_s5 + $0x888] ss:$16 sps:$4 sm:$0xff]  }
  0xf0   : > { %3520 = vmatprep.subr.bf16.mxu0 %v5135_v39  ;;  %3864 = vmatprep.subr.bf16.mxu1 %v5138_v40  ;;  %v5225_v39 = vld [vmem:[%s5726_s5 + $0x8a4] ss:$16 sps:$4 sm:$0xff]   ;;  %v5228_v40 = vld [vmem:[%s5726_s5 + $0x8ac] ss:$16 sps:$4 sm:$0xff]  }
  0xf3   : > { %3521 = vmatpush1.bf16.msra.mxu0 %v5133_v41  ;;  %3865 = vmatpush1.bf16.msra.mxu1 %v5136_v42  ;;  %v5223_v41 = vld [vmem:[%s5726_s5 + $0x8a0] ss:$16 sps:$4 sm:$0xff]   ;;  %v5226_v42 = vld [vmem:[%s5726_s5 + $0x8a8] ss:$16 sps:$4 sm:$0xff]  }
  0xf4   : > { %3522 = vmatprep.subr.bf16.mxu0 %v5141_v43  ;;  %3866 = vmatprep.subr.bf16.mxu1 %v5144_v44  ;;  %v5231_v43 = vld [vmem:[%s5726_s5 + $0x8c4] ss:$16 sps:$4 sm:$0xff]   ;;  %v5234_v44 = vld [vmem:[%s5726_s5 + $0x8cc] ss:$16 sps:$4 sm:$0xff]  }
  0xf7   : > { %3523 = vmatpush1.bf16.msra.mxu0 %v5139_v45  ;;  %3867 = vmatpush1.bf16.msra.mxu1 %v5142_v46  ;;  %v5229_v45 = vld [vmem:[%s5726_s5 + $0x8c0] ss:$16 sps:$4 sm:$0xff]   ;;  %v5232_v46 = vld [vmem:[%s5726_s5 + $0x8c8] ss:$16 sps:$4 sm:$0xff]  }
  0xf8   : > { %3524 = vmatprep.subr.bf16.mxu0 %v5147_v47  ;;  %3868 = vmatprep.subr.bf16.mxu1 %v5150_v48  ;;  %v5237_v47 = vld [vmem:[%s5726_s5 + $0x8e4] ss:$16 sps:$4 sm:$0xff]   ;;  %v5240_v48 = vld [vmem:[%s5726_s5 + $0x8ec] ss:$16 sps:$4 sm:$0xff]  }
  0xfb   : > { %3525 = vmatpush1.bf16.msra.mxu0 %v5145_v49  ;;  %3869 = vmatpush1.bf16.msra.mxu1 %v5148_v50  ;;  %v5235_v49 = vld [vmem:[%s5726_s5 + $0x8e0] ss:$16 sps:$4 sm:$0xff]   ;;  %v5238_v50 = vld [vmem:[%s5726_s5 + $0x8e8] ss:$16 sps:$4 sm:$0xff]  }
  0xfc   : > { %3526 = vmatprep.subr.bf16.mxu0 %v5153_v51  ;;  %3870 = vmatprep.subr.bf16.mxu1 %v5156_v52  ;;  %v5243_v51 = vld [vmem:[%s5726_s5 + $0x904] ss:$16 sps:$4 sm:$0xff]   ;;  %v5246_v52 = vld [vmem:[%s5726_s5 + $0x90c] ss:$16 sps:$4 sm:$0xff]  }
  0xff   : > { %3527 = vmatpush1.bf16.msra.mxu0 %v5151_v53  ;;  %3871 = vmatpush1.bf16.msra.mxu1 %v5154_v54  ;;  %v5241_v53 = vld [vmem:[%s5726_s5 + $0x900] ss:$16 sps:$4 sm:$0xff]   ;;  %v5244_v54 = vld [vmem:[%s5726_s5 + $0x908] ss:$16 sps:$4 sm:$0xff]  }
 0x100   : > { %3528 = vmatprep.subr.bf16.mxu0 %v5159_v55  ;;  %3872 = vmatprep.subr.bf16.mxu1 %v5162_v56  ;;  %v5249_v55 = vld [vmem:[%s5726_s5 + $0x924] ss:$16 sps:$4 sm:$0xff]   ;;  %v5252_v56 = vld [vmem:[%s5726_s5 + $0x92c] ss:$16 sps:$4 sm:$0xff]  }
 0x103   : > { %3529 = vmatpush1.bf16.msra.mxu0 %v5157_v57  ;;  %3873 = vmatpush1.bf16.msra.mxu1 %v5160_v58  ;;  %v5247_v57 = vld [vmem:[%s5726_s5 + $0x920] ss:$16 sps:$4 sm:$0xff]   ;;  %v5250_v58 = vld [vmem:[%s5726_s5 + $0x928] ss:$16 sps:$4 sm:$0xff]  }
 0x104   : > { %3530 = vmatprep.subr.bf16.mxu0 %v5165_v59  ;;  %3874 = vmatprep.subr.bf16.mxu1 %v5168_v60  ;;  %v5255_v59 = vld [vmem:[%s5726_s5 + $0x944] ss:$16 sps:$4 sm:$0xff]   ;;  %v5258_v60 = vld [vmem:[%s5726_s5 + $0x94c] ss:$16 sps:$4 sm:$0xff]  }
 0x107   : > { %3531 = vmatpush1.bf16.msra.mxu0 %v5163_v61  ;;  %3875 = vmatpush1.bf16.msra.mxu1 %v5166_v62  ;;  %v5253_v61 = vld [vmem:[%s5726_s5 + $0x940] ss:$16 sps:$4 sm:$0xff]   ;;  %v5256_v62 = vld [vmem:[%s5726_s5 + $0x948] ss:$16 sps:$4 sm:$0xff]  }
 0x108   : > { %3532 = vmatprep.subr.bf16.mxu0 %v5171_v63  ;;  %3876 = vmatprep.subr.bf16.mxu1 %v5174_v0  ;;  %v5261_v63 = vld [vmem:[%s5726_s5 + $0x964] ss:$16 sps:$4 sm:$0xff]   ;;  %v5264_v0 = vld [vmem:[%s5726_s5 + $0x96c] ss:$16 sps:$4 sm:$0xff]  }
 0x10b   : > { %3533 = vmatpush1.bf16.msra.mxu0 %v5169_v1  ;;  %3877 = vmatpush1.bf16.msra.mxu1 %v5172_v3  ;;  %v5259_v1 = vld [vmem:[%s5726_s5 + $0x960] ss:$16 sps:$4 sm:$0xff]   ;;  %v5262_v3 = vld [vmem:[%s5726_s5 + $0x968] ss:$16 sps:$4 sm:$0xff]  }
 0x10c   : > { %3534 = vmatprep.subr.bf16.mxu0 %v5177_v4  ;;  %3878 = vmatprep.subr.bf16.mxu1 %v5180_v5  ;;  %v5267_v4 = vld [vmem:[%s5726_s5 + $0x984] ss:$16 sps:$4 sm:$0xff]   ;;  %v5270_v5 = vld [vmem:[%s5726_s5 + $0x98c] ss:$16 sps:$4 sm:$0xff]  }
 0x10f   : > { %3535 = vmatpush1.bf16.msra.mxu0 %v5175_v6  ;;  %3879 = vmatpush1.bf16.msra.mxu1 %v5178_v7  ;;  %v5265_v6 = vld [vmem:[%s5726_s5 + $0x980] ss:$16 sps:$4 sm:$0xff]   ;;  %v5268_v7 = vld [vmem:[%s5726_s5 + $0x988] ss:$16 sps:$4 sm:$0xff]  }
 0x110   : > { %3536 = vmatprep.subr.bf16.mxu0 %v5183_v8  ;;  %3880 = vmatprep.subr.bf16.mxu1 %v5186_v9  ;;  %v5273_v8 = vld [vmem:[%s5726_s5 + $0x9a4] ss:$16 sps:$4 sm:$0xff]   ;;  %v5276_v9 = vld [vmem:[%s5726_s5 + $0x9ac] ss:$16 sps:$4 sm:$0xff]  }
 0x113   : > { %3537 = vmatpush1.bf16.msra.mxu0 %v5181_v10  ;;  %3881 = vmatpush1.bf16.msra.mxu1 %v5184_v11  ;;  %v5271_v10 = vld [vmem:[%s5726_s5 + $0x9a0] ss:$16 sps:$4 sm:$0xff]   ;;  %v5274_v11 = vld [vmem:[%s5726_s5 + $0x9a8] ss:$16 sps:$4 sm:$0xff]  }
 0x114   : > { %3538 = vmatprep.subr.bf16.mxu0 %v5189_v12  ;;  %3882 = vmatprep.subr.bf16.mxu1 %v5192_v13  ;;  %v5279_v12 = vld [vmem:[%s5726_s5 + $0x9c4] ss:$16 sps:$4 sm:$0xff]   ;;  %v5282_v13 = vld [vmem:[%s5726_s5 + $0x9cc] ss:$16 sps:$4 sm:$0xff]  }
 0x117   : > { %3539 = vmatpush1.bf16.msra.mxu0 %v5187_v2  ;;  %3883 = vmatpush1.bf16.msra.mxu1 %v5190_v18  ;;  %v5277_v2 = vld [vmem:[%s5726_s5 + $0x9c0] ss:$16 sps:$4 sm:$0xff]   ;;  %v5280_v18 = vld [vmem:[%s5726_s5 + $0x9c8] ss:$16 sps:$4 sm:$0xff]  }
 0x118   : > { %3551 = vmatprep.subr.bf16.mxu0 %v5195_v19  ;;  %3895 = vmatprep.subr.bf16.mxu1 %v5198_v20  ;;  %v5285_v19 = vld [vmem:[%s5726_s5 + $0x9e4] ss:$16 sps:$4 sm:$0xff]   ;;  %v5288_v20 = vld [vmem:[%s5726_s5 + $0x9ec] ss:$16 sps:$4 sm:$0xff]  }
 0x11a   : > { %3541 = vmatmul.mubr.bf16.vlgmr.msra.gmra.mrb[0].mxu0 %v4174_v16  ;;  %3885 = vmatmul.mubr.bf16.vlgmr.msra.gmra.mrb[0].mxu1 %v4174_v16  ;;  %v5291_v16 = vld [vmem:[%s5726_s5 + $0xa04] ss:$16 sps:$4 sm:$0xff]  }
 0x11b   : > { %3552 = vmatpush1.bf16.msra.mxu0 %v5193_v21  ;;  %3896 = vmatpush1.bf16.msra.mxu1 %v5196_v15  ;;  %v5283_v21 = vld [vmem:[%s5726_s5 + $0x9e0] ss:$16 sps:$4 sm:$0xff]   ;;  %v5286_v15 = vld [vmem:[%s5726_s5 + $0x9e8] ss:$16 sps:$4 sm:$0xff]  }
 0x11c   : > { %3553 = vmatprep.subr.bf16.mxu0 %v5201_v24  ;;  %3897 = vmatprep.subr.bf16.mxu1 %v5204_v25  ;;  %v5294_v24 = vld [vmem:[%s5726_s5 + $0xa0c] ss:$16 sps:$4 sm:$0xff]  }
 0x11d   : > { %3583 = vmatprep.mubr.bf16.mxu0 %v4177_v14  ;;  %3927 = vmatprep.mubr.bf16.mxu1 %v4177_v14  ;;  %v6109_v25 = vld [vmem:[%s6398_s0 + $0x28] sm:$0xff] }
 0x11e   : > { %v6114_v14 = vld [vmem:[%s6398_s0 + $0x68] sm:$0xff] }
 0x11f   : > { %3554 = vmatpush1.bf16.msra.mxu0 %v5199_v17  ;;  %3898 = vmatpush1.bf16.msra.mxu1 %v5202_v26  ;;  %v4176_v17 = vcombine.low %v6035_v22, %v6040_v23  ;;  %v5289_v26 = vld [vmem:[%s5726_s5 + $0xa00] ss:$16 sps:$4 sm:$0xff]   ;;  %v5298_v23 = vld [vmem:[%s5726_s5 + $0xa28] ss:$16 sps:$4 sm:$0xff]  }
 0x120   : > { %3555 = vmatprep.subr.bf16.mxu0 %v5207_v27  ;;  %3899 = vmatprep.subr.bf16.mxu1 %v5210_v28  ;;  %v5292_v27 = vld [vmem:[%s5726_s5 + $0xa08] ss:$16 sps:$4 sm:$0xff]   ;;  %v5297_v28 = vld [vmem:[%s5726_s5 + $0xa24] ss:$16 sps:$4 sm:$0xff]   ;;  %v5295_v22 = vld [vmem:[%s5726_s5 + $0xa20] ss:$16 sps:$4 sm:$0xff]  }
 0x123   : > { %3556 = vmatpush1.bf16.msra.mxu0 %v5205_v29  ;;  %3900 = vmatpush1.bf16.msra.mxu1 %v5208_v30  ;;  %v5300_v29 = vld [vmem:[%s5726_s5 + $0xa2c] ss:$16 sps:$4 sm:$0xff]   ;;  %v4179_v30 = vcombine.high %v6109_v25, %v6114_v14 }
 0x124   : > { %3557 = vmatprep.subr.bf16.mxu0 %v5213_v31  ;;  %3901 = vmatprep.subr.bf16.mxu1 %v5216_v32  ;;  %v5303_v31 = vld [vmem:[%s5726_s5 + $0xa44] ss:$16 sps:$4 sm:$0xff]   ;;  %v5306_v32 = vld [vmem:[%s5726_s5 + $0xa4c] ss:$16 sps:$4 sm:$0xff]  }
 0x127   : > { %3558 = vmatpush1.bf16.msra.mxu0 %v5211_v33  ;;  %3902 = vmatpush1.bf16.msra.mxu1 %v5214_v34  ;;  %v5301_v33 = vld [vmem:[%s5726_s5 + $0xa40] ss:$16 sps:$4 sm:$0xff]   ;;  %v5304_v34 = vld [vmem:[%s5726_s5 + $0xa48] ss:$16 sps:$4 sm:$0xff]  }
 0x128   : > { %3559 = vmatprep.subr.bf16.mxu0 %v5219_v35  ;;  %3903 = vmatprep.subr.bf16.mxu1 %v5222_v36  ;;  %v5309_v35 = vld [vmem:[%s5726_s5 + $0xa64] ss:$16 sps:$4 sm:$0xff]   ;;  %v5312_v36 = vld [vmem:[%s5726_s5 + $0xa6c] ss:$16 sps:$4 sm:$0xff]  }
 0x12b   : > { %3560 = vmatpush1.bf16.msra.mxu0 %v5217_v37  ;;  %3904 = vmatpush1.bf16.msra.mxu1 %v5220_v38  ;;  %v5307_v37 = vld [vmem:[%s5726_s5 + $0xa60] ss:$16 sps:$4 sm:$0xff]   ;;  %v5310_v38 = vld [vmem:[%s5726_s5 + $0xa68] ss:$16 sps:$4 sm:$0xff]  }
 0x12c   : > { %3561 = vmatprep.subr.bf16.mxu0 %v5225_v39  ;;  %3905 = vmatprep.subr.bf16.mxu1 %v5228_v40  ;;  %v5315_v39 = vld [vmem:[%s5726_s5 + $0xa84] ss:$16 sps:$4 sm:$0xff]   ;;  %v5318_v40 = vld [vmem:[%s5726_s5 + $0xa8c] ss:$16 sps:$4 sm:$0xff]  }
 0x12f   : > { %3562 = vmatpush1.bf16.msra.mxu0 %v5223_v41  ;;  %3906 = vmatpush1.bf16.msra.mxu1 %v5226_v42  ;;  %v5313_v41 = vld [vmem:[%s5726_s5 + $0xa80] ss:$16 sps:$4 sm:$0xff]   ;;  %v5316_v42 = vld [vmem:[%s5726_s5 + $0xa88] ss:$16 sps:$4 sm:$0xff]  }
 0x130   : > { %3563 = vmatprep.subr.bf16.mxu0 %v5231_v43  ;;  %3907 = vmatprep.subr.bf16.mxu1 %v5234_v44  ;;  %v5321_v43 = vld [vmem:[%s5726_s5 + $0xaa4] ss:$16 sps:$4 sm:$0xff]   ;;  %v5324_v44 = vld [vmem:[%s5726_s5 + $0xaac] ss:$16 sps:$4 sm:$0xff]  }
 0x133   : > { %3564 = vmatpush1.bf16.msra.mxu0 %v5229_v45  ;;  %3908 = vmatpush1.bf16.msra.mxu1 %v5232_v46  ;;  %v5319_v45 = vld [vmem:[%s5726_s5 + $0xaa0] ss:$16 sps:$4 sm:$0xff]   ;;  %v5322_v46 = vld [vmem:[%s5726_s5 + $0xaa8] ss:$16 sps:$4 sm:$0xff]  }
 0x134   : > { %3565 = vmatprep.subr.bf16.mxu0 %v5237_v47  ;;  %3909 = vmatprep.subr.bf16.mxu1 %v5240_v48  ;;  %v5327_v47 = vld [vmem:[%s5726_s5 + $0xac4] ss:$16 sps:$4 sm:$0xff]   ;;  %v5330_v48 = vld [vmem:[%s5726_s5 + $0xacc] ss:$16 sps:$4 sm:$0xff]  }
 0x137   : > { %3566 = vmatpush1.bf16.msra.mxu0 %v5235_v49  ;;  %3910 = vmatpush1.bf16.msra.mxu1 %v5238_v50  ;;  %v5325_v49 = vld [vmem:[%s5726_s5 + $0xac0] ss:$16 sps:$4 sm:$0xff]   ;;  %v5328_v50 = vld [vmem:[%s5726_s5 + $0xac8] ss:$16 sps:$4 sm:$0xff]  }
 0x138   : > { %3567 = vmatprep.subr.bf16.mxu0 %v5243_v51  ;;  %3911 = vmatprep.subr.bf16.mxu1 %v5246_v52  ;;  %v5333_v51 = vld [vmem:[%s5726_s5 + $0xae4] ss:$16 sps:$4 sm:$0xff]   ;;  %v5336_v52 = vld [vmem:[%s5726_s5 + $0xaec] ss:$16 sps:$4 sm:$0xff]  }
 0x13b   : > { %3568 = vmatpush1.bf16.msra.mxu0 %v5241_v53  ;;  %3912 = vmatpush1.bf16.msra.mxu1 %v5244_v54  ;;  %v5331_v53 = vld [vmem:[%s5726_s5 + $0xae0] ss:$16 sps:$4 sm:$0xff]   ;;  %v5334_v54 = vld [vmem:[%s5726_s5 + $0xae8] ss:$16 sps:$4 sm:$0xff]  }
 0x13c   : > { %3569 = vmatprep.subr.bf16.mxu0 %v5249_v55  ;;  %3913 = vmatprep.subr.bf16.mxu1 %v5252_v56  ;;  %v5339_v55 = vld [vmem:[%s5726_s5 + $0xb04] ss:$16 sps:$4 sm:$0xff]   ;;  %v5342_v56 = vld [vmem:[%s5726_s5 + $0xb0c] ss:$16 sps:$4 sm:$0xff]  }
 0x13f   : > { %3570 = vmatpush1.bf16.msra.mxu0 %v5247_v57  ;;  %3914 = vmatpush1.bf16.msra.mxu1 %v5250_v58  ;;  %v5337_v57 = vld [vmem:[%s5726_s5 + $0xb00] ss:$16 sps:$4 sm:$0xff]   ;;  %v5340_v58 = vld [vmem:[%s5726_s5 + $0xb08] ss:$16 sps:$4 sm:$0xff]  }
 0x140   : > { %3571 = vmatprep.subr.bf16.mxu0 %v5255_v59  ;;  %3915 = vmatprep.subr.bf16.mxu1 %v5258_v60  ;;  %v5345_v59 = vld [vmem:[%s5726_s5 + $0xb24] ss:$16 sps:$4 sm:$0xff]   ;;  %v5348_v60 = vld [vmem:[%s5726_s5 + $0xb2c] ss:$16 sps:$4 sm:$0xff]  }
 0x143   : > { %3572 = vmatpush1.bf16.msra.mxu0 %v5253_v61  ;;  %3916 = vmatpush1.bf16.msra.mxu1 %v5256_v62  ;;  %v5343_v61 = vld [vmem:[%s5726_s5 + $0xb20] ss:$16 sps:$4 sm:$0xff]   ;;  %v5346_v62 = vld [vmem:[%s5726_s5 + $0xb28] ss:$16 sps:$4 sm:$0xff]  }
 0x144   : > { %3573 = vmatprep.subr.bf16.mxu0 %v5261_v63  ;;  %3917 = vmatprep.subr.bf16.mxu1 %v5264_v0  ;;  %v5351_v63 = vld [vmem:[%s5726_s5 + $0xb44] ss:$16 sps:$4 sm:$0xff]   ;;  %v5354_v0 = vld [vmem:[%s5726_s5 + $0xb4c] ss:$16 sps:$4 sm:$0xff]  }
 0x147   : > { %3574 = vmatpush1.bf16.msra.mxu0 %v5259_v1  ;;  %3918 = vmatpush1.bf16.msra.mxu1 %v5262_v3  ;;  %v5349_v1 = vld [vmem:[%s5726_s5 + $0xb40] ss:$16 sps:$4 sm:$0xff]   ;;  %v5352_v3 = vld [vmem:[%s5726_s5 + $0xb48] ss:$16 sps:$4 sm:$0xff]  }
 0x148   : > { %3575 = vmatprep.subr.bf16.mxu0 %v5267_v4  ;;  %3919 = vmatprep.subr.bf16.mxu1 %v5270_v5  ;;  %v5357_v4 = vld [vmem:[%s5726_s5 + $0xb64] ss:$16 sps:$4 sm:$0xff]   ;;  %v5360_v5 = vld [vmem:[%s5726_s5 + $0xb6c] ss:$16 sps:$4 sm:$0xff]  }
 0x14b   : > { %3576 = vmatpush1.bf16.msra.mxu0 %v5265_v6  ;;  %3920 = vmatpush1.bf16.msra.mxu1 %v5268_v7  ;;  %v5355_v6 = vld [vmem:[%s5726_s5 + $0xb60] ss:$16 sps:$4 sm:$0xff]   ;;  %v5358_v7 = vld [vmem:[%s5726_s5 + $0xb68] ss:$16 sps:$4 sm:$0xff]  }
 0x14c   : > { %3577 = vmatprep.subr.bf16.mxu0 %v5273_v8  ;;  %3921 = vmatprep.subr.bf16.mxu1 %v5276_v9  ;;  %v5363_v8 = vld [vmem:[%s5726_s5 + $0xb84] ss:$16 sps:$4 sm:$0xff]   ;;  %v5366_v9 = vld [vmem:[%s5726_s5 + $0xb8c] ss:$16 sps:$4 sm:$0xff]  }
 0x14f   : > { %3578 = vmatpush1.bf16.msra.mxu0 %v5271_v10  ;;  %3922 = vmatpush1.bf16.msra.mxu1 %v5274_v11  ;;  %v5361_v10 = vld [vmem:[%s5726_s5 + $0xb80] ss:$16 sps:$4 sm:$0xff]   ;;  %v5364_v11 = vld [vmem:[%s5726_s5 + $0xb88] ss:$16 sps:$4 sm:$0xff]  }
 0x150   : > { %3579 = vmatprep.subr.bf16.mxu0 %v5279_v12  ;;  %3923 = vmatprep.subr.bf16.mxu1 %v5282_v13  ;;  %v5369_v12 = vld [vmem:[%s5726_s5 + $0xba4] ss:$16 sps:$4 sm:$0xff]   ;;  %v5372_v13 = vld [vmem:[%s5726_s5 + $0xbac] ss:$16 sps:$4 sm:$0xff]  }
 0x153   : > { %3580 = vmatpush1.bf16.msra.mxu0 %v5277_v2  ;;  %3924 = vmatpush1.bf16.msra.mxu1 %v5280_v18  ;;  %v5367_v2 = vld [vmem:[%s5726_s5 + $0xba0] ss:$16 sps:$4 sm:$0xff]   ;;  %v5370_v18 = vld [vmem:[%s5726_s5 + $0xba8] ss:$16 sps:$4 sm:$0xff]  }
 0x154   : > { %3581 = vmatprep.subr.bf16.mxu0 %v5285_v19  ;;  %3925 = vmatprep.subr.bf16.mxu1 %v5288_v20  ;;  %v5375_v19 = vld [vmem:[%s5726_s5 + $0xbc4] ss:$16 sps:$4 sm:$0xff]   ;;  %v5378_v20 = vld [vmem:[%s5726_s5 + $0xbcc] ss:$16 sps:$4 sm:$0xff]  }
 0x157   : > { %3582 = vmatpush1.bf16.msra.mxu0 %v5283_v21  ;;  %3926 = vmatpush1.bf16.msra.mxu1 %v5286_v15  ;;  %v5373_v21 = vld [vmem:[%s5726_s5 + $0xbc0] ss:$16 sps:$4 sm:$0xff]   ;;  %v5376_v15 = vld [vmem:[%s5726_s5 + $0xbc8] ss:$16 sps:$4 sm:$0xff]  }
 0x158   : > { %3594 = vmatprep.subr.bf16.mxu0 %v5291_v16  ;;  %3938 = vmatprep.subr.bf16.mxu1 %v5294_v24  ;;  %v5381_v16 = vld [vmem:[%s5726_s5 + $0xbe4] ss:$16 sps:$4 sm:$0xff]   ;;  %v5384_v24 = vld [vmem:[%s5726_s5 + $0xbec] ss:$16 sps:$4 sm:$0xff]  }
 0x15a   : > { %3584 = vmatmul.mubr.bf16.vlgmr.msra.gmra.mrb[0].mxu0 %v4176_v17  ;;  %3928 = vmatmul.mubr.bf16.vlgmr.msra.gmra.mrb[0].mxu1 %v4176_v17  ;;  %v5379_v17 = vld [vmem:[%s5726_s5 + $0xbe0] ss:$16 sps:$4 sm:$0xff]  }
 0x15b   : > { %3595 = vmatpush1.bf16.msra.mxu0 %v5289_v26  ;;  %3939 = vmatpush1.bf16.msra.mxu1 %v5292_v27  ;;  %v5382_v26 = vld [vmem:[%s5726_s5 + $0xbe8] ss:$16 sps:$4 sm:$0xff]   ;;  %v5387_v27 = vld [vmem:[%s5726_s5 + $0xc04] ss:$16 sps:$4 sm:$0xff]  }
 0x15c   : > { %3596 = vmatprep.subr.bf16.mxu0 %v5297_v28  ;;  %3940 = vmatprep.subr.bf16.mxu1 %v5300_v29  ;;  %v5390_v28 = vld [vmem:[%s5726_s5 + $0xc0c] ss:$16 sps:$4 sm:$0xff]   ;;  %v4178_v29 = vcombine.low %v6109_v25, %v6114_v14  ;;  %v5393_v25 = vld [vmem:[%s5726_s5 + $0xc24] ss:$16 sps:$4 sm:$0xff]  }
 0x15d   : > { %3626 = vmatprep.mubr.bf16.mxu0 %v4179_v30  ;;  %3970 = vmatprep.mubr.bf16.mxu1 %v4179_v30  ;;  %v6189_v30 = vld [vmem:[%s6398_s0 + $0x30] sm:$0xff]  ;;  %v5396_v14 = vld [vmem:[%s5726_s5 + $0xc2c] ss:$16 sps:$4 sm:$0xff]  }
 0x15f   : > { %3597 = vmatpush1.bf16.msra.mxu0 %v5295_v22  ;;  %3941 = vmatpush1.bf16.msra.mxu1 %v5298_v23  ;;  %v6194_v22 = vld [vmem:[%s6398_s0 + $0x70] sm:$0xff] }
 0x160   : > { %3598 = vmatprep.subr.bf16.mxu0 %v5303_v31  ;;  %3942 = vmatprep.subr.bf16.mxu1 %v5306_v32  ;;  %v5385_v23 = vld [vmem:[%s5726_s5 + $0xc00] ss:$16 sps:$4 sm:$0xff]   ;;  %v5388_v31 = vld [vmem:[%s5726_s5 + $0xc08] ss:$16 sps:$4 sm:$0xff]   ;;  %v4181_v32 = vcombine.high %v6189_v30, %v6194_v22 }
 0x163   : > { %3599 = vmatpush1.bf16.msra.mxu0 %v5301_v33  ;;  %3943 = vmatpush1.bf16.msra.mxu1 %v5304_v34  ;;  %v5391_v33 = vld [vmem:[%s5726_s5 + $0xc20] ss:$16 sps:$4 sm:$0xff]   ;;  %v5394_v34 = vld [vmem:[%s5726_s5 + $0xc28] ss:$16 sps:$4 sm:$0xff]  }
 0x164   : > { %3600 = vmatprep.subr.bf16.mxu0 %v5309_v35  ;;  %3944 = vmatprep.subr.bf16.mxu1 %v5312_v36  ;;  %v5399_v35 = vld [vmem:[%s5726_s5 + $0xc44] ss:$16 sps:$4 sm:$0xff]   ;;  %v5402_v36 = vld [vmem:[%s5726_s5 + $0xc4c] ss:$16 sps:$4 sm:$0xff]  }
 0x167   : > { %3601 = vmatpush1.bf16.msra.mxu0 %v5307_v37  ;;  %3945 = vmatpush1.bf16.msra.mxu1 %v5310_v38  ;;  %v5397_v37 = vld [vmem:[%s5726_s5 + $0xc40] ss:$16 sps:$4 sm:$0xff]   ;;  %v5400_v38 = vld [vmem:[%s5726_s5 + $0xc48] ss:$16 sps:$4 sm:$0xff]  }
 0x168   : > { %3602 = vmatprep.subr.bf16.mxu0 %v5315_v39  ;;  %3946 = vmatprep.subr.bf16.mxu1 %v5318_v40  ;;  %v5405_v39 = vld [vmem:[%s5726_s5 + $0xc64] ss:$16 sps:$4 sm:$0xff]   ;;  %v5408_v40 = vld [vmem:[%s5726_s5 + $0xc6c] ss:$16 sps:$4 sm:$0xff]  }
 0x16b   : > { %3603 = vmatpush1.bf16.msra.mxu0 %v5313_v41  ;;  %3947 = vmatpush1.bf16.msra.mxu1 %v5316_v42  ;;  %v5403_v41 = vld [vmem:[%s5726_s5 + $0xc60] ss:$16 sps:$4 sm:$0xff]   ;;  %v5406_v42 = vld [vmem:[%s5726_s5 + $0xc68] ss:$16 sps:$4 sm:$0xff]  }
 0x16c   : > { %3604 = vmatprep.subr.bf16.mxu0 %v5321_v43  ;;  %3948 = vmatprep.subr.bf16.mxu1 %v5324_v44  ;;  %v5411_v43 = vld [vmem:[%s5726_s5 + $0xc84] ss:$16 sps:$4 sm:$0xff]   ;;  %v5414_v44 = vld [vmem:[%s5726_s5 + $0xc8c] ss:$16 sps:$4 sm:$0xff]  }
 0x16f   : > { %3605 = vmatpush1.bf16.msra.mxu0 %v5319_v45  ;;  %3949 = vmatpush1.bf16.msra.mxu1 %v5322_v46  ;;  %v5409_v45 = vld [vmem:[%s5726_s5 + $0xc80] ss:$16 sps:$4 sm:$0xff]   ;;  %v5412_v46 = vld [vmem:[%s5726_s5 + $0xc88] ss:$16 sps:$4 sm:$0xff]  }
 0x170   : > { %3606 = vmatprep.subr.bf16.mxu0 %v5327_v47  ;;  %3950 = vmatprep.subr.bf16.mxu1 %v5330_v48  ;;  %v5417_v47 = vld [vmem:[%s5726_s5 + $0xca4] ss:$16 sps:$4 sm:$0xff]   ;;  %v5420_v48 = vld [vmem:[%s5726_s5 + $0xcac] ss:$16 sps:$4 sm:$0xff]  }
 0x173   : > { %3607 = vmatpush1.bf16.msra.mxu0 %v5325_v49  ;;  %3951 = vmatpush1.bf16.msra.mxu1 %v5328_v50  ;;  %v5415_v49 = vld [vmem:[%s5726_s5 + $0xca0] ss:$16 sps:$4 sm:$0xff]   ;;  %v5418_v50 = vld [vmem:[%s5726_s5 + $0xca8] ss:$16 sps:$4 sm:$0xff]  }
 0x174   : > { %3608 = vmatprep.subr.bf16.mxu0 %v5333_v51  ;;  %3952 = vmatprep.subr.bf16.mxu1 %v5336_v52  ;;  %v5423_v51 = vld [vmem:[%s5726_s5 + $0xcc4] ss:$16 sps:$4 sm:$0xff]   ;;  %v5426_v52 = vld [vmem:[%s5726_s5 + $0xccc] ss:$16 sps:$4 sm:$0xff]  }
 0x177   : > { %3609 = vmatpush1.bf16.msra.mxu0 %v5331_v53  ;;  %3953 = vmatpush1.bf16.msra.mxu1 %v5334_v54  ;;  %v5421_v53 = vld [vmem:[%s5726_s5 + $0xcc0] ss:$16 sps:$4 sm:$0xff]   ;;  %v5424_v54 = vld [vmem:[%s5726_s5 + $0xcc8] ss:$16 sps:$4 sm:$0xff]  }
 0x178   : > { %3610 = vmatprep.subr.bf16.mxu0 %v5339_v55  ;;  %3954 = vmatprep.subr.bf16.mxu1 %v5342_v56  ;;  %v5429_v55 = vld [vmem:[%s5726_s5 + $0xce4] ss:$16 sps:$4 sm:$0xff]   ;;  %v5432_v56 = vld [vmem:[%s5726_s5 + $0xcec] ss:$16 sps:$4 sm:$0xff]  }
 0x17b   : > { %3611 = vmatpush1.bf16.msra.mxu0 %v5337_v57  ;;  %3955 = vmatpush1.bf16.msra.mxu1 %v5340_v58  ;;  %v5427_v57 = vld [vmem:[%s5726_s5 + $0xce0] ss:$16 sps:$4 sm:$0xff]   ;;  %v5430_v58 = vld [vmem:[%s5726_s5 + $0xce8] ss:$16 sps:$4 sm:$0xff]  }
 0x17c   : > { %3612 = vmatprep.subr.bf16.mxu0 %v5345_v59  ;;  %3956 = vmatprep.subr.bf16.mxu1 %v5348_v60  ;;  %v5435_v59 = vld [vmem:[%s5726_s5 + $0xd04] ss:$16 sps:$4 sm:$0xff]   ;;  %v5438_v60 = vld [vmem:[%s5726_s5 + $0xd0c] ss:$16 sps:$4 sm:$0xff]  }
 0x17f   : > { %3613 = vmatpush1.bf16.msra.mxu0 %v5343_v61  ;;  %3957 = vmatpush1.bf16.msra.mxu1 %v5346_v62  ;;  %v5433_v61 = vld [vmem:[%s5726_s5 + $0xd00] ss:$16 sps:$4 sm:$0xff]   ;;  %v5436_v62 = vld [vmem:[%s5726_s5 + $0xd08] ss:$16 sps:$4 sm:$0xff]  }
 0x180   : > { %3614 = vmatprep.subr.bf16.mxu0 %v5351_v63  ;;  %3958 = vmatprep.subr.bf16.mxu1 %v5354_v0  ;;  %v5441_v63 = vld [vmem:[%s5726_s5 + $0xd24] ss:$16 sps:$4 sm:$0xff]   ;;  %v5444_v0 = vld [vmem:[%s5726_s5 + $0xd2c] ss:$16 sps:$4 sm:$0xff]  }
 0x183   : > { %3615 = vmatpush1.bf16.msra.mxu0 %v5349_v1  ;;  %3959 = vmatpush1.bf16.msra.mxu1 %v5352_v3  ;;  %v5439_v1 = vld [vmem:[%s5726_s5 + $0xd20] ss:$16 sps:$4 sm:$0xff]   ;;  %v5442_v3 = vld [vmem:[%s5726_s5 + $0xd28] ss:$16 sps:$4 sm:$0xff]  }
 0x184   : > { %3616 = vmatprep.subr.bf16.mxu0 %v5357_v4  ;;  %3960 = vmatprep.subr.bf16.mxu1 %v5360_v5  ;;  %v5447_v4 = vld [vmem:[%s5726_s5 + $0xd44] ss:$16 sps:$4 sm:$0xff]   ;;  %v5450_v5 = vld [vmem:[%s5726_s5 + $0xd4c] ss:$16 sps:$4 sm:$0xff]  }
 0x187   : > { %3617 = vmatpush1.bf16.msra.mxu0 %v5355_v6  ;;  %3961 = vmatpush1.bf16.msra.mxu1 %v5358_v7  ;;  %v5445_v6 = vld [vmem:[%s5726_s5 + $0xd40] ss:$16 sps:$4 sm:$0xff]   ;;  %v5448_v7 = vld [vmem:[%s5726_s5 + $0xd48] ss:$16 sps:$4 sm:$0xff]  }
 0x188   : > { %3618 = vmatprep.subr.bf16.mxu0 %v5363_v8  ;;  %3962 = vmatprep.subr.bf16.mxu1 %v5366_v9  ;;  %v5453_v8 = vld [vmem:[%s5726_s5 + $0xd64] ss:$16 sps:$4 sm:$0xff]   ;;  %v5456_v9 = vld [vmem:[%s5726_s5 + $0xd6c] ss:$16 sps:$4 sm:$0xff]  }
 0x18b   : > { %3619 = vmatpush1.bf16.msra.mxu0 %v5361_v10  ;;  %3963 = vmatpush1.bf16.msra.mxu1 %v5364_v11  ;;  %v5451_v10 = vld [vmem:[%s5726_s5 + $0xd60] ss:$16 sps:$4 sm:$0xff]   ;;  %v5454_v11 = vld [vmem:[%s5726_s5 + $0xd68] ss:$16 sps:$4 sm:$0xff]  }
 0x18c   : > { %3620 = vmatprep.subr.bf16.mxu0 %v5369_v12  ;;  %3964 = vmatprep.subr.bf16.mxu1 %v5372_v13  ;;  %v5459_v12 = vld [vmem:[%s5726_s5 + $0xd84] ss:$16 sps:$4 sm:$0xff]   ;;  %v5462_v13 = vld [vmem:[%s5726_s5 + $0xd8c] ss:$16 sps:$4 sm:$0xff]  }
 0x18f   : > { %3621 = vmatpush1.bf16.msra.mxu0 %v5367_v2  ;;  %3965 = vmatpush1.bf16.msra.mxu1 %v5370_v18  ;;  %v5457_v2 = vld [vmem:[%s5726_s5 + $0xd80] ss:$16 sps:$4 sm:$0xff]   ;;  %v5460_v18 = vld [vmem:[%s5726_s5 + $0xd88] ss:$16 sps:$4 sm:$0xff]  }
 0x190   : > { %3622 = vmatprep.subr.bf16.mxu0 %v5375_v19  ;;  %3966 = vmatprep.subr.bf16.mxu1 %v5378_v20  ;;  %v5465_v19 = vld [vmem:[%s5726_s5 + $0xda4] ss:$16 sps:$4 sm:$0xff]   ;;  %v5468_v20 = vld [vmem:[%s5726_s5 + $0xdac] ss:$16 sps:$4 sm:$0xff]  }
 0x193   : > { %3623 = vmatpush1.bf16.msra.mxu0 %v5373_v21  ;;  %3967 = vmatpush1.bf16.msra.mxu1 %v5376_v15  ;;  %v5463_v21 = vld [vmem:[%s5726_s5 + $0xda0] ss:$16 sps:$4 sm:$0xff]   ;;  %v5466_v15 = vld [vmem:[%s5726_s5 + $0xda8] ss:$16 sps:$4 sm:$0xff]  }
 0x194   : > { %3624 = vmatprep.subr.bf16.mxu0 %v5381_v16  ;;  %3968 = vmatprep.subr.bf16.mxu1 %v5384_v24  ;;  %v5471_v16 = vld [vmem:[%s5726_s5 + $0xdc4] ss:$16 sps:$4 sm:$0xff]   ;;  %v5474_v24 = vld [vmem:[%s5726_s5 + $0xdcc] ss:$16 sps:$4 sm:$0xff]  }
 0x197   : > { %3625 = vmatpush1.bf16.msra.mxu0 %v5379_v17  ;;  %3969 = vmatpush1.bf16.msra.mxu1 %v5382_v26  ;;  %v5469_v17 = vld [vmem:[%s5726_s5 + $0xdc0] ss:$16 sps:$4 sm:$0xff]   ;;  %v5472_v26 = vld [vmem:[%s5726_s5 + $0xdc8] ss:$16 sps:$4 sm:$0xff]  }
 0x198   : > { %3637 = vmatprep.subr.bf16.mxu0 %v5387_v27  ;;  %3981 = vmatprep.subr.bf16.mxu1 %v5390_v28  ;;  %v5477_v27 = vld [vmem:[%s5726_s5 + $0xde4] ss:$16 sps:$4 sm:$0xff]   ;;  %v5480_v28 = vld [vmem:[%s5726_s5 + $0xdec] ss:$16 sps:$4 sm:$0xff]  }
 0x19a   : > { %3627 = vmatmul.mubr.bf16.vlgmr.msra.gmra.mrb[0].mxu0 %v4178_v29  ;;  %3971 = vmatmul.mubr.bf16.vlgmr.msra.gmra.mrb[0].mxu1 %v4178_v29  ;;  %v5475_v29 = vld [vmem:[%s5726_s5 + $0xde0] ss:$16 sps:$4 sm:$0xff]  }
 0x19b   : > { %3638 = vmatpush1.bf16.msra.mxu0 %v5385_v23  ;;  %3982 = vmatpush1.bf16.msra.mxu1 %v5388_v31  ;;  %v5478_v23 = vld [vmem:[%s5726_s5 + $0xde8] ss:$16 sps:$4 sm:$0xff]   ;;  %v5483_v31 = vld [vmem:[%s5726_s5 + $0xe04] ss:$16 sps:$4 sm:$0xff]  }
 0x19c   : > { %3639 = vmatprep.subr.bf16.mxu0 %v5393_v25  ;;  %3983 = vmatprep.subr.bf16.mxu1 %v5396_v14  ;;  %v5486_v25 = vld [vmem:[%s5726_s5 + $0xe0c] ss:$16 sps:$4 sm:$0xff]   ;;  %v4180_v14 = vcombine.low %v6189_v30, %v6194_v22  ;;  %v5489_v30 = vld [vmem:[%s5726_s5 + $0xe24] ss:$16 sps:$4 sm:$0xff]  }
 0x19d   : > { %3669 = vmatprep.mubr.bf16.mxu0 %v4181_v32  ;;  %4013 = vmatprep.mubr.bf16.mxu1 %v4181_v32  ;;  %v6267_v32 = vld [vmem:[%s6398_s0 + $0x38] sm:$0xff] }
 0x19e   : > { %v5492_v22 = vld [vmem:[%s5726_s5 + $0xe2c] ss:$16 sps:$4 sm:$0xff]  }
 0x19f   : > { %3640 = vmatpush1.bf16.msra.mxu0 %v5391_v33  ;;  %3984 = vmatpush1.bf16.msra.mxu1 %v5394_v34  ;;  %v6272_v33 = vld [vmem:[%s6398_s0 + $0x78] sm:$0xff]  ;;  %v5481_v34 = vld [vmem:[%s5726_s5 + $0xe00] ss:$16 sps:$4 sm:$0xff]  }
 0x1a0   : > { %3641 = vmatprep.subr.bf16.mxu0 %v5399_v35  ;;  %3985 = vmatprep.subr.bf16.mxu1 %v5402_v36  ;;  %v5484_v35 = vld [vmem:[%s5726_s5 + $0xe08] ss:$16 sps:$4 sm:$0xff]   ;;  %v4183_v36 = vcombine.high %v6267_v32, %v6272_v33 }
 0x1a3   : > { %3642 = vmatpush1.bf16.msra.mxu0 %v5397_v37  ;;  %3986 = vmatpush1.bf16.msra.mxu1 %v5400_v38  ;;  %v5487_v37 = vld [vmem:[%s5726_s5 + $0xe20] ss:$16 sps:$4 sm:$0xff]   ;;  %v5490_v38 = vld [vmem:[%s5726_s5 + $0xe28] ss:$16 sps:$4 sm:$0xff]  }
 0x1a4   : > { %3643 = vmatprep.subr.bf16.mxu0 %v5405_v39  ;;  %3987 = vmatprep.subr.bf16.mxu1 %v5408_v40  ;;  %v5495_v39 = vld [vmem:[%s5726_s5 + $0xe44] ss:$16 sps:$4 sm:$0xff]   ;;  %v5498_v40 = vld [vmem:[%s5726_s5 + $0xe4c] ss:$16 sps:$4 sm:$0xff]  }
 0x1a7   : > { %3644 = vmatpush1.bf16.msra.mxu0 %v5403_v41  ;;  %3988 = vmatpush1.bf16.msra.mxu1 %v5406_v42  ;;  %v5493_v41 = vld [vmem:[%s5726_s5 + $0xe40] ss:$16 sps:$4 sm:$0xff]   ;;  %v5496_v42 = vld [vmem:[%s5726_s5 + $0xe48] ss:$16 sps:$4 sm:$0xff]  }
 0x1a8   : > { %3645 = vmatprep.subr.bf16.mxu0 %v5411_v43  ;;  %3989 = vmatprep.subr.bf16.mxu1 %v5414_v44  ;;  %v5501_v43 = vld [vmem:[%s5726_s5 + $0xe64] ss:$16 sps:$4 sm:$0xff]   ;;  %v5504_v44 = vld [vmem:[%s5726_s5 + $0xe6c] ss:$16 sps:$4 sm:$0xff]  }
 0x1ab   : > { %3646 = vmatpush1.bf16.msra.mxu0 %v5409_v45  ;;  %3990 = vmatpush1.bf16.msra.mxu1 %v5412_v46  ;;  %v5499_v45 = vld [vmem:[%s5726_s5 + $0xe60] ss:$16 sps:$4 sm:$0xff]   ;;  %v5502_v46 = vld [vmem:[%s5726_s5 + $0xe68] ss:$16 sps:$4 sm:$0xff]  }
 0x1ac   : > { %3647 = vmatprep.subr.bf16.mxu0 %v5417_v47  ;;  %3991 = vmatprep.subr.bf16.mxu1 %v5420_v48  ;;  %v5507_v47 = vld [vmem:[%s5726_s5 + $0xe84] ss:$16 sps:$4 sm:$0xff]   ;;  %v5510_v48 = vld [vmem:[%s5726_s5 + $0xe8c] ss:$16 sps:$4 sm:$0xff]  }
 0x1af   : > { %3648 = vmatpush1.bf16.msra.mxu0 %v5415_v49  ;;  %3992 = vmatpush1.bf16.msra.mxu1 %v5418_v50  ;;  %v5505_v49 = vld [vmem:[%s5726_s5 + $0xe80] ss:$16 sps:$4 sm:$0xff]   ;;  %v5508_v50 = vld [vmem:[%s5726_s5 + $0xe88] ss:$16 sps:$4 sm:$0xff]  }
 0x1b0   : > { %3649 = vmatprep.subr.bf16.mxu0 %v5423_v51  ;;  %3993 = vmatprep.subr.bf16.mxu1 %v5426_v52  ;;  %v5513_v51 = vld [vmem:[%s5726_s5 + $0xea4] ss:$16 sps:$4 sm:$0xff]   ;;  %v5516_v52 = vld [vmem:[%s5726_s5 + $0xeac] ss:$16 sps:$4 sm:$0xff]  }
 0x1b3   : > { %3650 = vmatpush1.bf16.msra.mxu0 %v5421_v53  ;;  %3994 = vmatpush1.bf16.msra.mxu1 %v5424_v54  ;;  %v5511_v53 = vld [vmem:[%s5726_s5 + $0xea0] ss:$16 sps:$4 sm:$0xff]   ;;  %v5514_v54 = vld [vmem:[%s5726_s5 + $0xea8] ss:$16 sps:$4 sm:$0xff]  }
 0x1b4   : > { %3651 = vmatprep.subr.bf16.mxu0 %v5429_v55  ;;  %3995 = vmatprep.subr.bf16.mxu1 %v5432_v56  ;;  %v5519_v55 = vld [vmem:[%s5726_s5 + $0xec4] ss:$16 sps:$4 sm:$0xff]   ;;  %v5522_v56 = vld [vmem:[%s5726_s5 + $0xecc] ss:$16 sps:$4 sm:$0xff]  }
 0x1b7   : > { %3652 = vmatpush1.bf16.msra.mxu0 %v5427_v57  ;;  %3996 = vmatpush1.bf16.msra.mxu1 %v5430_v58  ;;  %v5517_v57 = vld [vmem:[%s5726_s5 + $0xec0] ss:$16 sps:$4 sm:$0xff]   ;;  %v5520_v58 = vld [vmem:[%s5726_s5 + $0xec8] ss:$16 sps:$4 sm:$0xff]  }
 0x1b8   : > { %3653 = vmatprep.subr.bf16.mxu0 %v5435_v59  ;;  %3997 = vmatprep.subr.bf16.mxu1 %v5438_v60  ;;  %v5525_v59 = vld [vmem:[%s5726_s5 + $0xee4] ss:$16 sps:$4 sm:$0xff]   ;;  %v5528_v60 = vld [vmem:[%s5726_s5 + $0xeec] ss:$16 sps:$4 sm:$0xff]  }
 0x1bb   : > { %3654 = vmatpush1.bf16.msra.mxu0 %v5433_v61  ;;  %3998 = vmatpush1.bf16.msra.mxu1 %v5436_v62  ;;  %v5523_v61 = vld [vmem:[%s5726_s5 + $0xee0] ss:$16 sps:$4 sm:$0xff]   ;;  %v5526_v62 = vld [vmem:[%s5726_s5 + $0xee8] ss:$16 sps:$4 sm:$0xff]  }
 0x1bc   : > { %3655 = vmatprep.subr.bf16.mxu0 %v5441_v63  ;;  %3999 = vmatprep.subr.bf16.mxu1 %v5444_v0  ;;  %v5531_v63 = vld [vmem:[%s5726_s5 + $0xf04] ss:$16 sps:$4 sm:$0xff]   ;;  %v5534_v0 = vld [vmem:[%s5726_s5 + $0xf0c] ss:$16 sps:$4 sm:$0xff]  }
 0x1bf   : > { %3656 = vmatpush1.bf16.msra.mxu0 %v5439_v1  ;;  %4000 = vmatpush1.bf16.msra.mxu1 %v5442_v3  ;;  %v5529_v1 = vld [vmem:[%s5726_s5 + $0xf00] ss:$16 sps:$4 sm:$0xff]   ;;  %v5532_v3 = vld [vmem:[%s5726_s5 + $0xf08] ss:$16 sps:$4 sm:$0xff]  }
 0x1c0   : > { %3657 = vmatprep.subr.bf16.mxu0 %v5447_v4  ;;  %4001 = vmatprep.subr.bf16.mxu1 %v5450_v5  ;;  %v5537_v4 = vld [vmem:[%s5726_s5 + $0xf24] ss:$16 sps:$4 sm:$0xff]   ;;  %v5540_v5 = vld [vmem:[%s5726_s5 + $0xf2c] ss:$16 sps:$4 sm:$0xff]  }
 0x1c3   : > { %3658 = vmatpush1.bf16.msra.mxu0 %v5445_v6  ;;  %4002 = vmatpush1.bf16.msra.mxu1 %v5448_v7  ;;  %v5535_v6 = vld [vmem:[%s5726_s5 + $0xf20] ss:$16 sps:$4 sm:$0xff]   ;;  %v5538_v7 = vld [vmem:[%s5726_s5 + $0xf28] ss:$16 sps:$4 sm:$0xff]  }
 0x1c4   : > { %3659 = vmatprep.subr.bf16.mxu0 %v5453_v8  ;;  %4003 = vmatprep.subr.bf16.mxu1 %v5456_v9  ;;  %v5543_v8 = vld [vmem:[%s5726_s5 + $0xf44] ss:$16 sps:$4 sm:$0xff]   ;;  %v5546_v9 = vld [vmem:[%s5726_s5 + $0xf4c] ss:$16 sps:$4 sm:$0xff]  }
 0x1c7   : > { %3660 = vmatpush1.bf16.msra.mxu0 %v5451_v10  ;;  %4004 = vmatpush1.bf16.msra.mxu1 %v5454_v11  ;;  %v5541_v10 = vld [vmem:[%s5726_s5 + $0xf40] ss:$16 sps:$4 sm:$0xff]   ;;  %v5544_v11 = vld [vmem:[%s5726_s5 + $0xf48] ss:$16 sps:$4 sm:$0xff]  }
 0x1c8   : > { %3661 = vmatprep.subr.bf16.mxu0 %v5459_v12  ;;  %4005 = vmatprep.subr.bf16.mxu1 %v5462_v13  ;;  %v5549_v12 = vld [vmem:[%s5726_s5 + $0xf64] ss:$16 sps:$4 sm:$0xff]   ;;  %v5552_v13 = vld [vmem:[%s5726_s5 + $0xf6c] ss:$16 sps:$4 sm:$0xff]  }
 0x1cb   : > { %3662 = vmatpush1.bf16.msra.mxu0 %v5457_v2  ;;  %4006 = vmatpush1.bf16.msra.mxu1 %v5460_v18  ;;  %v5547_v2 = vld [vmem:[%s5726_s5 + $0xf60] ss:$16 sps:$4 sm:$0xff]   ;;  %v5550_v18 = vld [vmem:[%s5726_s5 + $0xf68] ss:$16 sps:$4 sm:$0xff]  }
 0x1cc   : > { %3663 = vmatprep.subr.bf16.mxu0 %v5465_v19  ;;  %4007 = vmatprep.subr.bf16.mxu1 %v5468_v20  ;;  %v5555_v19 = vld [vmem:[%s5726_s5 + $0xf84] ss:$16 sps:$4 sm:$0xff]   ;;  %v5558_v20 = vld [vmem:[%s5726_s5 + $0xf8c] ss:$16 sps:$4 sm:$0xff]  }
 0x1cf   : > { %3664 = vmatpush1.bf16.msra.mxu0 %v5463_v21  ;;  %4008 = vmatpush1.bf16.msra.mxu1 %v5466_v15  ;;  %v5553_v21 = vld [vmem:[%s5726_s5 + $0xf80] ss:$16 sps:$4 sm:$0xff]   ;;  %v5556_v15 = vld [vmem:[%s5726_s5 + $0xf88] ss:$16 sps:$4 sm:$0xff]  }
 0x1d0   : > { %3665 = vmatprep.subr.bf16.mxu0 %v5471_v16  ;;  %4009 = vmatprep.subr.bf16.mxu1 %v5474_v24  ;;  %v5561_v16 = vld [vmem:[%s5726_s5 + $0xfa4] ss:$16 sps:$4 sm:$0xff]   ;;  %v5564_v24 = vld [vmem:[%s5726_s5 + $0xfac] ss:$16 sps:$4 sm:$0xff]  }
 0x1d3   : > { %3666 = vmatpush1.bf16.msra.mxu0 %v5469_v17  ;;  %4010 = vmatpush1.bf16.msra.mxu1 %v5472_v26  ;;  %v5559_v17 = vld [vmem:[%s5726_s5 + $0xfa0] ss:$16 sps:$4 sm:$0xff]   ;;  %v5562_v26 = vld [vmem:[%s5726_s5 + $0xfa8] ss:$16 sps:$4 sm:$0xff]  }
 0x1d4   : > { %3667 = vmatprep.subr.bf16.mxu0 %v5477_v27  ;;  %4011 = vmatprep.subr.bf16.mxu1 %v5480_v28  ;;  %v5567_v27 = vld [vmem:[%s5726_s5 + $0xfc4] ss:$16 sps:$4 sm:$0xff]   ;;  %v5570_v28 = vld [vmem:[%s5726_s5 + $0xfcc] ss:$16 sps:$4 sm:$0xff]  }
 0x1d7   : > { %3668 = vmatpush1.bf16.msra.mxu0 %v5475_v29  ;;  %4012 = vmatpush1.bf16.msra.mxu1 %v5478_v23  ;;  %v5565_v29 = vld [vmem:[%s5726_s5 + $0xfc0] ss:$16 sps:$4 sm:$0xff]   ;;  %v5568_v23 = vld [vmem:[%s5726_s5 + $0xfc8] ss:$16 sps:$4 sm:$0xff]  }
 0x1d8   : > { %3680 = vmatprep.subr.bf16.mxu0 %v5483_v31  ;;  %4024 = vmatprep.subr.bf16.mxu1 %v5486_v25  ;;  %v5573_v31 = vld [vmem:[%s5726_s5 + $0xfe4] ss:$16 sps:$4 sm:$0xff]   ;;  %v5576_v25 = vld [vmem:[%s5726_s5 + $0xfec] ss:$16 sps:$4 sm:$0xff]  }
 0x1da   : > { %3670 = vmatmul.mubr.bf16.vlgmr.msra.gmra.mrb[0].mxu0 %v4180_v14  ;;  %4014 = vmatmul.mubr.bf16.vlgmr.msra.gmra.mrb[0].mxu1 %v4180_v14  ;;  %v5571_v14 = vld [vmem:[%s5726_s5 + $0xfe0] ss:$16 sps:$4 sm:$0xff]  }
 0x1db   : > { %3681 = vmatpush1.bf16.msra.mxu0 %v5481_v34  ;;  %4025 = vmatpush1.bf16.msra.mxu1 %v5484_v35  ;;  %v5574_v34 = vld [vmem:[%s5726_s5 + $0xfe8] ss:$16 sps:$4 sm:$0xff]   ;;  %v4182_v35 = vcombine.low %v6267_v32, %v6272_v33  ;;  %s175_s5 = sand.u32 1, %s5631_s13  }
 0x1dc   : > { %3682 = vmatprep.subr.bf16.mxu0 %v5489_v30  ;;  %4026 = vmatprep.subr.bf16.mxu1 %v5492_v22  ;;  %v719_v30 = vlaneseq  ;;  %s4164_s30 = sshll.u32 %s175_s5, 6  ;;  %s6357_s10 = scalar_lea.sflag [#allocation3], %s175_s5 }
 0x1dd   : > { %3712 = vmatprep.mubr.bf16.mxu0 %v4183_v36  ;;  %4056 = vmatprep.mubr.bf16.mxu1 %v4183_v36  ;;  %s177_s4 = scalar_lea.vmem [#allocation2], %s4164_s30 }
 0x1de   : > { %v720_v22 = vshrl.u32 %v719_v30, 7  ;;  %s4089_s6 = sshll.u32 %s177_s4, 4  ;;  %s6348_s6 = int_to_ptr.vmem [resolvable:$true] %s4089_s6 }
 0x1df   : > { %3683 = vmatpush1.bf16.msra.mxu0 %v5487_v37  ;;  %4027 = vmatpush1.bf16.msra.mxu1 %v5490_v38  ;;  %v717_v38 = vld [vmem:[%s186_s29] sm:$0xf]  ;;  %s5577_s11 = scalar_lea.vmem %s6348_s6, 1024  ;;  %p5584_p1 = scmp.lt.s32.totalorder %s6348_s6, %s5582_s19 }
 0x1e0   : > { %3684 = vmatprep.subr.bf16.mxu0 %v5495_v39  ;;  %4028 = vmatprep.subr.bf16.mxu1 %v5498_v40  ;;  %v721_v36 = vsub.s32 0, %v720_v22  ;;  %v729_v37 = vsub.s32 2, %v720_v22  ;;  %v725_v32 = vsub.s32 1, %v720_v22  ;;  %v733_v33 = vsub.s32 3, %v720_v22  ;;  %p5578_p12 = scmp.ne.s32.totalorder %s6348_s6, %s5577_s11  ;;  %p5585_p2 = scmp.lt.s32.totalorder %s5583_s20, %s5577_s11 }
 0x1e2   : > { %v722_v39 = vrot.slane %v717_v38, %v721_v36  ;;  %v730_v40 = vrot.slane %v717_v38, %v729_v37  ;;  %p5579_p13 = pnand %p5578_p12, %p5703_p5  ;;  %p5586_p3 = por %p5585_p2, %p5584_p1 }
 0x1e3   : > { %3685 = vmatpush1.bf16.msra.mxu0 %v5493_v41  ;;  %4029 = vmatpush1.bf16.msra.mxu1 %v5496_v42  ;;  %v726_v41 = vrot.slane %v717_v38, %v725_v32  ;;  %v734_v42 = vrot.slane %v717_v38, %v733_v33 }
 0x1e4   : > { %3686 = vmatprep.subr.bf16.mxu0 %v5501_v43  ;;  %4030 = vmatprep.subr.bf16.mxu1 %v5504_v44  ;;  %p5580_p0 = pneg %p5579_p13 }
 0x1e6   : > { %p5587_p4 = pnand %p5586_p3, %p5580_p0 }
 0x1e7   : > { %3687 = vmatpush1.bf16.msra.mxu0 %v5499_v45  ;;  %4031 = vmatpush1.bf16.msra.mxu1 %v5502_v46 }
 0x1e8   : > { %3688 = vmatprep.subr.bf16.mxu0 %v5507_v47  ;;  %4032 = vmatprep.subr.bf16.mxu1 %v5510_v48 }
 0x1eb   : > { %3689 = vmatpush1.bf16.msra.mxu0 %v5505_v49  ;;  %4033 = vmatpush1.bf16.msra.mxu1 %v5508_v50 }
 0x1ec   : > { %3690 = vmatprep.subr.bf16.mxu0 %v5513_v51  ;;  %4034 = vmatprep.subr.bf16.mxu1 %v5516_v52 }
 0x1ef   : > { %3691 = vmatpush1.bf16.msra.mxu0 %v5511_v53  ;;  %4035 = vmatpush1.bf16.msra.mxu1 %v5514_v54 }
 0x1f0   : > { %3692 = vmatprep.subr.bf16.mxu0 %v5519_v55  ;;  %4036 = vmatprep.subr.bf16.mxu1 %v5522_v56 }
 0x1f3   : > { %3693 = vmatpush1.bf16.msra.mxu0 %v5517_v57  ;;  %4037 = vmatpush1.bf16.msra.mxu1 %v5520_v58 }
 0x1f4   : > { %3694 = vmatprep.subr.bf16.mxu0 %v5525_v59  ;;  %4038 = vmatprep.subr.bf16.mxu1 %v5528_v60 }
 0x1f7   : > { %3695 = vmatpush1.bf16.msra.mxu0 %v5523_v61  ;;  %4039 = vmatpush1.bf16.msra.mxu1 %v5526_v62 }
 0x1f8   : > { %3696 = vmatprep.subr.bf16.mxu0 %v5531_v63  ;;  %4040 = vmatprep.subr.bf16.mxu1 %v5534_v0 }
 0x1fb   : > { %3697 = vmatpush1.bf16.msra.mxu0 %v5529_v1  ;;  %4041 = vmatpush1.bf16.msra.mxu1 %v5532_v3 }
 0x1fc   : > { %3698 = vmatprep.subr.bf16.mxu0 %v5537_v4  ;;  %4042 = vmatprep.subr.bf16.mxu1 %v5540_v5 }
 0x1ff   : > { %3699 = vmatpush1.bf16.msra.mxu0 %v5535_v6  ;;  %4043 = vmatpush1.bf16.msra.mxu1 %v5538_v7 }
 0x200   : > { %3700 = vmatprep.subr.bf16.mxu0 %v5543_v8  ;;  %4044 = vmatprep.subr.bf16.mxu1 %v5546_v9 }
 0x203   : > { %3701 = vmatpush1.bf16.msra.mxu0 %v5541_v10  ;;  %4045 = vmatpush1.bf16.msra.mxu1 %v5544_v11 }
 0x204   : > { %3702 = vmatprep.subr.bf16.mxu0 %v5549_v12  ;;  %4046 = vmatprep.subr.bf16.mxu1 %v5552_v13 }
 0x207   : > { %3703 = vmatpush1.bf16.msra.mxu0 %v5547_v2  ;;  %4047 = vmatpush1.bf16.msra.mxu1 %v5550_v18 }
 0x208   : > { %3704 = vmatprep.subr.bf16.mxu0 %v5555_v19  ;;  %4048 = vmatprep.subr.bf16.mxu1 %v5558_v20 }
 0x20b   : > { %3705 = vmatpush1.bf16.msra.mxu0 %v5553_v21  ;;  %4049 = vmatpush1.bf16.msra.mxu1 %v5556_v15 }
 0x20c   : > { %3706 = vmatprep.subr.bf16.mxu0 %v5561_v16  ;;  %4050 = vmatprep.subr.bf16.mxu1 %v5564_v24 }
 0x20f   : > { %3707 = vmatpush1.bf16.msra.mxu0 %v5559_v17  ;;  %4051 = vmatpush1.bf16.msra.mxu1 %v5562_v26 }
 0x210   : > { %3708 = vmatprep.subr.bf16.mxu0 %v5567_v27  ;;  %4052 = vmatprep.subr.bf16.mxu1 %v5570_v28 }
 0x213   : > { %3709 = vmatpush1.bf16.msra.mxu0 %v5565_v29  ;;  %4053 = vmatpush1.bf16.msra.mxu1 %v5568_v23 }
 0x214   : > { %3710 = vmatprep.subr.bf16.mxu0 %v5573_v31  ;;  %4054 = vmatprep.subr.bf16.mxu1 %v5576_v25 }
 0x217   : > { %3711 = vmatpush1.bf16.msra.mxu0 %v5571_v14  ;;  %4055 = vmatpush1.bf16.msra.mxu1 %v5574_v34 }
 0x21a   : > { %3713 = vmatmul.mubr.bf16.vlgmr.msra.gmra.mrb[0].mxu0 %v4182_v35  ;;  %4057 = vmatmul.mubr.bf16.vlgmr.msra.gmra.mrb[0].mxu1 %v4182_v35 }
 0x2ed   : > { %v3714_v43 = vpop.f32.mrb[0].mxu0  ;;  %v4058_v44 = vpop.f32.mrb[0].mxu1 }
 0x2ee   : > { %v4703_v45 = vadd.f32 %v3714_v43, %v722_v39  ;;  %v4707_v46 = vadd.f32 %v4058_v44, %v730_v40  ;;  %v3716_v47 = vpop.f32.mrb[1].mxu0  ;;  %v4060_v48 = vpop.f32.mrb[1].mxu1 }
 0x2ef   : > { %v4704_v49 = vadd.f32 %v3716_v47, %v726_v41  ;;  %v4708_v50 = vadd.f32 %v4060_v48, %v734_v42  ;;  %v3718_v51 = vpop.f32.mrb[2].mxu0  ;;  %v4062_v52 = vpop.f32.mrb[2].mxu1 }
 0x2f0   : > { %4067 = vst [vmem:[%s177_s4] sm:$0xff] %v4703_v45  ;;  %4069 = vst [vmem:[%s177_s4 + $0x10] sm:$0xff] %v4707_v46  ;;  %v4705_v53 = vadd.f32 %v3718_v51, %v722_v39  ;;  %v4709_v54 = vadd.f32 %v4062_v52, %v730_v40  ;;  %v3720_v55 = vpop.f32.mrb[3].mxu0  ;;  %v4064_v56 = vpop.f32.mrb[3].mxu1 }
 0x2f1   : > { %4068 = vst [vmem:[%s177_s4 + $0x8] sm:$0xff] %v4704_v49  ;;  %4070 = vst [vmem:[%s177_s4 + $0x18] sm:$0xff] %v4708_v50  ;;  %v4706_v57 = vadd.f32 %v3720_v55, %v726_v41  ;;  %v4710_v58 = vadd.f32 %v4064_v56, %v734_v42 }
 0x2f2   : > { %4071 = vst [vmem:[%s177_s4 + $0x20] sm:$0xff] %v4705_v53  ;;  %4073 = vst [vmem:[%s177_s4 + $0x30] sm:$0xff] %v4709_v54 }
 0x2f3   : > { %4072 = vst [vmem:[%s177_s4 + $0x28] sm:$0xff] %v4706_v57  ;;  %4074 = vst [vmem:[%s177_s4 + $0x38] sm:$0xff] %v4710_v58 }
 0x2f4   : > { %5590 = shalt.err (!%p5587_p4)
}
 0x2f5   : > { %s5591_s24 = scalar_lea.hbm %s6353_s9, 1024  ;;  %s5595_s27 = scalar_lea.hbm %s6401_s3, 4096 }
 0x2f6   : > { %p5592_p7 = scmp.ne.s32.totalorder %s6353_s9, %s5591_s24  ;;  %p5596_p10 = scmp.lt.u32.totalorder %s6353_s9, %s6401_s3 }
 0x2f7   : > { %p5597_p11 = scmp.lt.u32.totalorder %s5595_s27, %s5591_s24  ;;  %p5599_p13 = scmp.lt.u32.totalorder %s5591_s24, %s6353_s9 }
 0x2f8   : > { %p5593_p8 = pnand %p5592_p7, %p5703_p5 }
 0x2f9   : > { %p5598_p12 = por %p5597_p11, %p5596_p10 }
 0x2fa   : > { %p5594_p9 = pneg %p5593_p8 }
 0x2fb   : > { %p5600_p0 = por %p5599_p13, %p5598_p12 }
 0x2fd   : > { %p5601_p1 = pnand %p5600_p0, %p5594_p9 }
 0x2ff   : > { %5604 = shalt.err (!%p5601_p1)
}
 0x300   : > { %s5642_s5 = smov 512   ;;  %s5643_s30 = smov 2048  }
 0x301   : > { %s5644_s4 = smov 32  }
 0x302   : > { %4767 = dma.vmem_to_hbm [thread:$0]  (%p5703_p5), %s6348_s6, 1024, %s6353_s9, %s6357_s10, %s5642_s5, %s5643_s30, %s5644_s4  }
 0x303 PF: > { %p4773_p2 = scmp.ge.s32.totalorder %s5639_s15, 2  ;;  %s4104_s7 = sand.u32 1, %s5627_s12  }
 0x304   : > { %s4105_s16 = scalar_lea.sflag [#allocation3], %s4104_s7 }
 0x305   : > { %p4770_p3 = pnand %p4773_p2, %p5707_p6 }
 0x307   : > { %5622 = dma.done.wait (!%p4770_p3), %s4105_s16, 1024  }
 0x308   : > { %5624 = vsyncadd (!%p4770_p3), %s4105_s16, 4294966272  ;;  %p13_p4 = scmp.ge.s32.totalorder %s5690_s18, 6   ;;  %s6404_s12 = smov %s5631_s13 }
 0x309   : > { %s6405_s13 = smov %s5635_s14  ;;  %s6406_s14 = smov %s5701_s21 }
 0x30a   : > { %s6407_s15 = smov %s5690_s18  ;;  %15 = sbr.rel (!%p13_p4) target bundleno = 3 (0x3), region = 70 }
 0x311   :  { %4110 = vsyncpa [#allocation3], 1 }
 0x312   :  { %4112 = vsyncpa [#allocation3 + $0x1], 1 }

// kernel: bcnet_forward.2
= control target key start
LH: loop header
LB: loop body
LE: loop exit
PB: predicated region body
PF: predicated region fallthrough
CT: control target
= control target key end

     0   :  { %s7787_s0 = inlined_call_operand.vmem [shape: bf16[16,2048], index: 0, kind: input, shape index: {}]   ;;  %s7788_s1 = inlined_call_operand.vmem [shape: bf16[32,128], index: 1, kind: input, shape index: {}]   ;;  %s7789_s2 = inlined_call_operand.hbm [shape: bf16[4,2048,512], index: 2, kind: input, shape index: {}]   ;;  %s7790_s3 = inlined_call_operand.hbm [shape: f32[1,2048], index: 3, kind: input, shape index: {}]   ;;  %s7791_s4 = inlined_call_operand.hbm [shape: bf16[4,128,512], index: 4, kind: input, shape index: {}]   ;;  %s7792_s5 = inlined_call_operand.hbm [shape: f32[1,2048], index: 5, kind: input, shape index: {}]   ;;  %s7793_s6 = inlined_call_operand.vmem [shape: f32[16,32], index: 6, kind: input, shape index: {}]   ;;  %s7794_s7 = inlined_call_operand.<no memory space> [shape: f32[1,1], index: 7, kind: input, shape index: {}]   ;;  %s7795_s8 = inlined_call_operand.vmem [shape: bf16[16,2048], index: 8, kind: output, shape index: {}]  }
   0x1   :  { %7800 = sst [smem:[#allocation15_spill]] %s7789_s2  ;;  %v13_v0 = vstv %s7794_s7 }
   0x2   :  { %7801 = sst [smem:[#allocation16_spill]] %s7790_s3  ;;  %14 = vst [vmem:[#allocation2] sm:$0x1] %v13_v0 }
   0x3   :  { %15 = vsyncpa [#allocation4], 0 }
   0x4   :  { %17 = vsyncpa [#allocation4 + $0x1], 0 }
   0x5   :  { %18 = vsyncpa [#allocation6], 0 }
   0x6   :  { %20 = vsyncpa [#allocation6 + $0x1], 0 }
   0x7   :  { %21 = vsyncpa [#allocation9], 0 }
   0x8   :  { %23 = vsyncpa [#allocation9 + $0x1], 0  ;;  %s6831_s29 = smov 0   ;;  %s6833_s30 = smov 0  }
   0x9   :  { %s6835_s9 = smov 0   ;;  %s6837_s10 = smov 0  }
   0xa LB: > { %s6850_s7 = sadd.s32 4294967295, %s6773_s10   ;;  %s6853_s11 = sadd.s32 1, %s6773_s10   ;;  %s6773_s10 = sphi %s6837_s10, %s7820_s10   ;;  %s6769_s9 = sphi %s6835_s9, %s7819_s9   ;;  %s6765_s30 = sphi %s6833_s30, %s7818_s30   ;;  %s6761_s29 = sphi %s6831_s29, %s7817_s29  }
   0xb   : > { %s75_s12 = ssub.s32 %s6773_s10, %s6853_s11  ;;  %s78_s13 = sadd.s32 1, %s6769_s9 }
   0xc   : > { %p76_p0 = scmp.eq.s32.totalorder %s75_s12, 0  ;;  %p85_p1 = scmp.ne.s32.totalorder %s6769_s9, %s6765_s30 }
   0xd   : > { %p86_p2 = scmp.eq.s32.totalorder %s6773_s10, 0  ;;  %p91_p3 = scmp.ne.s32.totalorder %s6765_s30, %s6761_s29 }
   0xe   : > { %s6863_s14 = scalar_select %p76_p0, %s6769_s9, %s78_s13  }
   0xf   : > { %p87_p4 = por %p86_p2, %p85_p1  ;;  %p92_p5 = scmp.eq.s32.totalorder %s6850_s7, 0 }
  0x10   : > { %7802 = sst [smem:[#allocation14_spill]] %s6863_s14  ;;  %p235_p6 = scmp.eq.s32.totalorder %s6850_s7, 3 }
  0x11   : > { %p6867_p7 = por %p92_p5, %p91_p3  ;;  %p5756_p8 = scmp.lt.s32.totalorder %s6773_s10, 4 }
  0x12   : > { %p6872_p9 = por %p235_p6, %p85_p1  ;;  %s6877_s17 = sand.u32 1, %s6769_s9  }
  0x13   : > { %s7803_s15 = scalar_select %p6867_p7, 1, 0 }
  0x14   : > { %s7804_s16 = scalar_select %p6872_p9, 1, 0 }
  0x15   : > { %p6879_p10 = pnand %p5756_p8, %p87_p4  ;;  %s294_s19 = sand.u32 1, %s6773_s10  }
  0x16   : > { %s7797_s20 = sshll.u32 %s6877_s17, 2  ;;  %s7798_s21 = sshll.u32 %s6773_s10, 6 }
  0x17   : > { %s7805_s18 = scalar_select %p6879_p10, 1, 0 }
  0x18   : > { %s298_s22 = scalar_lea.vmem [#allocation5], %s7797_s20  ;;  %s7806_s3 = sld [smem:[#allocation16_spill]] }
  0x19   : > { %s306_s23 = sshll.u32 %s298_s22, 4  ;;  %s6897_s27 = scalar_lea.sflag [#allocation6], %s294_s19  ;;  %s6895_s23 = int_to_ptr.vmem [resolvable:$true] %s306_s23 }
  0x1a   : > { %p6903_p12 = pneg %p6879_p10 }
  0x1e   : > { %s6893_s26 = scalar_lea.hbm %s7806_s3, %s7798_s21  ;;  %s6616_s22 = scalar_lea.hbm %s7806_s3, 256 }
  0x1f   : > { %s6611_s28 = scalar_lea.hbm %s6893_s26, 64  ;;  %p6617_p1 = scmp.lt.u32.totalorder %s6893_s26, %s7806_s3 }
  0x20   : > { %p6612_p11 = scmp.ne.s32.totalorder %s6893_s26, %s6611_s28  ;;  %p6618_p2 = scmp.lt.u32.totalorder %s6616_s22, %s6611_s28 }
  0x21   : > { %p6620_p4 = scmp.lt.u32.totalorder %s6611_s28, %s6893_s26 }
  0x22   : > { %p6614_p13 = pnand %p6903_p12, %p6612_p11  ;;  %p6619_p3 = por %p6618_p2, %p6617_p1 }
  0x24   : > { %p6615_p0 = pneg %p6614_p13  ;;  %p6621_p5 = por %p6620_p4, %p6619_p3 }
  0x26   : > { %p6622_p6 = pnand %p6621_p5, %p6615_p0 }
  0x28   : > { %6625 = shalt.err (!%p6622_p6)
}
  0x29   : > { %s6626_s19 = scalar_lea.vmem %s6895_s23, 64  ;;  %s6775_s12 = smov [#allocation5]  }
  0x2a   : > { %p6627_p8 = scmp.ne.s32.totalorder %s6895_s23, %s6626_s19  ;;  %s6631_s13 = sshll.u32 %s6775_s12, 4  ;;  %s6632_s13 = int_to_ptr.vmem [resolvable:$false] %s6631_s13 }
  0x2b   : > { %s6633_s24 = scalar_lea.vmem %s6632_s13, 128  ;;  %p6634_p9 = scmp.lt.s32.totalorder %s6895_s23, %s6632_s13 }
  0x2c   : > { %p6629_p11 = pnand %p6627_p8, %p6903_p12  ;;  %p6635_p7 = scmp.lt.s32.totalorder %s6633_s24, %s6626_s19 }
  0x2e   : > { %p6630_p13 = pneg %p6629_p11  ;;  %p6636_p1 = por %p6635_p7, %p6634_p9 }
  0x30   : > { %p6637_p2 = pnand %p6636_p1, %p6630_p13 }
  0x32   : > { %6640 = shalt.err (!%p6637_p2)
}
  0x33   : > { %5749 = dma.hbm_to_vmem [thread:$0]  (!%p6879_p10), %s6893_s26, 64, %s6895_s23, %s6897_s27  }
  0x34   : > { %p5063_p0 = scmp.ge.s32.totalorder %s6773_s10, 1  ;;  %p351_p3 = scmp.lt.s32.totalorder %s6773_s10, 5 }
  0x35   : > { %s5051_s28 = sshll.u32 %s6877_s17, 12  ;;  %s5644_s25 = sshll.u32 %s6773_s10, 16 }
  0x36   : > { %p6930_p4 = pnand %p5063_p0, %p351_p3  ;;  %s277_s19 = scalar_lea.vmem [#allocation3], %s5051_s28 }
  0x37   : > { %s284_s12 = sshll.u32 %s277_s19, 4  ;;  %s7809_s2 = sld [smem:[#allocation15_spill]]  ;;  %s6940_s12 = int_to_ptr.vmem [resolvable:$true] %s284_s12 }
  0x38   : > { %s7808_s22 = scalar_select %p6930_p4, 1, 0 }
  0x39   : > { %s274_s23 = scalar_lea.sflag [#allocation4], %s6877_s17 }
  0x3d   : > { %s6938_s20 = scalar_lea.hbm %s7809_s2, %s5644_s25  ;;  %s6646_s19 = scalar_lea.hbm %s7809_s2, 262144 }
  0x3e   : > { %s6641_s26 = scalar_lea.hbm %s6938_s20, 65536  ;;  %p6647_p6 = scmp.lt.u32.totalorder %s6938_s20, %s7809_s2 }
  0x3f   : > { %p6642_p7 = scmp.ne.s32.totalorder %s6938_s20, %s6641_s26  ;;  %p6648_p8 = scmp.lt.u32.totalorder %s6646_s19, %s6641_s26 }
  0x40   : > { %p6650_p13 = scmp.lt.u32.totalorder %s6641_s26, %s6938_s20 }
  0x41   : > { %p6644_p9 = pnand %p6642_p7, %p6903_p12  ;;  %p6649_p11 = por %p6648_p8, %p6647_p6 }
  0x43   : > { %p6645_p5 = pneg %p6644_p9  ;;  %p6651_p1 = por %p6650_p13, %p6649_p11 }
  0x45   : > { %p6652_p2 = pnand %p6651_p1, %p6645_p5 }
  0x47   : > { %6655 = shalt.err (!%p6652_p2)
}
  0x48   : > { %s6656_s25 = scalar_lea.vmem %s6940_s12, 65536  ;;  %s6776_s21 = smov [#allocation3]  }
  0x49   : > { %p6657_p0 = scmp.ne.s32.totalorder %s6940_s12, %s6656_s25  ;;  %s6661_s24 = sshll.u32 %s6776_s21, 4  ;;  %s6662_s24 = int_to_ptr.vmem [resolvable:$false] %s6661_s24 }
  0x4a   : > { %s6663_s3 = scalar_lea.vmem %s6662_s24, 131072  ;;  %p6664_p9 = scmp.lt.s32.totalorder %s6940_s12, %s6662_s24 }
  0x4b   : > { %p6659_p3 = pnand %p6657_p0, %p6903_p12  ;;  %p6665_p4 = scmp.lt.s32.totalorder %s6663_s3, %s6656_s25 }
  0x4d   : > { %p6660_p7 = pneg %p6659_p3  ;;  %p6666_p6 = por %p6665_p4, %p6664_p9 }
  0x4f   : > { %p6667_p8 = pnand %p6666_p6, %p6660_p7 }
  0x51   : > { %6670 = shalt.err (!%p6667_p8)
}
  0x52   : > { %s6777_s26 = smov 256   ;;  %s6778_s28 = smov 16  }
  0x53   : > { %5746 = dma.hbm_to_vmem [thread:$0]  (!%p6879_p10), %s6938_s20, 65536, %s6940_s12, %s274_s23, %s6777_s26, %s6777_s26, %s6778_s28  }
  0x54   : > { %s5057_s19 = sshll.u32 %s6877_s17, 8  ;;  %s5646_s13 = sshll.u32 %s6773_s10, 12 }
  0x55   : > { %s6974_s24 = scalar_lea.hbm %s7791_s4, %s5646_s13  ;;  %s317_s3 = scalar_lea.vmem [#allocation7], %s5057_s19 }
  0x56   : > { %s324_s2 = sshll.u32 %s317_s3, 4  ;;  %s6671_s14 = scalar_lea.hbm %s6974_s24, 4096  ;;  %s6976_s2 = int_to_ptr.vmem [resolvable:$true] %s324_s2 }
  0x57   : > { %p6672_p4 = scmp.ne.s32.totalorder %s6974_s24, %s6671_s14  ;;  %s6676_s23 = scalar_lea.hbm %s7791_s4, 16384 }
  0x58   : > { %p6677_p13 = scmp.lt.u32.totalorder %s6974_s24, %s7791_s4  ;;  %p6678_p1 = scmp.lt.u32.totalorder %s6676_s23, %s6671_s14 }
  0x59   : > { %p6674_p5 = pnand %p6672_p4, %p6903_p12  ;;  %p6680_p0 = scmp.lt.u32.totalorder %s6671_s14, %s6974_s24 }
  0x5a   : > { %p6679_p2 = por %p6678_p1, %p6677_p13 }
  0x5b   : > { %p6675_p11 = pneg %p6674_p5 }
  0x5c   : > { %p6681_p3 = por %p6680_p0, %p6679_p2 }
  0x5e   : > { %p6682_p7 = pnand %p6681_p3, %p6675_p11 }
  0x60   : > { %6685 = shalt.err (!%p6682_p7)
}
  0x61   : > { %s6686_s19 = scalar_lea.vmem %s6976_s2, 4096  ;;  %s6779_s21 = smov [#allocation7]  }
  0x62   : > { %p6687_p9 = scmp.ne.s32.totalorder %s6976_s2, %s6686_s19  ;;  %s6691_s3 = sshll.u32 %s6779_s21, 4  ;;  %s6692_s3 = int_to_ptr.vmem [resolvable:$false] %s6691_s3 }
  0x63   : > { %s6693_s20 = scalar_lea.vmem %s6692_s3, 8192  ;;  %p6694_p4 = scmp.lt.s32.totalorder %s6976_s2, %s6692_s3 }
  0x64   : > { %p6689_p6 = pnand %p6687_p9, %p6903_p12  ;;  %p6695_p5 = scmp.lt.s32.totalorder %s6693_s20, %s6686_s19 }
  0x66   : > { %p6690_p8 = pneg %p6689_p6  ;;  %p6696_p13 = por %p6695_p5, %p6694_p4 }
  0x68   : > { %p6697_p1 = pnand %p6696_p13, %p6690_p8 }
  0x6a   : > { %6700 = shalt.err (!%p6697_p1)
}
  0x6b   : > { %5752 = dma.hbm_to_vmem [thread:$0]  (!%p6879_p10), %s6974_s24, 4096, %s6976_s2, %s6897_s27, %s6777_s26, %s6777_s26, %s6778_s28  }
  0x6c   : > { %s7810_s14 = sshll.u32 %s6773_s10, 6  ;;  %s7811_s13 = sshll.u32 %s6877_s17, 2 }
  0x6d   : > { %s7008_s25 = scalar_lea.hbm %s7792_s5, %s7810_s14  ;;  %s338_s19 = scalar_lea.vmem [#allocation8], %s7811_s13 }
  0x6e   : > { %s346_s21 = sshll.u32 %s338_s19, 4  ;;  %s335_s3 = scalar_lea.sflag [#allocation9], %s6877_s17  ;;  %s347_s21 = int_to_ptr.vmem [resolvable:$true] %s346_s21 }
  0x6f   : > { %s6701_s20 = scalar_lea.hbm %s7008_s25, 64  ;;  %s6706_s27 = scalar_lea.hbm %s7792_s5, 256 }
  0x70   : > { %p6702_p11 = scmp.ne.s32.totalorder %s7008_s25, %s6701_s20  ;;  %p6707_p3 = scmp.lt.u32.totalorder %s7008_s25, %s7792_s5 }
  0x71   : > { %p6708_p7 = scmp.lt.u32.totalorder %s6706_s27, %s6701_s20  ;;  %p6710_p6 = scmp.lt.u32.totalorder %s6701_s20, %s7008_s25 }
  0x72   : > { %p6704_p2 = pnand %p6702_p11, %p6903_p12 }
  0x73   : > { %p6709_p9 = por %p6708_p7, %p6707_p3 }
  0x74   : > { %p6705_p0 = pneg %p6704_p2 }
  0x75   : > { %p6711_p8 = por %p6710_p6, %p6709_p9 }
  0x77   : > { %p6712_p4 = pnand %p6711_p8, %p6705_p0 }
  0x79   : > { %6715 = shalt.err (!%p6712_p4)
}
  0x7a   : > { %s6716_s17 = scalar_lea.vmem %s347_s21, 64  ;;  %s6780_s24 = smov [#allocation8]  }
  0x7b   : > { %p6717_p5 = scmp.ne.s32.totalorder %s347_s21, %s6716_s17  ;;  %s6721_s14 = sshll.u32 %s6780_s24, 4  ;;  %s6722_s14 = int_to_ptr.vmem [resolvable:$false] %s6721_s14 }
  0x7c   : > { %s6723_s12 = scalar_lea.vmem %s6722_s14, 128  ;;  %p6724_p11 = scmp.lt.s32.totalorder %s347_s21, %s6722_s14 }
  0x7d   : > { %p6719_p13 = pnand %p6717_p5, %p6903_p12  ;;  %p6725_p2 = scmp.lt.s32.totalorder %s6723_s12, %s6716_s17 }
  0x7f   : > { %p6720_p1 = pneg %p6719_p13  ;;  %p6726_p10 = por %p6725_p2, %p6724_p11 }
  0x81   : > { %p6727_p3 = pnand %p6726_p10, %p6720_p1 }
  0x83   : > { %6730 = shalt.err (!%p6727_p3)
}
  0x84   : > { %p7812_p7 = scmp.ne.s32.totalorder %s7805_s18, 0  ;;  %p7813_p0 = scmp.ne.s32.totalorder %s7808_s22, 0 }
  0x85   : > { %s7033_s29 = sand.u32 (!%p7813_p0), 1, %s6765_s30   ;;  %p7814_p12 = scmp.ne.s32.totalorder (!%p7813_p0), %s7803_s15, 0 }
  0x86   : > { %5755 = dma.hbm_to_vmem [thread:$0]  (!%p7812_p7), %s7008_s25, 64, %s347_s21, %s335_s3  }
  0x87   : > { %355 = sbr.rel (%p7813_p0) target bundleno = 1159 (0x487), region = 52  ;;  %s5064_s23 = sshll.u32 (!%p7813_p0), %s7033_s29, 12 }
  0x88   : > { %s358_s13 = scalar_lea.sflag (!%p7813_p0), [#allocation4], %s7033_s29  ;;  %s7037_s19 = scalar_lea.vmem (!%p7813_p0), [#allocation3], %s5064_s23 }
  0x8e   : > { %6748 = dma.done.wait (%p7814_p12), %s358_s13, 65536  }
  0x8f   : > { %6750 = vsyncadd (%p7814_p12), %s358_s13, 4294901760  ;;  %s366_s18 = sand.u32 1, %s6850_s7   ;;  %s5065_s22 = sshll.u32 %s7033_s29, 2 }
  0x90   : > { %s367_s25 = scalar_lea.sflag [#allocation6], %s366_s18  ;;  %s7045_s21 = scalar_lea.vmem [#allocation5], %s5065_s22 }
  0x91   : > { %6752 = dma.done.wait (%p7814_p12), %s367_s25, 4160  }
  0x92   : > { %6754 = vsyncadd (%p7814_p12), %s367_s25, 4294963136  ;;  %s5066_s3 = sshll.u32 %s7033_s29, 8  ;;  %s385_s2 = scalar_lea.sflag [#allocation9], %s7033_s29 }
  0x93   : > { %s7052_s20 = scalar_lea.vmem [#allocation7], %s5066_s3  ;;  %s7055_s10 = scalar_lea.vmem [#allocation8], %s5065_s22 }
  0x94   : > { %6756 = dma.done.wait (%p7814_p12), %s385_s2, 64  }
  0x95   : > { %6758 = vsyncadd (%p7814_p12), %s385_s2, 4294967232  ;;  %v5793_v1 = vld [vmem:[%s7037_s19 + $0x4] ss:$16 sps:$4 sm:$0xff]   ;;  %v5795_v2 = vld [vmem:[%s7037_s19 + $0xc] ss:$16 sps:$4 sm:$0xff]   ;;  %vm4679_vm0 = vcmask 261120  }
  0x96   : > { %3629 = vmatprep.subr.bf16.mxu0 %v5793_v1  ;;  %v5797_v3 = vld [vmem:[%s7037_s19] ss:$16 sps:$4 sm:$0xff]   ;;  %v5798_v4 = vld [vmem:[%s7037_s19 + $0x8] ss:$16 sps:$4 sm:$0xff]   ;;  %3973 = vmatprep.subr.bf16.mxu1 %v5795_v2  ;;  %v5799_v5 = vld [vmem:[%s7037_s19 + $0x24] ss:$16 sps:$4 sm:$0xff]  }
  0x97   : > { %3630 = vmatpush1.bf16.msra.mxu0 %v5797_v3  ;;  %3974 = vmatpush1.bf16.msra.mxu1 %v5798_v4  ;;  %v5801_v6 = vld [vmem:[%s7037_s19 + $0x2c] ss:$16 sps:$4 sm:$0xff]   ;;  %v5803_v7 = vld [vmem:[%s7037_s19 + $0x20] ss:$16 sps:$4 sm:$0xff]   ;;  %v5804_v8 = vld [vmem:[%s7037_s19 + $0x28] ss:$16 sps:$4 sm:$0xff]  }
  0x98   : > { %3631 = vmatprep.subr.bf16.mxu0 %v5799_v5  ;;  %3975 = vmatprep.subr.bf16.mxu1 %v5801_v6  ;;  %v5805_v9 = vld [vmem:[%s7037_s19 + $0x44] ss:$16 sps:$4 sm:$0xff]   ;;  %v5807_v10 = vld [vmem:[%s7037_s19 + $0x4c] ss:$16 sps:$4 sm:$0xff]   ;;  %v5809_v11 = vld [vmem:[%s7037_s19 + $0x40] ss:$16 sps:$4 sm:$0xff]  }
  0x99   : > { %v5810_v12 = vld [vmem:[%s7037_s19 + $0x48] ss:$16 sps:$4 sm:$0xff]   ;;  %v5811_v13 = vld [vmem:[%s7037_s19 + $0x64] ss:$16 sps:$4 sm:$0xff]   ;;  %v5813_v14 = vld [vmem:[%s7037_s19 + $0x6c] ss:$16 sps:$4 sm:$0xff]  }
  0x9a   : > { %v5815_v15 = vld [vmem:[%s7037_s19 + $0x60] ss:$16 sps:$4 sm:$0xff]   ;;  %v5816_v16 = vld [vmem:[%s7037_s19 + $0x68] ss:$16 sps:$4 sm:$0xff]   ;;  %v5817_v17 = vld [vmem:[%s7037_s19 + $0x84] ss:$16 sps:$4 sm:$0xff]  }
  0x9b   : > { %3632 = vmatpush1.bf16.msra.mxu0 %v5803_v7  ;;  %3976 = vmatpush1.bf16.msra.mxu1 %v5804_v8  ;;  %v5819_v18 = vld [vmem:[%s7037_s19 + $0x8c] ss:$16 sps:$4 sm:$0xff]   ;;  %v5821_v19 = vld [vmem:[%s7037_s19 + $0x80] ss:$16 sps:$4 sm:$0xff]   ;;  %v5822_v20 = vld [vmem:[%s7037_s19 + $0x88] ss:$16 sps:$4 sm:$0xff]  }
  0x9c   : > { %3633 = vmatprep.subr.bf16.mxu0 %v5805_v9  ;;  %3977 = vmatprep.subr.bf16.mxu1 %v5807_v10  ;;  %v5823_v21 = vld [vmem:[%s7037_s19 + $0xa4] ss:$16 sps:$4 sm:$0xff]   ;;  %v5825_v22 = vld [vmem:[%s7037_s19 + $0xac] ss:$16 sps:$4 sm:$0xff]   ;;  %v5827_v23 = vld [vmem:[%s7037_s19 + $0xa0] ss:$16 sps:$4 sm:$0xff]  }
  0x9d   : > { %v5828_v24 = vld [vmem:[%s7037_s19 + $0xa8] ss:$16 sps:$4 sm:$0xff]   ;;  %v5829_v25 = vld [vmem:[%s7037_s19 + $0xc4] ss:$16 sps:$4 sm:$0xff]   ;;  %v5831_v26 = vld [vmem:[%s7037_s19 + $0xcc] ss:$16 sps:$4 sm:$0xff]  }
  0x9e   : > { %v5833_v27 = vld [vmem:[%s7037_s19 + $0xc0] ss:$16 sps:$4 sm:$0xff]   ;;  %v5834_v28 = vld [vmem:[%s7037_s19 + $0xc8] ss:$16 sps:$4 sm:$0xff]   ;;  %v5835_v29 = vld [vmem:[%s7037_s19 + $0xe4] ss:$16 sps:$4 sm:$0xff]  }
  0x9f   : > { %3634 = vmatpush1.bf16.msra.mxu0 %v5809_v11  ;;  %3978 = vmatpush1.bf16.msra.mxu1 %v5810_v12  ;;  %v5837_v30 = vld [vmem:[%s7037_s19 + $0xec] ss:$16 sps:$4 sm:$0xff]   ;;  %v5839_v31 = vld [vmem:[%s7037_s19 + $0xe0] ss:$16 sps:$4 sm:$0xff]   ;;  %v5840_v32 = vld [vmem:[%s7037_s19 + $0xe8] ss:$16 sps:$4 sm:$0xff]  }
  0xa0   : > { %3635 = vmatprep.subr.bf16.mxu0 %v5811_v13  ;;  %3979 = vmatprep.subr.bf16.mxu1 %v5813_v14  ;;  %v5841_v33 = vld [vmem:[%s7037_s19 + $0x104] ss:$16 sps:$4 sm:$0xff]   ;;  %v5843_v34 = vld [vmem:[%s7037_s19 + $0x10c] ss:$16 sps:$4 sm:$0xff]   ;;  %v5845_v35 = vld [vmem:[%s7037_s19 + $0x100] ss:$16 sps:$4 sm:$0xff]  }
  0xa1   : > { %v5846_v36 = vld [vmem:[%s7037_s19 + $0x108] ss:$16 sps:$4 sm:$0xff]   ;;  %v5847_v37 = vld [vmem:[%s7037_s19 + $0x124] ss:$16 sps:$4 sm:$0xff]   ;;  %v5849_v38 = vld [vmem:[%s7037_s19 + $0x12c] ss:$16 sps:$4 sm:$0xff]  }
  0xa2   : > { %v5851_v39 = vld [vmem:[%s7037_s19 + $0x120] ss:$16 sps:$4 sm:$0xff]   ;;  %v5852_v40 = vld [vmem:[%s7037_s19 + $0x128] ss:$16 sps:$4 sm:$0xff]   ;;  %v5853_v41 = vld [vmem:[%s7037_s19 + $0x144] ss:$16 sps:$4 sm:$0xff]  }
  0xa3   : > { %3636 = vmatpush1.bf16.msra.mxu0 %v5815_v15  ;;  %3980 = vmatpush1.bf16.msra.mxu1 %v5816_v16  ;;  %v5855_v42 = vld [vmem:[%s7037_s19 + $0x14c] ss:$16 sps:$4 sm:$0xff]   ;;  %v5857_v43 = vld [vmem:[%s7037_s19 + $0x140] ss:$16 sps:$4 sm:$0xff]   ;;  %v5858_v44 = vld [vmem:[%s7037_s19 + $0x148] ss:$16 sps:$4 sm:$0xff]  }
  0xa4   : > { %3637 = vmatprep.subr.bf16.mxu0 %v5817_v17  ;;  %3981 = vmatprep.subr.bf16.mxu1 %v5819_v18  ;;  %v5859_v45 = vld [vmem:[%s7037_s19 + $0x164] ss:$16 sps:$4 sm:$0xff]   ;;  %v5861_v46 = vld [vmem:[%s7037_s19 + $0x16c] ss:$16 sps:$4 sm:$0xff]   ;;  %v5863_v49 = vld [vmem:[%s7037_s19 + $0x160] ss:$16 sps:$4 sm:$0xff]  }
  0xa5   : > { %v439_v47 = vld [vmem:[%s7787_s0] sm:$0xff]  ;;  %v5864_v50 = vld [vmem:[%s7037_s19 + $0x168] ss:$16 sps:$4 sm:$0xff]   ;;  %s5068_s12 = sshll.u32 %s7033_s29, 5  ;;  %p7815_p10 = scmp.ne.s32.totalorder %s7804_s16, 0 }
  0xa6   : > { %v447_v48 = vld [vmem:[%s7787_s0 + $0x40] sm:$0xff]  ;;  %v5870_v55 = vld [vmem:[%s7037_s19 + $0x188] ss:$16 sps:$4 sm:$0xff]   ;;  %s434_s29 = scalar_lea.vmem [#allocation10], %s5068_s12  ;;  %s5652_s23 = sshll.u32 (%p7815_p10), %s6850_s7, 4 }
  0xa7   : > { %3638 = vmatpush1.bf16.msra.mxu0 %v5821_v19  ;;  %3982 = vmatpush1.bf16.msra.mxu1 %v5822_v20  ;;  %v5070_v51 = vcombine.high %v439_v47, %v447_v48  ;;  %v5865_v52 = vld [vmem:[%s7037_s19 + $0x184] ss:$16 sps:$4 sm:$0xff]   ;;  %v5867_v53 = vld [vmem:[%s7037_s19 + $0x18c] ss:$16 sps:$4 sm:$0xff]   ;;  %v5869_v54 = vld [vmem:[%s7037_s19 + $0x180] ss:$16 sps:$4 sm:$0xff]   ;;  %v5069_v6 = vcombine.low %v439_v47, %v447_v48  ;;  %s4896_s22 = scalar_lea.vmem (%p7815_p10), %s7795_s8, %s5652_s23 }
  0xa8   : > { %3639 = vmatprep.subr.bf16.mxu0 %v5823_v21  ;;  %3983 = vmatprep.subr.bf16.mxu1 %v5825_v22  ;;  %v5871_v56 = vld [vmem:[%s7037_s19 + $0x1a4] ss:$16 sps:$4 sm:$0xff]   ;;  %v5873_v57 = vld [vmem:[%s7037_s19 + $0x1ac] ss:$16 sps:$4 sm:$0xff]   ;;  %v5875_v58 = vld [vmem:[%s7037_s19 + $0x1a0] ss:$16 sps:$4 sm:$0xff]  }
  0xa9   : > { %3661 = vmatprep.mubr.bf16.mxu0 %v5070_v51  ;;  %4005 = vmatprep.mubr.bf16.mxu1 %v5070_v51  ;;  %v5876_v59 = vld [vmem:[%s7037_s19 + $0x1a8] ss:$16 sps:$4 sm:$0xff]   ;;  %v5877_v60 = vld [vmem:[%s7037_s19 + $0x1c4] ss:$16 sps:$4 sm:$0xff]   ;;  %v5879_v61 = vld [vmem:[%s7037_s19 + $0x1cc] ss:$16 sps:$4 sm:$0xff]  }
  0xaa   : > { %v5881_v62 = vld [vmem:[%s7037_s19 + $0x1c0] ss:$16 sps:$4 sm:$0xff]   ;;  %v5882_v63 = vld [vmem:[%s7037_s19 + $0x1c8] ss:$16 sps:$4 sm:$0xff]   ;;  %v5883_v0 = vld [vmem:[%s7037_s19 + $0x1e4] ss:$16 sps:$4 sm:$0xff]  }
  0xab   : > { %3640 = vmatpush1.bf16.msra.mxu0 %v5827_v23  ;;  %3984 = vmatpush1.bf16.msra.mxu1 %v5828_v24  ;;  %v5885_v1 = vld [vmem:[%s7037_s19 + $0x1ec] ss:$16 sps:$4 sm:$0xff]   ;;  %v5887_v2 = vld [vmem:[%s7037_s19 + $0x1e0] ss:$16 sps:$4 sm:$0xff]   ;;  %v5888_v3 = vld [vmem:[%s7037_s19 + $0x1e8] ss:$16 sps:$4 sm:$0xff]  }
  0xac   : > { %3641 = vmatprep.subr.bf16.mxu0 %v5829_v25  ;;  %3985 = vmatprep.subr.bf16.mxu1 %v5831_v26  ;;  %v5891_v4 = vld [vmem:[%s7037_s19 + $0x204] ss:$16 sps:$4 sm:$0xff]   ;;  %v5894_v5 = vld [vmem:[%s7037_s19 + $0x20c] ss:$16 sps:$4 sm:$0xff]   ;;  %v5889_v7 = vld [vmem:[%s7037_s19 + $0x200] ss:$16 sps:$4 sm:$0xff]  }
  0xad   : > { %v5892_v8 = vld [vmem:[%s7037_s19 + $0x208] ss:$16 sps:$4 sm:$0xff]   ;;  %v5897_v9 = vld [vmem:[%s7037_s19 + $0x224] ss:$16 sps:$4 sm:$0xff]   ;;  %v5900_v10 = vld [vmem:[%s7037_s19 + $0x22c] ss:$16 sps:$4 sm:$0xff]  }
  0xae   : > { %v5895_v11 = vld [vmem:[%s7037_s19 + $0x220] ss:$16 sps:$4 sm:$0xff]   ;;  %v5898_v12 = vld [vmem:[%s7037_s19 + $0x228] ss:$16 sps:$4 sm:$0xff]   ;;  %v5903_v13 = vld [vmem:[%s7037_s19 + $0x244] ss:$16 sps:$4 sm:$0xff]  }
  0xaf   : > { %3642 = vmatpush1.bf16.msra.mxu0 %v5833_v27  ;;  %3986 = vmatpush1.bf16.msra.mxu1 %v5834_v28  ;;  %v5906_v14 = vld [vmem:[%s7037_s19 + $0x24c] ss:$16 sps:$4 sm:$0xff]   ;;  %v5901_v15 = vld [vmem:[%s7037_s19 + $0x240] ss:$16 sps:$4 sm:$0xff]   ;;  %v5904_v16 = vld [vmem:[%s7037_s19 + $0x248] ss:$16 sps:$4 sm:$0xff]  }
  0xb0   : > { %3643 = vmatprep.subr.bf16.mxu0 %v5835_v29  ;;  %3987 = vmatprep.subr.bf16.mxu1 %v5837_v30  ;;  %v5909_v17 = vld [vmem:[%s7037_s19 + $0x264] ss:$16 sps:$4 sm:$0xff]   ;;  %v5912_v18 = vld [vmem:[%s7037_s19 + $0x26c] ss:$16 sps:$4 sm:$0xff]   ;;  %v5907_v19 = vld [vmem:[%s7037_s19 + $0x260] ss:$16 sps:$4 sm:$0xff]  }
  0xb1   : > { %v5910_v20 = vld [vmem:[%s7037_s19 + $0x268] ss:$16 sps:$4 sm:$0xff]   ;;  %v5915_v21 = vld [vmem:[%s7037_s19 + $0x284] ss:$16 sps:$4 sm:$0xff]   ;;  %v5918_v22 = vld [vmem:[%s7037_s19 + $0x28c] ss:$16 sps:$4 sm:$0xff]  }
  0xb2   : > { %v5913_v23 = vld [vmem:[%s7037_s19 + $0x280] ss:$16 sps:$4 sm:$0xff]   ;;  %v5916_v24 = vld [vmem:[%s7037_s19 + $0x288] ss:$16 sps:$4 sm:$0xff]   ;;  %v5921_v25 = vld [vmem:[%s7037_s19 + $0x2a4] ss:$16 sps:$4 sm:$0xff]  }
  0xb3   : > { %3644 = vmatpush1.bf16.msra.mxu0 %v5839_v31  ;;  %3988 = vmatpush1.bf16.msra.mxu1 %v5840_v32  ;;  %v5924_v26 = vld [vmem:[%s7037_s19 + $0x2ac] ss:$16 sps:$4 sm:$0xff]   ;;  %v5919_v27 = vld [vmem:[%s7037_s19 + $0x2a0] ss:$16 sps:$4 sm:$0xff]   ;;  %v5922_v28 = vld [vmem:[%s7037_s19 + $0x2a8] ss:$16 sps:$4 sm:$0xff]  }
  0xb4   : > { %3645 = vmatprep.subr.bf16.mxu0 %v5841_v33  ;;  %3989 = vmatprep.subr.bf16.mxu1 %v5843_v34  ;;  %v5927_v29 = vld [vmem:[%s7037_s19 + $0x2c4] ss:$16 sps:$4 sm:$0xff]   ;;  %v5930_v30 = vld [vmem:[%s7037_s19 + $0x2cc] ss:$16 sps:$4 sm:$0xff]   ;;  %v5925_v33 = vld [vmem:[%s7037_s19 + $0x2c0] ss:$16 sps:$4 sm:$0xff]  }
  0xb5   : > { %v7160_v31 = vld [vmem:[%s7787_s0 + $0x8] sm:$0xff] }
  0xb6   : > { %v7165_v32 = vld [vmem:[%s7787_s0 + $0x48] sm:$0xff] }
  0xb7   : > { %3646 = vmatpush1.bf16.msra.mxu0 %v5845_v35  ;;  %3990 = vmatpush1.bf16.msra.mxu1 %v5846_v36  ;;  %v5928_v34 = vld [vmem:[%s7037_s19 + $0x2c8] ss:$16 sps:$4 sm:$0xff]   ;;  %v5072_v35 = vcombine.high %v7160_v31, %v7165_v32  ;;  %v5933_v36 = vld [vmem:[%s7037_s19 + $0x2e4] ss:$16 sps:$4 sm:$0xff]  }
  0xb8   : > { %3647 = vmatprep.subr.bf16.mxu0 %v5847_v37  ;;  %3991 = vmatprep.subr.bf16.mxu1 %v5849_v38  ;;  %v5936_v37 = vld [vmem:[%s7037_s19 + $0x2ec] ss:$16 sps:$4 sm:$0xff]   ;;  %v5931_v38 = vld [vmem:[%s7037_s19 + $0x2e0] ss:$16 sps:$4 sm:$0xff]   ;;  %v5946_v47 = vld [vmem:[%s7037_s19 + $0x328] ss:$16 sps:$4 sm:$0xff]  }
  0xb9   : > { %v5951_v48 = vld [vmem:[%s7037_s19 + $0x344] ss:$16 sps:$4 sm:$0xff]   ;;  %v5952_v51 = vld [vmem:[%s7037_s19 + $0x348] ss:$16 sps:$4 sm:$0xff]  }
  0xbb   : > { %3648 = vmatpush1.bf16.msra.mxu0 %v5851_v39  ;;  %3992 = vmatpush1.bf16.msra.mxu1 %v5852_v40  ;;  %v5934_v39 = vld [vmem:[%s7037_s19 + $0x2e8] ss:$16 sps:$4 sm:$0xff]   ;;  %v5939_v40 = vld [vmem:[%s7037_s19 + $0x304] ss:$16 sps:$4 sm:$0xff]  }
  0xbc   : > { %3649 = vmatprep.subr.bf16.mxu0 %v5853_v41  ;;  %3993 = vmatprep.subr.bf16.mxu1 %v5855_v42  ;;  %v5942_v41 = vld [vmem:[%s7037_s19 + $0x30c] ss:$16 sps:$4 sm:$0xff]   ;;  %v5937_v42 = vld [vmem:[%s7037_s19 + $0x300] ss:$16 sps:$4 sm:$0xff]  }
  0xbf   : > { %3650 = vmatpush1.bf16.msra.mxu0 %v5857_v43  ;;  %3994 = vmatpush1.bf16.msra.mxu1 %v5858_v44  ;;  %v5940_v43 = vld [vmem:[%s7037_s19 + $0x308] ss:$16 sps:$4 sm:$0xff]   ;;  %v5945_v44 = vld [vmem:[%s7037_s19 + $0x324] ss:$16 sps:$4 sm:$0xff]  }
  0xc0   : > { %3651 = vmatprep.subr.bf16.mxu0 %v5859_v45  ;;  %3995 = vmatprep.subr.bf16.mxu1 %v5861_v46  ;;  %v5948_v45 = vld [vmem:[%s7037_s19 + $0x32c] ss:$16 sps:$4 sm:$0xff]   ;;  %v5943_v46 = vld [vmem:[%s7037_s19 + $0x320] ss:$16 sps:$4 sm:$0xff]  }
  0xc3   : > { %3652 = vmatpush1.bf16.msra.mxu0 %v5863_v49  ;;  %3996 = vmatpush1.bf16.msra.mxu1 %v5864_v50  ;;  %v5954_v49 = vld [vmem:[%s7037_s19 + $0x34c] ss:$16 sps:$4 sm:$0xff]   ;;  %v5949_v50 = vld [vmem:[%s7037_s19 + $0x340] ss:$16 sps:$4 sm:$0xff]  }
  0xc4   : > { %3653 = vmatprep.subr.bf16.mxu0 %v5865_v52  ;;  %3997 = vmatprep.subr.bf16.mxu1 %v5867_v53  ;;  %v5957_v52 = vld [vmem:[%s7037_s19 + $0x364] ss:$16 sps:$4 sm:$0xff]   ;;  %v5960_v53 = vld [vmem:[%s7037_s19 + $0x36c] ss:$16 sps:$4 sm:$0xff]  }
  0xc7   : > { %3654 = vmatpush1.bf16.msra.mxu0 %v5869_v54  ;;  %3998 = vmatpush1.bf16.msra.mxu1 %v5870_v55  ;;  %v5955_v54 = vld [vmem:[%s7037_s19 + $0x360] ss:$16 sps:$4 sm:$0xff]   ;;  %v5958_v55 = vld [vmem:[%s7037_s19 + $0x368] ss:$16 sps:$4 sm:$0xff]  }
  0xc8   : > { %3655 = vmatprep.subr.bf16.mxu0 %v5871_v56  ;;  %3999 = vmatprep.subr.bf16.mxu1 %v5873_v57  ;;  %v5963_v56 = vld [vmem:[%s7037_s19 + $0x384] ss:$16 sps:$4 sm:$0xff]   ;;  %v5966_v57 = vld [vmem:[%s7037_s19 + $0x38c] ss:$16 sps:$4 sm:$0xff]  }
  0xcb   : > { %3656 = vmatpush1.bf16.msra.mxu0 %v5875_v58  ;;  %4000 = vmatpush1.bf16.msra.mxu1 %v5876_v59  ;;  %v5961_v58 = vld [vmem:[%s7037_s19 + $0x380] ss:$16 sps:$4 sm:$0xff]   ;;  %v5964_v59 = vld [vmem:[%s7037_s19 + $0x388] ss:$16 sps:$4 sm:$0xff]  }
  0xcc   : > { %3657 = vmatprep.subr.bf16.mxu0 %v5877_v60  ;;  %4001 = vmatprep.subr.bf16.mxu1 %v5879_v61  ;;  %v5969_v60 = vld [vmem:[%s7037_s19 + $0x3a4] ss:$16 sps:$4 sm:$0xff]   ;;  %v5972_v61 = vld [vmem:[%s7037_s19 + $0x3ac] ss:$16 sps:$4 sm:$0xff]  }
  0xcf   : > { %3658 = vmatpush1.bf16.msra.mxu0 %v5881_v62  ;;  %4002 = vmatpush1.bf16.msra.mxu1 %v5882_v63  ;;  %v5967_v62 = vld [vmem:[%s7037_s19 + $0x3a0] ss:$16 sps:$4 sm:$0xff]   ;;  %v5970_v63 = vld [vmem:[%s7037_s19 + $0x3a8] ss:$16 sps:$4 sm:$0xff]  }
  0xd0   : > { %3659 = vmatprep.subr.bf16.mxu0 %v5883_v0  ;;  %4003 = vmatprep.subr.bf16.mxu1 %v5885_v1  ;;  %v5975_v0 = vld [vmem:[%s7037_s19 + $0x3c4] ss:$16 sps:$4 sm:$0xff]   ;;  %v5978_v1 = vld [vmem:[%s7037_s19 + $0x3cc] ss:$16 sps:$4 sm:$0xff]  }
  0xd3   : > { %3660 = vmatpush1.bf16.msra.mxu0 %v5887_v2  ;;  %4004 = vmatpush1.bf16.msra.mxu1 %v5888_v3  ;;  %v5973_v2 = vld [vmem:[%s7037_s19 + $0x3c0] ss:$16 sps:$4 sm:$0xff]   ;;  %v5976_v3 = vld [vmem:[%s7037_s19 + $0x3c8] ss:$16 sps:$4 sm:$0xff]  }
  0xd4   : > { %3672 = vmatprep.subr.bf16.mxu0 %v5891_v4  ;;  %4016 = vmatprep.subr.bf16.mxu1 %v5894_v5  ;;  %v5981_v4 = vld [vmem:[%s7037_s19 + $0x3e4] ss:$16 sps:$4 sm:$0xff]   ;;  %v5984_v5 = vld [vmem:[%s7037_s19 + $0x3ec] ss:$16 sps:$4 sm:$0xff]  }
  0xd6   : > { %3662 = vmatmul.mubr.bf16.vlgmr.msra.gmra.mrb[0].mxu0 %v5069_v6  ;;  %4006 = vmatmul.mubr.bf16.vlgmr.msra.gmra.mrb[0].mxu1 %v5069_v6  ;;  %v5979_v6 = vld [vmem:[%s7037_s19 + $0x3e0] ss:$16 sps:$4 sm:$0xff]  }
  0xd7   : > { %3673 = vmatpush1.bf16.msra.mxu0 %v5889_v7  ;;  %4017 = vmatpush1.bf16.msra.mxu1 %v5892_v8  ;;  %v5982_v7 = vld [vmem:[%s7037_s19 + $0x3e8] ss:$16 sps:$4 sm:$0xff]   ;;  %v5987_v8 = vld [vmem:[%s7037_s19 + $0x404] ss:$16 sps:$4 sm:$0xff]  }
  0xd8   : > { %3674 = vmatprep.subr.bf16.mxu0 %v5897_v9  ;;  %4018 = vmatprep.subr.bf16.mxu1 %v5900_v10  ;;  %v5990_v9 = vld [vmem:[%s7037_s19 + $0x40c] ss:$16 sps:$4 sm:$0xff]   ;;  %v5071_v10 = vcombine.low %v7160_v31, %v7165_v32  ;;  %v6012_v31 = vld [vmem:[%s7037_s19 + $0x488] ss:$16 sps:$4 sm:$0xff]   ;;  %v6017_v32 = vld [vmem:[%s7037_s19 + $0x4a4] ss:$16 sps:$4 sm:$0xff]  }
  0xd9   : > { %3704 = vmatprep.mubr.bf16.mxu0 %v5072_v35  ;;  %4048 = vmatprep.mubr.bf16.mxu1 %v5072_v35  ;;  %v6018_v35 = vld [vmem:[%s7037_s19 + $0x4a8] ss:$16 sps:$4 sm:$0xff]  }
  0xdb   : > { %3675 = vmatpush1.bf16.msra.mxu0 %v5895_v11  ;;  %4019 = vmatpush1.bf16.msra.mxu1 %v5898_v12  ;;  %v5985_v11 = vld [vmem:[%s7037_s19 + $0x400] ss:$16 sps:$4 sm:$0xff]   ;;  %v5988_v12 = vld [vmem:[%s7037_s19 + $0x408] ss:$16 sps:$4 sm:$0xff]  }
  0xdc   : > { %3676 = vmatprep.subr.bf16.mxu0 %v5903_v13  ;;  %4020 = vmatprep.subr.bf16.mxu1 %v5906_v14  ;;  %v5993_v13 = vld [vmem:[%s7037_s19 + $0x424] ss:$16 sps:$4 sm:$0xff]   ;;  %v5996_v14 = vld [vmem:[%s7037_s19 + $0x42c] ss:$16 sps:$4 sm:$0xff]  }
  0xdf   : > { %3677 = vmatpush1.bf16.msra.mxu0 %v5901_v15  ;;  %4021 = vmatpush1.bf16.msra.mxu1 %v5904_v16  ;;  %v7218_v15 = vld [vmem:[%s7787_s0 + $0x10] sm:$0xff] }
  0xe0   : > { %3678 = vmatprep.subr.bf16.mxu0 %v5909_v17  ;;  %4022 = vmatprep.subr.bf16.mxu1 %v5912_v18  ;;  %v7223_v16 = vld [vmem:[%s7787_s0 + $0x50] sm:$0xff] }
  0xe1   : > { %v5074_v17 = vcombine.high %v7218_v15, %v7223_v16  ;;  %v5991_v18 = vld [vmem:[%s7037_s19 + $0x420] ss:$16 sps:$4 sm:$0xff]  }
  0xe3   : > { %3679 = vmatpush1.bf16.msra.mxu0 %v5907_v19  ;;  %4023 = vmatpush1.bf16.msra.mxu1 %v5910_v20  ;;  %v5994_v19 = vld [vmem:[%s7037_s19 + $0x428] ss:$16 sps:$4 sm:$0xff]   ;;  %v5999_v20 = vld [vmem:[%s7037_s19 + $0x444] ss:$16 sps:$4 sm:$0xff]  }
  0xe4   : > { %3680 = vmatprep.subr.bf16.mxu0 %v5915_v21  ;;  %4024 = vmatprep.subr.bf16.mxu1 %v5918_v22  ;;  %v6002_v21 = vld [vmem:[%s7037_s19 + $0x44c] ss:$16 sps:$4 sm:$0xff]   ;;  %v5997_v22 = vld [vmem:[%s7037_s19 + $0x440] ss:$16 sps:$4 sm:$0xff]  }
  0xe7   : > { %3681 = vmatpush1.bf16.msra.mxu0 %v5913_v23  ;;  %4025 = vmatpush1.bf16.msra.mxu1 %v5916_v24  ;;  %v6000_v23 = vld [vmem:[%s7037_s19 + $0x448] ss:$16 sps:$4 sm:$0xff]   ;;  %v6005_v24 = vld [vmem:[%s7037_s19 + $0x464] ss:$16 sps:$4 sm:$0xff]  }
  0xe8   : > { %3682 = vmatprep.subr.bf16.mxu0 %v5921_v25  ;;  %4026 = vmatprep.subr.bf16.mxu1 %v5924_v26  ;;  %v6008_v25 = vld [vmem:[%s7037_s19 + $0x46c] ss:$16 sps:$4 sm:$0xff]   ;;  %v6003_v26 = vld [vmem:[%s7037_s19 + $0x460] ss:$16 sps:$4 sm:$0xff]  }
  0xeb   : > { %3683 = vmatpush1.bf16.msra.mxu0 %v5919_v27  ;;  %4027 = vmatpush1.bf16.msra.mxu1 %v5922_v28  ;;  %v6006_v27 = vld [vmem:[%s7037_s19 + $0x468] ss:$16 sps:$4 sm:$0xff]   ;;  %v6011_v28 = vld [vmem:[%s7037_s19 + $0x484] ss:$16 sps:$4 sm:$0xff]  }
  0xec   : > { %3684 = vmatprep.subr.bf16.mxu0 %v5927_v29  ;;  %4028 = vmatprep.subr.bf16.mxu1 %v5930_v30  ;;  %v6014_v29 = vld [vmem:[%s7037_s19 + $0x48c] ss:$16 sps:$4 sm:$0xff]   ;;  %v6009_v30 = vld [vmem:[%s7037_s19 + $0x480] ss:$16 sps:$4 sm:$0xff]  }
  0xef   : > { %3685 = vmatpush1.bf16.msra.mxu0 %v5925_v33  ;;  %4029 = vmatpush1.bf16.msra.mxu1 %v5928_v34  ;;  %v6020_v33 = vld [vmem:[%s7037_s19 + $0x4ac] ss:$16 sps:$4 sm:$0xff]   ;;  %v6015_v34 = vld [vmem:[%s7037_s19 + $0x4a0] ss:$16 sps:$4 sm:$0xff]  }
  0xf0   : > { %3686 = vmatprep.subr.bf16.mxu0 %v5933_v36  ;;  %4030 = vmatprep.subr.bf16.mxu1 %v5936_v37  ;;  %v6023_v36 = vld [vmem:[%s7037_s19 + $0x4c4] ss:$16 sps:$4 sm:$0xff]   ;;  %v6026_v37 = vld [vmem:[%s7037_s19 + $0x4cc] ss:$16 sps:$4 sm:$0xff]  }
  0xf3   : > { %3687 = vmatpush1.bf16.msra.mxu0 %v5931_v38  ;;  %4031 = vmatpush1.bf16.msra.mxu1 %v5934_v39  ;;  %v6021_v38 = vld [vmem:[%s7037_s19 + $0x4c0] ss:$16 sps:$4 sm:$0xff]   ;;  %v6024_v39 = vld [vmem:[%s7037_s19 + $0x4c8] ss:$16 sps:$4 sm:$0xff]  }
  0xf4   : > { %3688 = vmatprep.subr.bf16.mxu0 %v5939_v40  ;;  %4032 = vmatprep.subr.bf16.mxu1 %v5942_v41  ;;  %v6029_v40 = vld [vmem:[%s7037_s19 + $0x4e4] ss:$16 sps:$4 sm:$0xff]   ;;  %v6032_v41 = vld [vmem:[%s7037_s19 + $0x4ec] ss:$16 sps:$4 sm:$0xff]  }
  0xf7   : > { %3689 = vmatpush1.bf16.msra.mxu0 %v5937_v42  ;;  %4033 = vmatpush1.bf16.msra.mxu1 %v5940_v43  ;;  %v6027_v42 = vld [vmem:[%s7037_s19 + $0x4e0] ss:$16 sps:$4 sm:$0xff]   ;;  %v6030_v43 = vld [vmem:[%s7037_s19 + $0x4e8] ss:$16 sps:$4 sm:$0xff]  }
  0xf8   : > { %3690 = vmatprep.subr.bf16.mxu0 %v5945_v44  ;;  %4034 = vmatprep.subr.bf16.mxu1 %v5948_v45  ;;  %v6035_v44 = vld [vmem:[%s7037_s19 + $0x504] ss:$16 sps:$4 sm:$0xff]   ;;  %v6038_v45 = vld [vmem:[%s7037_s19 + $0x50c] ss:$16 sps:$4 sm:$0xff]  }
  0xfb   : > { %3691 = vmatpush1.bf16.msra.mxu0 %v5943_v46  ;;  %4035 = vmatpush1.bf16.msra.mxu1 %v5946_v47  ;;  %v6033_v46 = vld [vmem:[%s7037_s19 + $0x500] ss:$16 sps:$4 sm:$0xff]   ;;  %v6036_v47 = vld [vmem:[%s7037_s19 + $0x508] ss:$16 sps:$4 sm:$0xff]  }
  0xfc   : > { %3692 = vmatprep.subr.bf16.mxu0 %v5951_v48  ;;  %4036 = vmatprep.subr.bf16.mxu1 %v5954_v49  ;;  %v6041_v48 = vld [vmem:[%s7037_s19 + $0x524] ss:$16 sps:$4 sm:$0xff]   ;;  %v6044_v49 = vld [vmem:[%s7037_s19 + $0x52c] ss:$16 sps:$4 sm:$0xff]  }
  0xff   : > { %3693 = vmatpush1.bf16.msra.mxu0 %v5949_v50  ;;  %4037 = vmatpush1.bf16.msra.mxu1 %v5952_v51  ;;  %v6039_v50 = vld [vmem:[%s7037_s19 + $0x520] ss:$16 sps:$4 sm:$0xff]   ;;  %v6042_v51 = vld [vmem:[%s7037_s19 + $0x528] ss:$16 sps:$4 sm:$0xff]  }
 0x100   : > { %3694 = vmatprep.subr.bf16.mxu0 %v5957_v52  ;;  %4038 = vmatprep.subr.bf16.mxu1 %v5960_v53  ;;  %v6047_v52 = vld [vmem:[%s7037_s19 + $0x544] ss:$16 sps:$4 sm:$0xff]   ;;  %v6050_v53 = vld [vmem:[%s7037_s19 + $0x54c] ss:$16 sps:$4 sm:$0xff]  }
 0x103   : > { %3695 = vmatpush1.bf16.msra.mxu0 %v5955_v54  ;;  %4039 = vmatpush1.bf16.msra.mxu1 %v5958_v55  ;;  %v6045_v54 = vld [vmem:[%s7037_s19 + $0x540] ss:$16 sps:$4 sm:$0xff]   ;;  %v6048_v55 = vld [vmem:[%s7037_s19 + $0x548] ss:$16 sps:$4 sm:$0xff]  }
 0x104   : > { %3696 = vmatprep.subr.bf16.mxu0 %v5963_v56  ;;  %4040 = vmatprep.subr.bf16.mxu1 %v5966_v57  ;;  %v6053_v56 = vld [vmem:[%s7037_s19 + $0x564] ss:$16 sps:$4 sm:$0xff]   ;;  %v6056_v57 = vld [vmem:[%s7037_s19 + $0x56c] ss:$16 sps:$4 sm:$0xff]  }
 0x107   : > { %3697 = vmatpush1.bf16.msra.mxu0 %v5961_v58  ;;  %4041 = vmatpush1.bf16.msra.mxu1 %v5964_v59  ;;  %v6051_v58 = vld [vmem:[%s7037_s19 + $0x560] ss:$16 sps:$4 sm:$0xff]   ;;  %v6054_v59 = vld [vmem:[%s7037_s19 + $0x568] ss:$16 sps:$4 sm:$0xff]  }
 0x108   : > { %3698 = vmatprep.subr.bf16.mxu0 %v5969_v60  ;;  %4042 = vmatprep.subr.bf16.mxu1 %v5972_v61  ;;  %v6059_v60 = vld [vmem:[%s7037_s19 + $0x584] ss:$16 sps:$4 sm:$0xff]   ;;  %v6062_v61 = vld [vmem:[%s7037_s19 + $0x58c] ss:$16 sps:$4 sm:$0xff]  }
 0x10b   : > { %3699 = vmatpush1.bf16.msra.mxu0 %v5967_v62  ;;  %4043 = vmatpush1.bf16.msra.mxu1 %v5970_v63  ;;  %v6057_v62 = vld [vmem:[%s7037_s19 + $0x580] ss:$16 sps:$4 sm:$0xff]   ;;  %v6060_v63 = vld [vmem:[%s7037_s19 + $0x588] ss:$16 sps:$4 sm:$0xff]  }
 0x10c   : > { %3700 = vmatprep.subr.bf16.mxu0 %v5975_v0  ;;  %4044 = vmatprep.subr.bf16.mxu1 %v5978_v1  ;;  %v6065_v0 = vld [vmem:[%s7037_s19 + $0x5a4] ss:$16 sps:$4 sm:$0xff]   ;;  %v6068_v1 = vld [vmem:[%s7037_s19 + $0x5ac] ss:$16 sps:$4 sm:$0xff]  }
 0x10f   : > { %3701 = vmatpush1.bf16.msra.mxu0 %v5973_v2  ;;  %4045 = vmatpush1.bf16.msra.mxu1 %v5976_v3  ;;  %v6063_v2 = vld [vmem:[%s7037_s19 + $0x5a0] ss:$16 sps:$4 sm:$0xff]   ;;  %v6066_v3 = vld [vmem:[%s7037_s19 + $0x5a8] ss:$16 sps:$4 sm:$0xff]  }
 0x110   : > { %3702 = vmatprep.subr.bf16.mxu0 %v5981_v4  ;;  %4046 = vmatprep.subr.bf16.mxu1 %v5984_v5  ;;  %v6071_v4 = vld [vmem:[%s7037_s19 + $0x5c4] ss:$16 sps:$4 sm:$0xff]   ;;  %v6074_v5 = vld [vmem:[%s7037_s19 + $0x5cc] ss:$16 sps:$4 sm:$0xff]  }
 0x113   : > { %3703 = vmatpush1.bf16.msra.mxu0 %v5979_v6  ;;  %4047 = vmatpush1.bf16.msra.mxu1 %v5982_v7  ;;  %v6069_v6 = vld [vmem:[%s7037_s19 + $0x5c0] ss:$16 sps:$4 sm:$0xff]   ;;  %v6072_v7 = vld [vmem:[%s7037_s19 + $0x5c8] ss:$16 sps:$4 sm:$0xff]  }
 0x114   : > { %3715 = vmatprep.subr.bf16.mxu0 %v5987_v8  ;;  %4059 = vmatprep.subr.bf16.mxu1 %v5990_v9  ;;  %v6077_v8 = vld [vmem:[%s7037_s19 + $0x5e4] ss:$16 sps:$4 sm:$0xff]   ;;  %v6080_v9 = vld [vmem:[%s7037_s19 + $0x5ec] ss:$16 sps:$4 sm:$0xff]  }
 0x116   : > { %3705 = vmatmul.mubr.bf16.vlgmr.msra.gmra.mrb[0].mxu0 %v5071_v10  ;;  %4049 = vmatmul.mubr.bf16.vlgmr.msra.gmra.mrb[0].mxu1 %v5071_v10  ;;  %v6075_v10 = vld [vmem:[%s7037_s19 + $0x5e0] ss:$16 sps:$4 sm:$0xff]  }
 0x117   : > { %3716 = vmatpush1.bf16.msra.mxu0 %v5985_v11  ;;  %4060 = vmatpush1.bf16.msra.mxu1 %v5988_v12  ;;  %v6078_v11 = vld [vmem:[%s7037_s19 + $0x5e8] ss:$16 sps:$4 sm:$0xff]   ;;  %v6083_v12 = vld [vmem:[%s7037_s19 + $0x604] ss:$16 sps:$4 sm:$0xff]  }
 0x118   : > { %3717 = vmatprep.subr.bf16.mxu0 %v5993_v13  ;;  %4061 = vmatprep.subr.bf16.mxu1 %v5996_v14  ;;  %v6086_v13 = vld [vmem:[%s7037_s19 + $0x60c] ss:$16 sps:$4 sm:$0xff]   ;;  %v6081_v14 = vld [vmem:[%s7037_s19 + $0x600] ss:$16 sps:$4 sm:$0xff]  }
 0x119   : > { %3747 = vmatprep.mubr.bf16.mxu0 %v5074_v17  ;;  %4091 = vmatprep.mubr.bf16.mxu1 %v5074_v17  ;;  %v6084_v17 = vld [vmem:[%s7037_s19 + $0x608] ss:$16 sps:$4 sm:$0xff]  }
 0x11b   : > { %3718 = vmatpush1.bf16.msra.mxu0 %v5991_v18  ;;  %4062 = vmatpush1.bf16.msra.mxu1 %v5994_v19  ;;  %v5073_v18 = vcombine.low %v7218_v15, %v7223_v16  ;;  %v7294_v19 = vld [vmem:[%s7787_s0 + $0x18] sm:$0xff] }
 0x11c   : > { %3719 = vmatprep.subr.bf16.mxu0 %v5999_v20  ;;  %4063 = vmatprep.subr.bf16.mxu1 %v6002_v21  ;;  %v7299_v20 = vld [vmem:[%s7787_s0 + $0x58] sm:$0xff] }
 0x11d   : > { %v6089_v21 = vld [vmem:[%s7037_s19 + $0x624] ss:$16 sps:$4 sm:$0xff]   ;;  %v6092_v15 = vld [vmem:[%s7037_s19 + $0x62c] ss:$16 sps:$4 sm:$0xff]   ;;  %v5076_v16 = vcombine.high %v7294_v19, %v7299_v20 }
 0x11f   : > { %3720 = vmatpush1.bf16.msra.mxu0 %v5997_v22  ;;  %4064 = vmatpush1.bf16.msra.mxu1 %v6000_v23  ;;  %v6087_v22 = vld [vmem:[%s7037_s19 + $0x620] ss:$16 sps:$4 sm:$0xff]   ;;  %v6090_v23 = vld [vmem:[%s7037_s19 + $0x628] ss:$16 sps:$4 sm:$0xff]  }
 0x120   : > { %3721 = vmatprep.subr.bf16.mxu0 %v6005_v24  ;;  %4065 = vmatprep.subr.bf16.mxu1 %v6008_v25  ;;  %v6095_v24 = vld [vmem:[%s7037_s19 + $0x644] ss:$16 sps:$4 sm:$0xff]   ;;  %v6098_v25 = vld [vmem:[%s7037_s19 + $0x64c] ss:$16 sps:$4 sm:$0xff]  }
 0x123   : > { %3722 = vmatpush1.bf16.msra.mxu0 %v6003_v26  ;;  %4066 = vmatpush1.bf16.msra.mxu1 %v6006_v27  ;;  %v6093_v26 = vld [vmem:[%s7037_s19 + $0x640] ss:$16 sps:$4 sm:$0xff]   ;;  %v6096_v27 = vld [vmem:[%s7037_s19 + $0x648] ss:$16 sps:$4 sm:$0xff]  }
 0x124   : > { %3723 = vmatprep.subr.bf16.mxu0 %v6011_v28  ;;  %4067 = vmatprep.subr.bf16.mxu1 %v6014_v29  ;;  %v6101_v28 = vld [vmem:[%s7037_s19 + $0x664] ss:$16 sps:$4 sm:$0xff]   ;;  %v6104_v29 = vld [vmem:[%s7037_s19 + $0x66c] ss:$16 sps:$4 sm:$0xff]  }
 0x127   : > { %3724 = vmatpush1.bf16.msra.mxu0 %v6009_v30  ;;  %4068 = vmatpush1.bf16.msra.mxu1 %v6012_v31  ;;  %v6099_v30 = vld [vmem:[%s7037_s19 + $0x660] ss:$16 sps:$4 sm:$0xff]   ;;  %v6102_v31 = vld [vmem:[%s7037_s19 + $0x668] ss:$16 sps:$4 sm:$0xff]  }
 0x128   : > { %3725 = vmatprep.subr.bf16.mxu0 %v6017_v32  ;;  %4069 = vmatprep.subr.bf16.mxu1 %v6020_v33  ;;  %v6107_v32 = vld [vmem:[%s7037_s19 + $0x684] ss:$16 sps:$4 sm:$0xff]   ;;  %v6110_v33 = vld [vmem:[%s7037_s19 + $0x68c] ss:$16 sps:$4 sm:$0xff]  }
 0x12b   : > { %3726 = vmatpush1.bf16.msra.mxu0 %v6015_v34  ;;  %4070 = vmatpush1.bf16.msra.mxu1 %v6018_v35  ;;  %v6105_v34 = vld [vmem:[%s7037_s19 + $0x680] ss:$16 sps:$4 sm:$0xff]   ;;  %v6108_v35 = vld [vmem:[%s7037_s19 + $0x688] ss:$16 sps:$4 sm:$0xff]  }
 0x12c   : > { %3727 = vmatprep.subr.bf16.mxu0 %v6023_v36  ;;  %4071 = vmatprep.subr.bf16.mxu1 %v6026_v37  ;;  %v6113_v36 = vld [vmem:[%s7037_s19 + $0x6a4] ss:$16 sps:$4 sm:$0xff]   ;;  %v6116_v37 = vld [vmem:[%s7037_s19 + $0x6ac] ss:$16 sps:$4 sm:$0xff]  }
 0x12f   : > { %3728 = vmatpush1.bf16.msra.mxu0 %v6021_v38  ;;  %4072 = vmatpush1.bf16.msra.mxu1 %v6024_v39  ;;  %v6111_v38 = vld [vmem:[%s7037_s19 + $0x6a0] ss:$16 sps:$4 sm:$0xff]   ;;  %v6114_v39 = vld [vmem:[%s7037_s19 + $0x6a8] ss:$16 sps:$4 sm:$0xff]  }
 0x130   : > { %3729 = vmatprep.subr.bf16.mxu0 %v6029_v40  ;;  %4073 = vmatprep.subr.bf16.mxu1 %v6032_v41  ;;  %v6119_v40 = vld [vmem:[%s7037_s19 + $0x6c4] ss:$16 sps:$4 sm:$0xff]   ;;  %v6122_v41 = vld [vmem:[%s7037_s19 + $0x6cc] ss:$16 sps:$4 sm:$0xff]  }
 0x133   : > { %3730 = vmatpush1.bf16.msra.mxu0 %v6027_v42  ;;  %4074 = vmatpush1.bf16.msra.mxu1 %v6030_v43  ;;  %v6117_v42 = vld [vmem:[%s7037_s19 + $0x6c0] ss:$16 sps:$4 sm:$0xff]   ;;  %v6120_v43 = vld [vmem:[%s7037_s19 + $0x6c8] ss:$16 sps:$4 sm:$0xff]  }
 0x134   : > { %3731 = vmatprep.subr.bf16.mxu0 %v6035_v44  ;;  %4075 = vmatprep.subr.bf16.mxu1 %v6038_v45  ;;  %v6125_v44 = vld [vmem:[%s7037_s19 + $0x6e4] ss:$16 sps:$4 sm:$0xff]   ;;  %v6128_v45 = vld [vmem:[%s7037_s19 + $0x6ec] ss:$16 sps:$4 sm:$0xff]  }
 0x137   : > { %3732 = vmatpush1.bf16.msra.mxu0 %v6033_v46  ;;  %4076 = vmatpush1.bf16.msra.mxu1 %v6036_v47  ;;  %v6123_v46 = vld [vmem:[%s7037_s19 + $0x6e0] ss:$16 sps:$4 sm:$0xff]   ;;  %v6126_v47 = vld [vmem:[%s7037_s19 + $0x6e8] ss:$16 sps:$4 sm:$0xff]  }
 0x138   : > { %3733 = vmatprep.subr.bf16.mxu0 %v6041_v48  ;;  %4077 = vmatprep.subr.bf16.mxu1 %v6044_v49  ;;  %v6131_v48 = vld [vmem:[%s7037_s19 + $0x704] ss:$16 sps:$4 sm:$0xff]   ;;  %v6134_v49 = vld [vmem:[%s7037_s19 + $0x70c] ss:$16 sps:$4 sm:$0xff]  }
 0x13b   : > { %3734 = vmatpush1.bf16.msra.mxu0 %v6039_v50  ;;  %4078 = vmatpush1.bf16.msra.mxu1 %v6042_v51  ;;  %v6129_v50 = vld [vmem:[%s7037_s19 + $0x700] ss:$16 sps:$4 sm:$0xff]   ;;  %v6132_v51 = vld [vmem:[%s7037_s19 + $0x708] ss:$16 sps:$4 sm:$0xff]  }
 0x13c   : > { %3735 = vmatprep.subr.bf16.mxu0 %v6047_v52  ;;  %4079 = vmatprep.subr.bf16.mxu1 %v6050_v53  ;;  %v6137_v52 = vld [vmem:[%s7037_s19 + $0x724] ss:$16 sps:$4 sm:$0xff]   ;;  %v6140_v53 = vld [vmem:[%s7037_s19 + $0x72c] ss:$16 sps:$4 sm:$0xff]  }
 0x13f   : > { %3736 = vmatpush1.bf16.msra.mxu0 %v6045_v54  ;;  %4080 = vmatpush1.bf16.msra.mxu1 %v6048_v55  ;;  %v6135_v54 = vld [vmem:[%s7037_s19 + $0x720] ss:$16 sps:$4 sm:$0xff]   ;;  %v6138_v55 = vld [vmem:[%s7037_s19 + $0x728] ss:$16 sps:$4 sm:$0xff]  }
 0x140   : > { %3737 = vmatprep.subr.bf16.mxu0 %v6053_v56  ;;  %4081 = vmatprep.subr.bf16.mxu1 %v6056_v57  ;;  %v6143_v56 = vld [vmem:[%s7037_s19 + $0x744] ss:$16 sps:$4 sm:$0xff]   ;;  %v6146_v57 = vld [vmem:[%s7037_s19 + $0x74c] ss:$16 sps:$4 sm:$0xff]  }
 0x143   : > { %3738 = vmatpush1.bf16.msra.mxu0 %v6051_v58  ;;  %4082 = vmatpush1.bf16.msra.mxu1 %v6054_v59  ;;  %v6141_v58 = vld [vmem:[%s7037_s19 + $0x740] ss:$16 sps:$4 sm:$0xff]   ;;  %v6144_v59 = vld [vmem:[%s7037_s19 + $0x748] ss:$16 sps:$4 sm:$0xff]  }
 0x144   : > { %3739 = vmatprep.subr.bf16.mxu0 %v6059_v60  ;;  %4083 = vmatprep.subr.bf16.mxu1 %v6062_v61  ;;  %v6149_v60 = vld [vmem:[%s7037_s19 + $0x764] ss:$16 sps:$4 sm:$0xff]   ;;  %v6152_v61 = vld [vmem:[%s7037_s19 + $0x76c] ss:$16 sps:$4 sm:$0xff]  }
 0x147   : > { %3740 = vmatpush1.bf16.msra.mxu0 %v6057_v62  ;;  %4084 = vmatpush1.bf16.msra.mxu1 %v6060_v63  ;;  %v6147_v62 = vld [vmem:[%s7037_s19 + $0x760] ss:$16 sps:$4 sm:$0xff]   ;;  %v6150_v63 = vld [vmem:[%s7037_s19 + $0x768] ss:$16 sps:$4 sm:$0xff]  }
 0x148   : > { %3741 = vmatprep.subr.bf16.mxu0 %v6065_v0  ;;  %4085 = vmatprep.subr.bf16.mxu1 %v6068_v1  ;;  %v6155_v0 = vld [vmem:[%s7037_s19 + $0x784] ss:$16 sps:$4 sm:$0xff]   ;;  %v6158_v1 = vld [vmem:[%s7037_s19 + $0x78c] ss:$16 sps:$4 sm:$0xff]  }
 0x14b   : > { %3742 = vmatpush1.bf16.msra.mxu0 %v6063_v2  ;;  %4086 = vmatpush1.bf16.msra.mxu1 %v6066_v3  ;;  %v6153_v2 = vld [vmem:[%s7037_s19 + $0x780] ss:$16 sps:$4 sm:$0xff]   ;;  %v6156_v3 = vld [vmem:[%s7037_s19 + $0x788] ss:$16 sps:$4 sm:$0xff]  }
 0x14c   : > { %3743 = vmatprep.subr.bf16.mxu0 %v6071_v4  ;;  %4087 = vmatprep.subr.bf16.mxu1 %v6074_v5  ;;  %v6161_v4 = vld [vmem:[%s7037_s19 + $0x7a4] ss:$16 sps:$4 sm:$0xff]   ;;  %v6164_v5 = vld [vmem:[%s7037_s19 + $0x7ac] ss:$16 sps:$4 sm:$0xff]  }
 0x14f   : > { %3744 = vmatpush1.bf16.msra.mxu0 %v6069_v6  ;;  %4088 = vmatpush1.bf16.msra.mxu1 %v6072_v7  ;;  %v6159_v6 = vld [vmem:[%s7037_s19 + $0x7a0] ss:$16 sps:$4 sm:$0xff]   ;;  %v6162_v7 = vld [vmem:[%s7037_s19 + $0x7a8] ss:$16 sps:$4 sm:$0xff]  }
 0x150   : > { %3745 = vmatprep.subr.bf16.mxu0 %v6077_v8  ;;  %4089 = vmatprep.subr.bf16.mxu1 %v6080_v9  ;;  %v6167_v8 = vld [vmem:[%s7037_s19 + $0x7c4] ss:$16 sps:$4 sm:$0xff]   ;;  %v6170_v9 = vld [vmem:[%s7037_s19 + $0x7cc] ss:$16 sps:$4 sm:$0xff]  }
 0x153   : > { %3746 = vmatpush1.bf16.msra.mxu0 %v6075_v10  ;;  %4090 = vmatpush1.bf16.msra.mxu1 %v6078_v11  ;;  %v6165_v10 = vld [vmem:[%s7037_s19 + $0x7c0] ss:$16 sps:$4 sm:$0xff]   ;;  %v6168_v11 = vld [vmem:[%s7037_s19 + $0x7c8] ss:$16 sps:$4 sm:$0xff]  }
 0x154   : > { %3758 = vmatprep.subr.bf16.mxu0 %v6083_v12  ;;  %4102 = vmatprep.subr.bf16.mxu1 %v6086_v13  ;;  %v6173_v12 = vld [vmem:[%s7037_s19 + $0x7e4] ss:$16 sps:$4 sm:$0xff]   ;;  %v6176_v13 = vld [vmem:[%s7037_s19 + $0x7ec] ss:$16 sps:$4 sm:$0xff]  }
 0x156   : > { %3748 = vmatmul.mubr.bf16.vlgmr.msra.gmra.mrb[0].mxu0 %v5073_v18  ;;  %4092 = vmatmul.mubr.bf16.vlgmr.msra.gmra.mrb[0].mxu1 %v5073_v18  ;;  %v6179_v18 = vld [vmem:[%s7037_s19 + $0x804] ss:$16 sps:$4 sm:$0xff]  }
 0x157   : > { %3759 = vmatpush1.bf16.msra.mxu0 %v6081_v14  ;;  %4103 = vmatpush1.bf16.msra.mxu1 %v6084_v17  ;;  %v6171_v14 = vld [vmem:[%s7037_s19 + $0x7e0] ss:$16 sps:$4 sm:$0xff]   ;;  %v6174_v17 = vld [vmem:[%s7037_s19 + $0x7e8] ss:$16 sps:$4 sm:$0xff]  }
 0x158   : > { %3760 = vmatprep.subr.bf16.mxu0 %v6089_v21  ;;  %4104 = vmatprep.subr.bf16.mxu1 %v6092_v15  ;;  %v6182_v21 = vld [vmem:[%s7037_s19 + $0x80c] ss:$16 sps:$4 sm:$0xff]  }
 0x159   : > { %3790 = vmatprep.mubr.bf16.mxu0 %v5076_v16  ;;  %4134 = vmatprep.mubr.bf16.mxu1 %v5076_v16  ;;  %v7368_v15 = vld [vmem:[%s7787_s0 + $0x20] sm:$0xff]  ;;  %v5075_v16 = vcombine.low %v7294_v19, %v7299_v20 }
 0x15a   : > { %v6183_v20 = vld [vmem:[%s7037_s19 + $0x820] ss:$16 sps:$4 sm:$0xff]  }
 0x15b   : > { %3761 = vmatpush1.bf16.msra.mxu0 %v6087_v22  ;;  %4105 = vmatpush1.bf16.msra.mxu1 %v6090_v23  ;;  %v7375_v22 = vld [vmem:[%s7787_s0 + $0x60] sm:$0xff] }
 0x15c   : > { %3762 = vmatprep.subr.bf16.mxu0 %v6095_v24  ;;  %4106 = vmatprep.subr.bf16.mxu1 %v6098_v25  ;;  %v6177_v23 = vld [vmem:[%s7037_s19 + $0x800] ss:$16 sps:$4 sm:$0xff]   ;;  %v6180_v24 = vld [vmem:[%s7037_s19 + $0x808] ss:$16 sps:$4 sm:$0xff]   ;;  %v6185_v25 = vld [vmem:[%s7037_s19 + $0x824] ss:$16 sps:$4 sm:$0xff]   ;;  %v5078_v19 = vcombine.high %v7368_v15, %v7375_v22 }
 0x15f   : > { %3763 = vmatpush1.bf16.msra.mxu0 %v6093_v26  ;;  %4107 = vmatpush1.bf16.msra.mxu1 %v6096_v27  ;;  %v6188_v26 = vld [vmem:[%s7037_s19 + $0x82c] ss:$16 sps:$4 sm:$0xff]   ;;  %v6186_v27 = vld [vmem:[%s7037_s19 + $0x828] ss:$16 sps:$4 sm:$0xff]  }
 0x160   : > { %3764 = vmatprep.subr.bf16.mxu0 %v6101_v28  ;;  %4108 = vmatprep.subr.bf16.mxu1 %v6104_v29  ;;  %v6191_v28 = vld [vmem:[%s7037_s19 + $0x844] ss:$16 sps:$4 sm:$0xff]   ;;  %v6194_v29 = vld [vmem:[%s7037_s19 + $0x84c] ss:$16 sps:$4 sm:$0xff]  }
 0x163   : > { %3765 = vmatpush1.bf16.msra.mxu0 %v6099_v30  ;;  %4109 = vmatpush1.bf16.msra.mxu1 %v6102_v31  ;;  %v6189_v30 = vld [vmem:[%s7037_s19 + $0x840] ss:$16 sps:$4 sm:$0xff]   ;;  %v6192_v31 = vld [vmem:[%s7037_s19 + $0x848] ss:$16 sps:$4 sm:$0xff]  }
 0x164   : > { %3766 = vmatprep.subr.bf16.mxu0 %v6107_v32  ;;  %4110 = vmatprep.subr.bf16.mxu1 %v6110_v33  ;;  %v6197_v32 = vld [vmem:[%s7037_s19 + $0x864] ss:$16 sps:$4 sm:$0xff]   ;;  %v6200_v33 = vld [vmem:[%s7037_s19 + $0x86c] ss:$16 sps:$4 sm:$0xff]  }
 0x167   : > { %3767 = vmatpush1.bf16.msra.mxu0 %v6105_v34  ;;  %4111 = vmatpush1.bf16.msra.mxu1 %v6108_v35  ;;  %v6195_v34 = vld [vmem:[%s7037_s19 + $0x860] ss:$16 sps:$4 sm:$0xff]   ;;  %v6198_v35 = vld [vmem:[%s7037_s19 + $0x868] ss:$16 sps:$4 sm:$0xff]  }
 0x168   : > { %3768 = vmatprep.subr.bf16.mxu0 %v6113_v36  ;;  %4112 = vmatprep.subr.bf16.mxu1 %v6116_v37  ;;  %v6203_v36 = vld [vmem:[%s7037_s19 + $0x884] ss:$16 sps:$4 sm:$0xff]   ;;  %v6206_v37 = vld [vmem:[%s7037_s19 + $0x88c] ss:$16 sps:$4 sm:$0xff]  }
 0x16b   : > { %3769 = vmatpush1.bf16.msra.mxu0 %v6111_v38  ;;  %4113 = vmatpush1.bf16.msra.mxu1 %v6114_v39  ;;  %v6201_v38 = vld [vmem:[%s7037_s19 + $0x880] ss:$16 sps:$4 sm:$0xff]   ;;  %v6204_v39 = vld [vmem:[%s7037_s19 + $0x888] ss:$16 sps:$4 sm:$0xff]  }
 0x16c   : > { %3770 = vmatprep.subr.bf16.mxu0 %v6119_v40  ;;  %4114 = vmatprep.subr.bf16.mxu1 %v6122_v41  ;;  %v6209_v40 = vld [vmem:[%s7037_s19 + $0x8a4] ss:$16 sps:$4 sm:$0xff]   ;;  %v6212_v41 = vld [vmem:[%s7037_s19 + $0x8ac] ss:$16 sps:$4 sm:$0xff]  }
 0x16f   : > { %3771 = vmatpush1.bf16.msra.mxu0 %v6117_v42  ;;  %4115 = vmatpush1.bf16.msra.mxu1 %v6120_v43  ;;  %v6207_v42 = vld [vmem:[%s7037_s19 + $0x8a0] ss:$16 sps:$4 sm:$0xff]   ;;  %v6210_v43 = vld [vmem:[%s7037_s19 + $0x8a8] ss:$16 sps:$4 sm:$0xff]  }
 0x170   : > { %3772 = vmatprep.subr.bf16.mxu0 %v6125_v44  ;;  %4116 = vmatprep.subr.bf16.mxu1 %v6128_v45  ;;  %v6215_v44 = vld [vmem:[%s7037_s19 + $0x8c4] ss:$16 sps:$4 sm:$0xff]   ;;  %v6218_v45 = vld [vmem:[%s7037_s19 + $0x8cc] ss:$16 sps:$4 sm:$0xff]  }
 0x173   : > { %3773 = vmatpush1.bf16.msra.mxu0 %v6123_v46  ;;  %4117 = vmatpush1.bf16.msra.mxu1 %v6126_v47  ;;  %v6213_v46 = vld [vmem:[%s7037_s19 + $0x8c0] ss:$16 sps:$4 sm:$0xff]   ;;  %v6216_v47 = vld [vmem:[%s7037_s19 + $0x8c8] ss:$16 sps:$4 sm:$0xff]  }
 0x174   : > { %3774 = vmatprep.subr.bf16.mxu0 %v6131_v48  ;;  %4118 = vmatprep.subr.bf16.mxu1 %v6134_v49  ;;  %v6221_v48 = vld [vmem:[%s7037_s19 + $0x8e4] ss:$16 sps:$4 sm:$0xff]   ;;  %v6224_v49 = vld [vmem:[%s7037_s19 + $0x8ec] ss:$16 sps:$4 sm:$0xff]  }
 0x177   : > { %3775 = vmatpush1.bf16.msra.mxu0 %v6129_v50  ;;  %4119 = vmatpush1.bf16.msra.mxu1 %v6132_v51  ;;  %v6219_v50 = vld [vmem:[%s7037_s19 + $0x8e0] ss:$16 sps:$4 sm:$0xff]   ;;  %v6222_v51 = vld [vmem:[%s7037_s19 + $0x8e8] ss:$16 sps:$4 sm:$0xff]  }
 0x178   : > { %3776 = vmatprep.subr.bf16.mxu0 %v6137_v52  ;;  %4120 = vmatprep.subr.bf16.mxu1 %v6140_v53  ;;  %v6227_v52 = vld [vmem:[%s7037_s19 + $0x904] ss:$16 sps:$4 sm:$0xff]   ;;  %v6230_v53 = vld [vmem:[%s7037_s19 + $0x90c] ss:$16 sps:$4 sm:$0xff]  }
 0x17b   : > { %3777 = vmatpush1.bf16.msra.mxu0 %v6135_v54  ;;  %4121 = vmatpush1.bf16.msra.mxu1 %v6138_v55  ;;  %v6225_v54 = vld [vmem:[%s7037_s19 + $0x900] ss:$16 sps:$4 sm:$0xff]   ;;  %v6228_v55 = vld [vmem:[%s7037_s19 + $0x908] ss:$16 sps:$4 sm:$0xff]  }
 0x17c   : > { %3778 = vmatprep.subr.bf16.mxu0 %v6143_v56  ;;  %4122 = vmatprep.subr.bf16.mxu1 %v6146_v57  ;;  %v6233_v56 = vld [vmem:[%s7037_s19 + $0x924] ss:$16 sps:$4 sm:$0xff]   ;;  %v6236_v57 = vld [vmem:[%s7037_s19 + $0x92c] ss:$16 sps:$4 sm:$0xff]  }
 0x17f   : > { %3779 = vmatpush1.bf16.msra.mxu0 %v6141_v58  ;;  %4123 = vmatpush1.bf16.msra.mxu1 %v6144_v59  ;;  %v6231_v58 = vld [vmem:[%s7037_s19 + $0x920] ss:$16 sps:$4 sm:$0xff]   ;;  %v6234_v59 = vld [vmem:[%s7037_s19 + $0x928] ss:$16 sps:$4 sm:$0xff]  }
 0x180   : > { %3780 = vmatprep.subr.bf16.mxu0 %v6149_v60  ;;  %4124 = vmatprep.subr.bf16.mxu1 %v6152_v61  ;;  %v6239_v60 = vld [vmem:[%s7037_s19 + $0x944] ss:$16 sps:$4 sm:$0xff]   ;;  %v6242_v61 = vld [vmem:[%s7037_s19 + $0x94c] ss:$16 sps:$4 sm:$0xff]  }
 0x183   : > { %3781 = vmatpush1.bf16.msra.mxu0 %v6147_v62  ;;  %4125 = vmatpush1.bf16.msra.mxu1 %v6150_v63  ;;  %v6237_v62 = vld [vmem:[%s7037_s19 + $0x940] ss:$16 sps:$4 sm:$0xff]   ;;  %v6240_v63 = vld [vmem:[%s7037_s19 + $0x948] ss:$16 sps:$4 sm:$0xff]  }
 0x184   : > { %3782 = vmatprep.subr.bf16.mxu0 %v6155_v0  ;;  %4126 = vmatprep.subr.bf16.mxu1 %v6158_v1  ;;  %v6245_v0 = vld [vmem:[%s7037_s19 + $0x964] ss:$16 sps:$4 sm:$0xff]   ;;  %v6248_v1 = vld [vmem:[%s7037_s19 + $0x96c] ss:$16 sps:$4 sm:$0xff]  }
 0x187   : > { %3783 = vmatpush1.bf16.msra.mxu0 %v6153_v2  ;;  %4127 = vmatpush1.bf16.msra.mxu1 %v6156_v3  ;;  %v6243_v2 = vld [vmem:[%s7037_s19 + $0x960] ss:$16 sps:$4 sm:$0xff]   ;;  %v6246_v3 = vld [vmem:[%s7037_s19 + $0x968] ss:$16 sps:$4 sm:$0xff]  }
 0x188   : > { %3784 = vmatprep.subr.bf16.mxu0 %v6161_v4  ;;  %4128 = vmatprep.subr.bf16.mxu1 %v6164_v5  ;;  %v6251_v4 = vld [vmem:[%s7037_s19 + $0x984] ss:$16 sps:$4 sm:$0xff]   ;;  %v6254_v5 = vld [vmem:[%s7037_s19 + $0x98c] ss:$16 sps:$4 sm:$0xff]  }
 0x18b   : > { %3785 = vmatpush1.bf16.msra.mxu0 %v6159_v6  ;;  %4129 = vmatpush1.bf16.msra.mxu1 %v6162_v7  ;;  %v6249_v6 = vld [vmem:[%s7037_s19 + $0x980] ss:$16 sps:$4 sm:$0xff]   ;;  %v6252_v7 = vld [vmem:[%s7037_s19 + $0x988] ss:$16 sps:$4 sm:$0xff]  }
 0x18c   : > { %3786 = vmatprep.subr.bf16.mxu0 %v6167_v8  ;;  %4130 = vmatprep.subr.bf16.mxu1 %v6170_v9  ;;  %v6257_v8 = vld [vmem:[%s7037_s19 + $0x9a4] ss:$16 sps:$4 sm:$0xff]   ;;  %v6260_v9 = vld [vmem:[%s7037_s19 + $0x9ac] ss:$16 sps:$4 sm:$0xff]  }
 0x18f   : > { %3787 = vmatpush1.bf16.msra.mxu0 %v6165_v10  ;;  %4131 = vmatpush1.bf16.msra.mxu1 %v6168_v11  ;;  %v6255_v10 = vld [vmem:[%s7037_s19 + $0x9a0] ss:$16 sps:$4 sm:$0xff]   ;;  %v6258_v11 = vld [vmem:[%s7037_s19 + $0x9a8] ss:$16 sps:$4 sm:$0xff]  }
 0x190   : > { %3788 = vmatprep.subr.bf16.mxu0 %v6173_v12  ;;  %4132 = vmatprep.subr.bf16.mxu1 %v6176_v13  ;;  %v6263_v12 = vld [vmem:[%s7037_s19 + $0x9c4] ss:$16 sps:$4 sm:$0xff]   ;;  %v6266_v13 = vld [vmem:[%s7037_s19 + $0x9cc] ss:$16 sps:$4 sm:$0xff]  }
 0x193   : > { %3789 = vmatpush1.bf16.msra.mxu0 %v6171_v14  ;;  %4133 = vmatpush1.bf16.msra.mxu1 %v6174_v17  ;;  %v6261_v14 = vld [vmem:[%s7037_s19 + $0x9c0] ss:$16 sps:$4 sm:$0xff]   ;;  %v6264_v17 = vld [vmem:[%s7037_s19 + $0x9c8] ss:$16 sps:$4 sm:$0xff]  }
 0x194   : > { %3801 = vmatprep.subr.bf16.mxu0 %v6179_v18  ;;  %4145 = vmatprep.subr.bf16.mxu1 %v6182_v21  ;;  %v6269_v18 = vld [vmem:[%s7037_s19 + $0x9e4] ss:$16 sps:$4 sm:$0xff]   ;;  %v6272_v21 = vld [vmem:[%s7037_s19 + $0x9ec] ss:$16 sps:$4 sm:$0xff]  }
 0x196   : > { %3791 = vmatmul.mubr.bf16.vlgmr.msra.gmra.mrb[0].mxu0 %v5075_v16  ;;  %4135 = vmatmul.mubr.bf16.vlgmr.msra.gmra.mrb[0].mxu1 %v5075_v16  ;;  %v6267_v16 = vld [vmem:[%s7037_s19 + $0x9e0] ss:$16 sps:$4 sm:$0xff]  }
 0x197   : > { %3802 = vmatpush1.bf16.msra.mxu0 %v6177_v23  ;;  %4146 = vmatpush1.bf16.msra.mxu1 %v6180_v24  ;;  %v6270_v23 = vld [vmem:[%s7037_s19 + $0x9e8] ss:$16 sps:$4 sm:$0xff]   ;;  %v6275_v24 = vld [vmem:[%s7037_s19 + $0xa04] ss:$16 sps:$4 sm:$0xff]  }
 0x198   : > { %3803 = vmatprep.subr.bf16.mxu0 %v6185_v25  ;;  %4147 = vmatprep.subr.bf16.mxu1 %v6188_v26  ;;  %v6278_v25 = vld [vmem:[%s7037_s19 + $0xa0c] ss:$16 sps:$4 sm:$0xff]  }
 0x199   : > { %3833 = vmatprep.mubr.bf16.mxu0 %v5078_v19  ;;  %4177 = vmatprep.mubr.bf16.mxu1 %v5078_v19  ;;  %v7446_v26 = vld [vmem:[%s7787_s0 + $0x28] sm:$0xff] }
 0x19a   : > { %v7451_v19 = vld [vmem:[%s7787_s0 + $0x68] sm:$0xff] }
 0x19b   : > { %3804 = vmatpush1.bf16.msra.mxu0 %v6183_v20  ;;  %4148 = vmatpush1.bf16.msra.mxu1 %v6186_v27  ;;  %v5077_v20 = vcombine.low %v7368_v15, %v7375_v22  ;;  %v6273_v27 = vld [vmem:[%s7037_s19 + $0xa00] ss:$16 sps:$4 sm:$0xff]   ;;  %v6282_v22 = vld [vmem:[%s7037_s19 + $0xa28] ss:$16 sps:$4 sm:$0xff]  }
 0x19c   : > { %3805 = vmatprep.subr.bf16.mxu0 %v6191_v28  ;;  %4149 = vmatprep.subr.bf16.mxu1 %v6194_v29  ;;  %v6276_v28 = vld [vmem:[%s7037_s19 + $0xa08] ss:$16 sps:$4 sm:$0xff]   ;;  %v6281_v29 = vld [vmem:[%s7037_s19 + $0xa24] ss:$16 sps:$4 sm:$0xff]   ;;  %v6279_v15 = vld [vmem:[%s7037_s19 + $0xa20] ss:$16 sps:$4 sm:$0xff]  }
 0x19f   : > { %3806 = vmatpush1.bf16.msra.mxu0 %v6189_v30  ;;  %4150 = vmatpush1.bf16.msra.mxu1 %v6192_v31  ;;  %v6284_v30 = vld [vmem:[%s7037_s19 + $0xa2c] ss:$16 sps:$4 sm:$0xff]   ;;  %v5080_v31 = vcombine.high %v7446_v26, %v7451_v19 }
 0x1a0   : > { %3807 = vmatprep.subr.bf16.mxu0 %v6197_v32  ;;  %4151 = vmatprep.subr.bf16.mxu1 %v6200_v33  ;;  %v6287_v32 = vld [vmem:[%s7037_s19 + $0xa44] ss:$16 sps:$4 sm:$0xff]   ;;  %v6290_v33 = vld [vmem:[%s7037_s19 + $0xa4c] ss:$16 sps:$4 sm:$0xff]  }
 0x1a3   : > { %3808 = vmatpush1.bf16.msra.mxu0 %v6195_v34  ;;  %4152 = vmatpush1.bf16.msra.mxu1 %v6198_v35  ;;  %v6285_v34 = vld [vmem:[%s7037_s19 + $0xa40] ss:$16 sps:$4 sm:$0xff]   ;;  %v6288_v35 = vld [vmem:[%s7037_s19 + $0xa48] ss:$16 sps:$4 sm:$0xff]  }
 0x1a4   : > { %3809 = vmatprep.subr.bf16.mxu0 %v6203_v36  ;;  %4153 = vmatprep.subr.bf16.mxu1 %v6206_v37  ;;  %v6293_v36 = vld [vmem:[%s7037_s19 + $0xa64] ss:$16 sps:$4 sm:$0xff]   ;;  %v6296_v37 = vld [vmem:[%s7037_s19 + $0xa6c] ss:$16 sps:$4 sm:$0xff]  }
 0x1a7   : > { %3810 = vmatpush1.bf16.msra.mxu0 %v6201_v38  ;;  %4154 = vmatpush1.bf16.msra.mxu1 %v6204_v39  ;;  %v6291_v38 = vld [vmem:[%s7037_s19 + $0xa60] ss:$16 sps:$4 sm:$0xff]   ;;  %v6294_v39 = vld [vmem:[%s7037_s19 + $0xa68] ss:$16 sps:$4 sm:$0xff]  }
 0x1a8   : > { %3811 = vmatprep.subr.bf16.mxu0 %v6209_v40  ;;  %4155 = vmatprep.subr.bf16.mxu1 %v6212_v41  ;;  %v6299_v40 = vld [vmem:[%s7037_s19 + $0xa84] ss:$16 sps:$4 sm:$0xff]   ;;  %v6302_v41 = vld [vmem:[%s7037_s19 + $0xa8c] ss:$16 sps:$4 sm:$0xff]  }
 0x1ab   : > { %3812 = vmatpush1.bf16.msra.mxu0 %v6207_v42  ;;  %4156 = vmatpush1.bf16.msra.mxu1 %v6210_v43  ;;  %v6297_v42 = vld [vmem:[%s7037_s19 + $0xa80] ss:$16 sps:$4 sm:$0xff]   ;;  %v6300_v43 = vld [vmem:[%s7037_s19 + $0xa88] ss:$16 sps:$4 sm:$0xff]  }
 0x1ac   : > { %3813 = vmatprep.subr.bf16.mxu0 %v6215_v44  ;;  %4157 = vmatprep.subr.bf16.mxu1 %v6218_v45  ;;  %v6305_v44 = vld [vmem:[%s7037_s19 + $0xaa4] ss:$16 sps:$4 sm:$0xff]   ;;  %v6308_v45 = vld [vmem:[%s7037_s19 + $0xaac] ss:$16 sps:$4 sm:$0xff]  }
 0x1af   : > { %3814 = vmatpush1.bf16.msra.mxu0 %v6213_v46  ;;  %4158 = vmatpush1.bf16.msra.mxu1 %v6216_v47  ;;  %v6303_v46 = vld [vmem:[%s7037_s19 + $0xaa0] ss:$16 sps:$4 sm:$0xff]   ;;  %v6306_v47 = vld [vmem:[%s7037_s19 + $0xaa8] ss:$16 sps:$4 sm:$0xff]  }
 0x1b0   : > { %3815 = vmatprep.subr.bf16.mxu0 %v6221_v48  ;;  %4159 = vmatprep.subr.bf16.mxu1 %v6224_v49  ;;  %v6311_v48 = vld [vmem:[%s7037_s19 + $0xac4] ss:$16 sps:$4 sm:$0xff]   ;;  %v6314_v49 = vld [vmem:[%s7037_s19 + $0xacc] ss:$16 sps:$4 sm:$0xff]  }
 0x1b3   : > { %3816 = vmatpush1.bf16.msra.mxu0 %v6219_v50  ;;  %4160 = vmatpush1.bf16.msra.mxu1 %v6222_v51  ;;  %v6309_v50 = vld [vmem:[%s7037_s19 + $0xac0] ss:$16 sps:$4 sm:$0xff]   ;;  %v6312_v51 = vld [vmem:[%s7037_s19 + $0xac8] ss:$16 sps:$4 sm:$0xff]  }
 0x1b4   : > { %3817 = vmatprep.subr.bf16.mxu0 %v6227_v52  ;;  %4161 = vmatprep.subr.bf16.mxu1 %v6230_v53  ;;  %v6317_v52 = vld [vmem:[%s7037_s19 + $0xae4] ss:$16 sps:$4 sm:$0xff]   ;;  %v6320_v53 = vld [vmem:[%s7037_s19 + $0xaec] ss:$16 sps:$4 sm:$0xff]  }
 0x1b7   : > { %3818 = vmatpush1.bf16.msra.mxu0 %v6225_v54  ;;  %4162 = vmatpush1.bf16.msra.mxu1 %v6228_v55  ;;  %v6315_v54 = vld [vmem:[%s7037_s19 + $0xae0] ss:$16 sps:$4 sm:$0xff]   ;;  %v6318_v55 = vld [vmem:[%s7037_s19 + $0xae8] ss:$16 sps:$4 sm:$0xff]  }
 0x1b8   : > { %3819 = vmatprep.subr.bf16.mxu0 %v6233_v56  ;;  %4163 = vmatprep.subr.bf16.mxu1 %v6236_v57  ;;  %v6323_v56 = vld [vmem:[%s7037_s19 + $0xb04] ss:$16 sps:$4 sm:$0xff]   ;;  %v6326_v57 = vld [vmem:[%s7037_s19 + $0xb0c] ss:$16 sps:$4 sm:$0xff]  }
 0x1bb   : > { %3820 = vmatpush1.bf16.msra.mxu0 %v6231_v58  ;;  %4164 = vmatpush1.bf16.msra.mxu1 %v6234_v59  ;;  %v6321_v58 = vld [vmem:[%s7037_s19 + $0xb00] ss:$16 sps:$4 sm:$0xff]   ;;  %v6324_v59 = vld [vmem:[%s7037_s19 + $0xb08] ss:$16 sps:$4 sm:$0xff]  }
 0x1bc   : > { %3821 = vmatprep.subr.bf16.mxu0 %v6239_v60  ;;  %4165 = vmatprep.subr.bf16.mxu1 %v6242_v61  ;;  %v6329_v60 = vld [vmem:[%s7037_s19 + $0xb24] ss:$16 sps:$4 sm:$0xff]   ;;  %v6332_v61 = vld [vmem:[%s7037_s19 + $0xb2c] ss:$16 sps:$4 sm:$0xff]  }
 0x1bf   : > { %3822 = vmatpush1.bf16.msra.mxu0 %v6237_v62  ;;  %4166 = vmatpush1.bf16.msra.mxu1 %v6240_v63  ;;  %v6327_v62 = vld [vmem:[%s7037_s19 + $0xb20] ss:$16 sps:$4 sm:$0xff]   ;;  %v6330_v63 = vld [vmem:[%s7037_s19 + $0xb28] ss:$16 sps:$4 sm:$0xff]  }
 0x1c0   : > { %3823 = vmatprep.subr.bf16.mxu0 %v6245_v0  ;;  %4167 = vmatprep.subr.bf16.mxu1 %v6248_v1  ;;  %v6335_v0 = vld [vmem:[%s7037_s19 + $0xb44] ss:$16 sps:$4 sm:$0xff]   ;;  %v6338_v1 = vld [vmem:[%s7037_s19 + $0xb4c] ss:$16 sps:$4 sm:$0xff]  }
 0x1c3   : > { %3824 = vmatpush1.bf16.msra.mxu0 %v6243_v2  ;;  %4168 = vmatpush1.bf16.msra.mxu1 %v6246_v3  ;;  %v6333_v2 = vld [vmem:[%s7037_s19 + $0xb40] ss:$16 sps:$4 sm:$0xff]   ;;  %v6336_v3 = vld [vmem:[%s7037_s19 + $0xb48] ss:$16 sps:$4 sm:$0xff]  }
 0x1c4   : > { %3825 = vmatprep.subr.bf16.mxu0 %v6251_v4  ;;  %4169 = vmatprep.subr.bf16.mxu1 %v6254_v5  ;;  %v6341_v4 = vld [vmem:[%s7037_s19 + $0xb64] ss:$16 sps:$4 sm:$0xff]   ;;  %v6344_v5 = vld [vmem:[%s7037_s19 + $0xb6c] ss:$16 sps:$4 sm:$0xff]  }
 0x1c7   : > { %3826 = vmatpush1.bf16.msra.mxu0 %v6249_v6  ;;  %4170 = vmatpush1.bf16.msra.mxu1 %v6252_v7  ;;  %v6339_v6 = vld [vmem:[%s7037_s19 + $0xb60] ss:$16 sps:$4 sm:$0xff]   ;;  %v6342_v7 = vld [vmem:[%s7037_s19 + $0xb68] ss:$16 sps:$4 sm:$0xff]  }
 0x1c8   : > { %3827 = vmatprep.subr.bf16.mxu0 %v6257_v8  ;;  %4171 = vmatprep.subr.bf16.mxu1 %v6260_v9  ;;  %v6347_v8 = vld [vmem:[%s7037_s19 + $0xb84] ss:$16 sps:$4 sm:$0xff]   ;;  %v6350_v9 = vld [vmem:[%s7037_s19 + $0xb8c] ss:$16 sps:$4 sm:$0xff]  }
 0x1cb   : > { %3828 = vmatpush1.bf16.msra.mxu0 %v6255_v10  ;;  %4172 = vmatpush1.bf16.msra.mxu1 %v6258_v11  ;;  %v6345_v10 = vld [vmem:[%s7037_s19 + $0xb80] ss:$16 sps:$4 sm:$0xff]   ;;  %v6348_v11 = vld [vmem:[%s7037_s19 + $0xb88] ss:$16 sps:$4 sm:$0xff]  }
 0x1cc   : > { %3829 = vmatprep.subr.bf16.mxu0 %v6263_v12  ;;  %4173 = vmatprep.subr.bf16.mxu1 %v6266_v13  ;;  %v6353_v12 = vld [vmem:[%s7037_s19 + $0xba4] ss:$16 sps:$4 sm:$0xff]   ;;  %v6356_v13 = vld [vmem:[%s7037_s19 + $0xbac] ss:$16 sps:$4 sm:$0xff]  }
 0x1cf   : > { %3830 = vmatpush1.bf16.msra.mxu0 %v6261_v14  ;;  %4174 = vmatpush1.bf16.msra.mxu1 %v6264_v17  ;;  %v6351_v14 = vld [vmem:[%s7037_s19 + $0xba0] ss:$16 sps:$4 sm:$0xff]   ;;  %v6354_v17 = vld [vmem:[%s7037_s19 + $0xba8] ss:$16 sps:$4 sm:$0xff]  }
 0x1d0   : > { %3831 = vmatprep.subr.bf16.mxu0 %v6269_v18  ;;  %4175 = vmatprep.subr.bf16.mxu1 %v6272_v21  ;;  %v6359_v18 = vld [vmem:[%s7037_s19 + $0xbc4] ss:$16 sps:$4 sm:$0xff]   ;;  %v6362_v21 = vld [vmem:[%s7037_s19 + $0xbcc] ss:$16 sps:$4 sm:$0xff]  }
 0x1d3   : > { %3832 = vmatpush1.bf16.msra.mxu0 %v6267_v16  ;;  %4176 = vmatpush1.bf16.msra.mxu1 %v6270_v23  ;;  %v6357_v16 = vld [vmem:[%s7037_s19 + $0xbc0] ss:$16 sps:$4 sm:$0xff]   ;;  %v6360_v23 = vld [vmem:[%s7037_s19 + $0xbc8] ss:$16 sps:$4 sm:$0xff]  }
 0x1d4   : > { %3844 = vmatprep.subr.bf16.mxu0 %v6275_v24  ;;  %4188 = vmatprep.subr.bf16.mxu1 %v6278_v25  ;;  %v6365_v24 = vld [vmem:[%s7037_s19 + $0xbe4] ss:$16 sps:$4 sm:$0xff]   ;;  %v6368_v25 = vld [vmem:[%s7037_s19 + $0xbec] ss:$16 sps:$4 sm:$0xff]  }
 0x1d6   : > { %3834 = vmatmul.mubr.bf16.vlgmr.msra.gmra.mrb[0].mxu0 %v5077_v20  ;;  %4178 = vmatmul.mubr.bf16.vlgmr.msra.gmra.mrb[0].mxu1 %v5077_v20  ;;  %v6363_v20 = vld [vmem:[%s7037_s19 + $0xbe0] ss:$16 sps:$4 sm:$0xff]  }
 0x1d7   : > { %3845 = vmatpush1.bf16.msra.mxu0 %v6273_v27  ;;  %4189 = vmatpush1.bf16.msra.mxu1 %v6276_v28  ;;  %v6366_v27 = vld [vmem:[%s7037_s19 + $0xbe8] ss:$16 sps:$4 sm:$0xff]   ;;  %v6371_v28 = vld [vmem:[%s7037_s19 + $0xc04] ss:$16 sps:$4 sm:$0xff]  }
 0x1d8   : > { %3846 = vmatprep.subr.bf16.mxu0 %v6281_v29  ;;  %4190 = vmatprep.subr.bf16.mxu1 %v6284_v30  ;;  %v6374_v29 = vld [vmem:[%s7037_s19 + $0xc0c] ss:$16 sps:$4 sm:$0xff]   ;;  %v5079_v30 = vcombine.low %v7446_v26, %v7451_v19  ;;  %v6377_v26 = vld [vmem:[%s7037_s19 + $0xc24] ss:$16 sps:$4 sm:$0xff]  }
 0x1d9   : > { %3876 = vmatprep.mubr.bf16.mxu0 %v5080_v31  ;;  %4220 = vmatprep.mubr.bf16.mxu1 %v5080_v31  ;;  %v7526_v31 = vld [vmem:[%s7787_s0 + $0x30] sm:$0xff] }
 0x1da   : > { %v6380_v19 = vld [vmem:[%s7037_s19 + $0xc2c] ss:$16 sps:$4 sm:$0xff]  }
 0x1db   : > { %3847 = vmatpush1.bf16.msra.mxu0 %v6279_v15  ;;  %4191 = vmatpush1.bf16.msra.mxu1 %v6282_v22  ;;  %v7531_v15 = vld [vmem:[%s7787_s0 + $0x70] sm:$0xff] }
 0x1dc   : > { %3848 = vmatprep.subr.bf16.mxu0 %v6287_v32  ;;  %4192 = vmatprep.subr.bf16.mxu1 %v6290_v33  ;;  %v6369_v22 = vld [vmem:[%s7037_s19 + $0xc00] ss:$16 sps:$4 sm:$0xff]   ;;  %v6372_v32 = vld [vmem:[%s7037_s19 + $0xc08] ss:$16 sps:$4 sm:$0xff]   ;;  %v5082_v33 = vcombine.high %v7526_v31, %v7531_v15 }
 0x1df   : > { %3849 = vmatpush1.bf16.msra.mxu0 %v6285_v34  ;;  %4193 = vmatpush1.bf16.msra.mxu1 %v6288_v35  ;;  %v6375_v34 = vld [vmem:[%s7037_s19 + $0xc20] ss:$16 sps:$4 sm:$0xff]   ;;  %v6378_v35 = vld [vmem:[%s7037_s19 + $0xc28] ss:$16 sps:$4 sm:$0xff]  }
 0x1e0   : > { %3850 = vmatprep.subr.bf16.mxu0 %v6293_v36  ;;  %4194 = vmatprep.subr.bf16.mxu1 %v6296_v37  ;;  %v6383_v36 = vld [vmem:[%s7037_s19 + $0xc44] ss:$16 sps:$4 sm:$0xff]   ;;  %v6386_v37 = vld [vmem:[%s7037_s19 + $0xc4c] ss:$16 sps:$4 sm:$0xff]  }
 0x1e3   : > { %3851 = vmatpush1.bf16.msra.mxu0 %v6291_v38  ;;  %4195 = vmatpush1.bf16.msra.mxu1 %v6294_v39  ;;  %v6381_v38 = vld [vmem:[%s7037_s19 + $0xc40] ss:$16 sps:$4 sm:$0xff]   ;;  %v6384_v39 = vld [vmem:[%s7037_s19 + $0xc48] ss:$16 sps:$4 sm:$0xff]  }
 0x1e4   : > { %3852 = vmatprep.subr.bf16.mxu0 %v6299_v40  ;;  %4196 = vmatprep.subr.bf16.mxu1 %v6302_v41  ;;  %v6389_v40 = vld [vmem:[%s7037_s19 + $0xc64] ss:$16 sps:$4 sm:$0xff]   ;;  %v6392_v41 = vld [vmem:[%s7037_s19 + $0xc6c] ss:$16 sps:$4 sm:$0xff]  }
 0x1e7   : > { %3853 = vmatpush1.bf16.msra.mxu0 %v6297_v42  ;;  %4197 = vmatpush1.bf16.msra.mxu1 %v6300_v43  ;;  %v6387_v42 = vld [vmem:[%s7037_s19 + $0xc60] ss:$16 sps:$4 sm:$0xff]   ;;  %v6390_v43 = vld [vmem:[%s7037_s19 + $0xc68] ss:$16 sps:$4 sm:$0xff]  }
 0x1e8   : > { %3854 = vmatprep.subr.bf16.mxu0 %v6305_v44  ;;  %4198 = vmatprep.subr.bf16.mxu1 %v6308_v45  ;;  %v6395_v44 = vld [vmem:[%s7037_s19 + $0xc84] ss:$16 sps:$4 sm:$0xff]   ;;  %v6398_v45 = vld [vmem:[%s7037_s19 + $0xc8c] ss:$16 sps:$4 sm:$0xff]  }
 0x1eb   : > { %3855 = vmatpush1.bf16.msra.mxu0 %v6303_v46  ;;  %4199 = vmatpush1.bf16.msra.mxu1 %v6306_v47  ;;  %v6393_v46 = vld [vmem:[%s7037_s19 + $0xc80] ss:$16 sps:$4 sm:$0xff]   ;;  %v6396_v47 = vld [vmem:[%s7037_s19 + $0xc88] ss:$16 sps:$4 sm:$0xff]  }
 0x1ec   : > { %3856 = vmatprep.subr.bf16.mxu0 %v6311_v48  ;;  %4200 = vmatprep.subr.bf16.mxu1 %v6314_v49  ;;  %v6401_v48 = vld [vmem:[%s7037_s19 + $0xca4] ss:$16 sps:$4 sm:$0xff]   ;;  %v6404_v49 = vld [vmem:[%s7037_s19 + $0xcac] ss:$16 sps:$4 sm:$0xff]  }
 0x1ef   : > { %3857 = vmatpush1.bf16.msra.mxu0 %v6309_v50  ;;  %4201 = vmatpush1.bf16.msra.mxu1 %v6312_v51  ;;  %v6399_v50 = vld [vmem:[%s7037_s19 + $0xca0] ss:$16 sps:$4 sm:$0xff]   ;;  %v6402_v51 = vld [vmem:[%s7037_s19 + $0xca8] ss:$16 sps:$4 sm:$0xff]  }
 0x1f0   : > { %3858 = vmatprep.subr.bf16.mxu0 %v6317_v52  ;;  %4202 = vmatprep.subr.bf16.mxu1 %v6320_v53  ;;  %v6407_v52 = vld [vmem:[%s7037_s19 + $0xcc4] ss:$16 sps:$4 sm:$0xff]   ;;  %v6410_v53 = vld [vmem:[%s7037_s19 + $0xccc] ss:$16 sps:$4 sm:$0xff]  }
 0x1f3   : > { %3859 = vmatpush1.bf16.msra.mxu0 %v6315_v54  ;;  %4203 = vmatpush1.bf16.msra.mxu1 %v6318_v55  ;;  %v6405_v54 = vld [vmem:[%s7037_s19 + $0xcc0] ss:$16 sps:$4 sm:$0xff]   ;;  %v6408_v55 = vld [vmem:[%s7037_s19 + $0xcc8] ss:$16 sps:$4 sm:$0xff]  }
 0x1f4   : > { %3860 = vmatprep.subr.bf16.mxu0 %v6323_v56  ;;  %4204 = vmatprep.subr.bf16.mxu1 %v6326_v57  ;;  %v6413_v56 = vld [vmem:[%s7037_s19 + $0xce4] ss:$16 sps:$4 sm:$0xff]   ;;  %v6416_v57 = vld [vmem:[%s7037_s19 + $0xcec] ss:$16 sps:$4 sm:$0xff]  }
 0x1f7   : > { %3861 = vmatpush1.bf16.msra.mxu0 %v6321_v58  ;;  %4205 = vmatpush1.bf16.msra.mxu1 %v6324_v59  ;;  %v6411_v58 = vld [vmem:[%s7037_s19 + $0xce0] ss:$16 sps:$4 sm:$0xff]   ;;  %v6414_v59 = vld [vmem:[%s7037_s19 + $0xce8] ss:$16 sps:$4 sm:$0xff]  }
 0x1f8   : > { %3862 = vmatprep.subr.bf16.mxu0 %v6329_v60  ;;  %4206 = vmatprep.subr.bf16.mxu1 %v6332_v61  ;;  %v6419_v60 = vld [vmem:[%s7037_s19 + $0xd04] ss:$16 sps:$4 sm:$0xff]   ;;  %v6422_v61 = vld [vmem:[%s7037_s19 + $0xd0c] ss:$16 sps:$4 sm:$0xff]  }
 0x1fb   : > { %3863 = vmatpush1.bf16.msra.mxu0 %v6327_v62  ;;  %4207 = vmatpush1.bf16.msra.mxu1 %v6330_v63  ;;  %v6417_v62 = vld [vmem:[%s7037_s19 + $0xd00] ss:$16 sps:$4 sm:$0xff]   ;;  %v6420_v63 = vld [vmem:[%s7037_s19 + $0xd08] ss:$16 sps:$4 sm:$0xff]  }
 0x1fc   : > { %3864 = vmatprep.subr.bf16.mxu0 %v6335_v0  ;;  %4208 = vmatprep.subr.bf16.mxu1 %v6338_v1  ;;  %v6425_v0 = vld [vmem:[%s7037_s19 + $0xd24] ss:$16 sps:$4 sm:$0xff]   ;;  %v6428_v1 = vld [vmem:[%s7037_s19 + $0xd2c] ss:$16 sps:$4 sm:$0xff]  }
 0x1ff   : > { %3865 = vmatpush1.bf16.msra.mxu0 %v6333_v2  ;;  %4209 = vmatpush1.bf16.msra.mxu1 %v6336_v3  ;;  %v6423_v2 = vld [vmem:[%s7037_s19 + $0xd20] ss:$16 sps:$4 sm:$0xff]   ;;  %v6426_v3 = vld [vmem:[%s7037_s19 + $0xd28] ss:$16 sps:$4 sm:$0xff]  }
 0x200   : > { %3866 = vmatprep.subr.bf16.mxu0 %v6341_v4  ;;  %4210 = vmatprep.subr.bf16.mxu1 %v6344_v5  ;;  %v6431_v4 = vld [vmem:[%s7037_s19 + $0xd44] ss:$16 sps:$4 sm:$0xff]   ;;  %v6434_v5 = vld [vmem:[%s7037_s19 + $0xd4c] ss:$16 sps:$4 sm:$0xff]  }
 0x203   : > { %3867 = vmatpush1.bf16.msra.mxu0 %v6339_v6  ;;  %4211 = vmatpush1.bf16.msra.mxu1 %v6342_v7  ;;  %v6429_v6 = vld [vmem:[%s7037_s19 + $0xd40] ss:$16 sps:$4 sm:$0xff]   ;;  %v6432_v7 = vld [vmem:[%s7037_s19 + $0xd48] ss:$16 sps:$4 sm:$0xff]  }
 0x204   : > { %3868 = vmatprep.subr.bf16.mxu0 %v6347_v8  ;;  %4212 = vmatprep.subr.bf16.mxu1 %v6350_v9  ;;  %v6437_v8 = vld [vmem:[%s7037_s19 + $0xd64] ss:$16 sps:$4 sm:$0xff]   ;;  %v6440_v9 = vld [vmem:[%s7037_s19 + $0xd6c] ss:$16 sps:$4 sm:$0xff]  }
 0x207   : > { %3869 = vmatpush1.bf16.msra.mxu0 %v6345_v10  ;;  %4213 = vmatpush1.bf16.msra.mxu1 %v6348_v11  ;;  %v6435_v10 = vld [vmem:[%s7037_s19 + $0xd60] ss:$16 sps:$4 sm:$0xff]   ;;  %v6438_v11 = vld [vmem:[%s7037_s19 + $0xd68] ss:$16 sps:$4 sm:$0xff]  }
 0x208   : > { %3870 = vmatprep.subr.bf16.mxu0 %v6353_v12  ;;  %4214 = vmatprep.subr.bf16.mxu1 %v6356_v13  ;;  %v6443_v12 = vld [vmem:[%s7037_s19 + $0xd84] ss:$16 sps:$4 sm:$0xff]   ;;  %v6446_v13 = vld [vmem:[%s7037_s19 + $0xd8c] ss:$16 sps:$4 sm:$0xff]  }
 0x20b   : > { %3871 = vmatpush1.bf16.msra.mxu0 %v6351_v14  ;;  %4215 = vmatpush1.bf16.msra.mxu1 %v6354_v17  ;;  %v6441_v14 = vld [vmem:[%s7037_s19 + $0xd80] ss:$16 sps:$4 sm:$0xff]   ;;  %v6444_v17 = vld [vmem:[%s7037_s19 + $0xd88] ss:$16 sps:$4 sm:$0xff]  }
 0x20c   : > { %3872 = vmatprep.subr.bf16.mxu0 %v6359_v18  ;;  %4216 = vmatprep.subr.bf16.mxu1 %v6362_v21  ;;  %v6449_v18 = vld [vmem:[%s7037_s19 + $0xda4] ss:$16 sps:$4 sm:$0xff]   ;;  %v6452_v21 = vld [vmem:[%s7037_s19 + $0xdac] ss:$16 sps:$4 sm:$0xff]  }
 0x20f   : > { %3873 = vmatpush1.bf16.msra.mxu0 %v6357_v16  ;;  %4217 = vmatpush1.bf16.msra.mxu1 %v6360_v23  ;;  %v6447_v16 = vld [vmem:[%s7037_s19 + $0xda0] ss:$16 sps:$4 sm:$0xff]   ;;  %v6450_v23 = vld [vmem:[%s7037_s19 + $0xda8] ss:$16 sps:$4 sm:$0xff]  }
 0x210   : > { %3874 = vmatprep.subr.bf16.mxu0 %v6365_v24  ;;  %4218 = vmatprep.subr.bf16.mxu1 %v6368_v25  ;;  %v6455_v24 = vld [vmem:[%s7037_s19 + $0xdc4] ss:$16 sps:$4 sm:$0xff]   ;;  %v6458_v25 = vld [vmem:[%s7037_s19 + $0xdcc] ss:$16 sps:$4 sm:$0xff]  }
 0x213   : > { %3875 = vmatpush1.bf16.msra.mxu0 %v6363_v20  ;;  %4219 = vmatpush1.bf16.msra.mxu1 %v6366_v27  ;;  %v6453_v20 = vld [vmem:[%s7037_s19 + $0xdc0] ss:$16 sps:$4 sm:$0xff]   ;;  %v6456_v27 = vld [vmem:[%s7037_s19 + $0xdc8] ss:$16 sps:$4 sm:$0xff]  }
 0x214   : > { %3887 = vmatprep.subr.bf16.mxu0 %v6371_v28  ;;  %4231 = vmatprep.subr.bf16.mxu1 %v6374_v29  ;;  %v6461_v28 = vld [vmem:[%s7037_s19 + $0xde4] ss:$16 sps:$4 sm:$0xff]   ;;  %v6464_v29 = vld [vmem:[%s7037_s19 + $0xdec] ss:$16 sps:$4 sm:$0xff]  }
 0x216   : > { %3877 = vmatmul.mubr.bf16.vlgmr.msra.gmra.mrb[0].mxu0 %v5079_v30  ;;  %4221 = vmatmul.mubr.bf16.vlgmr.msra.gmra.mrb[0].mxu1 %v5079_v30  ;;  %v6459_v30 = vld [vmem:[%s7037_s19 + $0xde0] ss:$16 sps:$4 sm:$0xff]  }
 0x217   : > { %3888 = vmatpush1.bf16.msra.mxu0 %v6369_v22  ;;  %4232 = vmatpush1.bf16.msra.mxu1 %v6372_v32  ;;  %v6462_v22 = vld [vmem:[%s7037_s19 + $0xde8] ss:$16 sps:$4 sm:$0xff]   ;;  %v6467_v32 = vld [vmem:[%s7037_s19 + $0xe04] ss:$16 sps:$4 sm:$0xff]  }
 0x218   : > { %3889 = vmatprep.subr.bf16.mxu0 %v6377_v26  ;;  %4233 = vmatprep.subr.bf16.mxu1 %v6380_v19  ;;  %v6470_v26 = vld [vmem:[%s7037_s19 + $0xe0c] ss:$16 sps:$4 sm:$0xff]   ;;  %v5081_v19 = vcombine.low %v7526_v31, %v7531_v15  ;;  %v6473_v31 = vld [vmem:[%s7037_s19 + $0xe24] ss:$16 sps:$4 sm:$0xff]  }
 0x219   : > { %3919 = vmatprep.mubr.bf16.mxu0 %v5082_v33  ;;  %4263 = vmatprep.mubr.bf16.mxu1 %v5082_v33  ;;  %v7604_v33 = vld [vmem:[%s7787_s0 + $0x38] sm:$0xff] }
 0x21a   : > { %v6476_v15 = vld [vmem:[%s7037_s19 + $0xe2c] ss:$16 sps:$4 sm:$0xff]  }
 0x21b   : > { %3890 = vmatpush1.bf16.msra.mxu0 %v6375_v34  ;;  %4234 = vmatpush1.bf16.msra.mxu1 %v6378_v35  ;;  %v7609_v34 = vld [vmem:[%s7787_s0 + $0x78] sm:$0xff]  ;;  %v6465_v35 = vld [vmem:[%s7037_s19 + $0xe00] ss:$16 sps:$4 sm:$0xff]  }
 0x21c   : > { %3891 = vmatprep.subr.bf16.mxu0 %v6383_v36  ;;  %4235 = vmatprep.subr.bf16.mxu1 %v6386_v37  ;;  %v6468_v36 = vld [vmem:[%s7037_s19 + $0xe08] ss:$16 sps:$4 sm:$0xff]   ;;  %v5084_v37 = vcombine.high %v7604_v33, %v7609_v34 }
 0x21f   : > { %3892 = vmatpush1.bf16.msra.mxu0 %v6381_v38  ;;  %4236 = vmatpush1.bf16.msra.mxu1 %v6384_v39  ;;  %v6471_v38 = vld [vmem:[%s7037_s19 + $0xe20] ss:$16 sps:$4 sm:$0xff]   ;;  %v6474_v39 = vld [vmem:[%s7037_s19 + $0xe28] ss:$16 sps:$4 sm:$0xff]  }
 0x220   : > { %3893 = vmatprep.subr.bf16.mxu0 %v6389_v40  ;;  %4237 = vmatprep.subr.bf16.mxu1 %v6392_v41  ;;  %v6479_v40 = vld [vmem:[%s7037_s19 + $0xe44] ss:$16 sps:$4 sm:$0xff]   ;;  %v6482_v41 = vld [vmem:[%s7037_s19 + $0xe4c] ss:$16 sps:$4 sm:$0xff]  }
 0x223   : > { %3894 = vmatpush1.bf16.msra.mxu0 %v6387_v42  ;;  %4238 = vmatpush1.bf16.msra.mxu1 %v6390_v43  ;;  %v6477_v42 = vld [vmem:[%s7037_s19 + $0xe40] ss:$16 sps:$4 sm:$0xff]   ;;  %v6480_v43 = vld [vmem:[%s7037_s19 + $0xe48] ss:$16 sps:$4 sm:$0xff]  }
 0x224   : > { %3895 = vmatprep.subr.bf16.mxu0 %v6395_v44  ;;  %4239 = vmatprep.subr.bf16.mxu1 %v6398_v45  ;;  %v6485_v44 = vld [vmem:[%s7037_s19 + $0xe64] ss:$16 sps:$4 sm:$0xff]   ;;  %v6488_v45 = vld [vmem:[%s7037_s19 + $0xe6c] ss:$16 sps:$4 sm:$0xff]  }
 0x227   : > { %3896 = vmatpush1.bf16.msra.mxu0 %v6393_v46  ;;  %4240 = vmatpush1.bf16.msra.mxu1 %v6396_v47  ;;  %v6483_v46 = vld [vmem:[%s7037_s19 + $0xe60] ss:$16 sps:$4 sm:$0xff]   ;;  %v6486_v47 = vld [vmem:[%s7037_s19 + $0xe68] ss:$16 sps:$4 sm:$0xff]  }
 0x228   : > { %3897 = vmatprep.subr.bf16.mxu0 %v6401_v48  ;;  %4241 = vmatprep.subr.bf16.mxu1 %v6404_v49  ;;  %v6491_v48 = vld [vmem:[%s7037_s19 + $0xe84] ss:$16 sps:$4 sm:$0xff]   ;;  %v6494_v49 = vld [vmem:[%s7037_s19 + $0xe8c] ss:$16 sps:$4 sm:$0xff]  }
 0x22b   : > { %3898 = vmatpush1.bf16.msra.mxu0 %v6399_v50  ;;  %4242 = vmatpush1.bf16.msra.mxu1 %v6402_v51  ;;  %v6489_v50 = vld [vmem:[%s7037_s19 + $0xe80] ss:$16 sps:$4 sm:$0xff]   ;;  %v6492_v51 = vld [vmem:[%s7037_s19 + $0xe88] ss:$16 sps:$4 sm:$0xff]  }
 0x22c   : > { %3899 = vmatprep.subr.bf16.mxu0 %v6407_v52  ;;  %4243 = vmatprep.subr.bf16.mxu1 %v6410_v53  ;;  %v6497_v52 = vld [vmem:[%s7037_s19 + $0xea4] ss:$16 sps:$4 sm:$0xff]   ;;  %v6500_v53 = vld [vmem:[%s7037_s19 + $0xeac] ss:$16 sps:$4 sm:$0xff]  }
 0x22f   : > { %3900 = vmatpush1.bf16.msra.mxu0 %v6405_v54  ;;  %4244 = vmatpush1.bf16.msra.mxu1 %v6408_v55  ;;  %v6495_v54 = vld [vmem:[%s7037_s19 + $0xea0] ss:$16 sps:$4 sm:$0xff]   ;;  %v6498_v55 = vld [vmem:[%s7037_s19 + $0xea8] ss:$16 sps:$4 sm:$0xff]  }
 0x230   : > { %3901 = vmatprep.subr.bf16.mxu0 %v6413_v56  ;;  %4245 = vmatprep.subr.bf16.mxu1 %v6416_v57  ;;  %v6503_v56 = vld [vmem:[%s7037_s19 + $0xec4] ss:$16 sps:$4 sm:$0xff]   ;;  %v6506_v57 = vld [vmem:[%s7037_s19 + $0xecc] ss:$16 sps:$4 sm:$0xff]  }
 0x233   : > { %3902 = vmatpush1.bf16.msra.mxu0 %v6411_v58  ;;  %4246 = vmatpush1.bf16.msra.mxu1 %v6414_v59  ;;  %v6501_v58 = vld [vmem:[%s7037_s19 + $0xec0] ss:$16 sps:$4 sm:$0xff]   ;;  %v6504_v59 = vld [vmem:[%s7037_s19 + $0xec8] ss:$16 sps:$4 sm:$0xff]  }
 0x234   : > { %3903 = vmatprep.subr.bf16.mxu0 %v6419_v60  ;;  %4247 = vmatprep.subr.bf16.mxu1 %v6422_v61  ;;  %v6509_v60 = vld [vmem:[%s7037_s19 + $0xee4] ss:$16 sps:$4 sm:$0xff]   ;;  %v6512_v61 = vld [vmem:[%s7037_s19 + $0xeec] ss:$16 sps:$4 sm:$0xff]  }
 0x237   : > { %3904 = vmatpush1.bf16.msra.mxu0 %v6417_v62  ;;  %4248 = vmatpush1.bf16.msra.mxu1 %v6420_v63  ;;  %v6507_v62 = vld [vmem:[%s7037_s19 + $0xee0] ss:$16 sps:$4 sm:$0xff]   ;;  %v6510_v63 = vld [vmem:[%s7037_s19 + $0xee8] ss:$16 sps:$4 sm:$0xff]  }
 0x238   : > { %3905 = vmatprep.subr.bf16.mxu0 %v6425_v0  ;;  %4249 = vmatprep.subr.bf16.mxu1 %v6428_v1  ;;  %v6515_v0 = vld [vmem:[%s7037_s19 + $0xf04] ss:$16 sps:$4 sm:$0xff]   ;;  %v6518_v1 = vld [vmem:[%s7037_s19 + $0xf0c] ss:$16 sps:$4 sm:$0xff]  }
 0x23b   : > { %3906 = vmatpush1.bf16.msra.mxu0 %v6423_v2  ;;  %4250 = vmatpush1.bf16.msra.mxu1 %v6426_v3  ;;  %v6513_v2 = vld [vmem:[%s7037_s19 + $0xf00] ss:$16 sps:$4 sm:$0xff]   ;;  %v6516_v3 = vld [vmem:[%s7037_s19 + $0xf08] ss:$16 sps:$4 sm:$0xff]  }
 0x23c   : > { %3907 = vmatprep.subr.bf16.mxu0 %v6431_v4  ;;  %4251 = vmatprep.subr.bf16.mxu1 %v6434_v5  ;;  %v6521_v4 = vld [vmem:[%s7037_s19 + $0xf24] ss:$16 sps:$4 sm:$0xff]   ;;  %v6524_v5 = vld [vmem:[%s7037_s19 + $0xf2c] ss:$16 sps:$4 sm:$0xff]  }
 0x23f   : > { %3908 = vmatpush1.bf16.msra.mxu0 %v6429_v6  ;;  %4252 = vmatpush1.bf16.msra.mxu1 %v6432_v7  ;;  %v6519_v6 = vld [vmem:[%s7037_s19 + $0xf20] ss:$16 sps:$4 sm:$0xff]   ;;  %v6522_v7 = vld [vmem:[%s7037_s19 + $0xf28] ss:$16 sps:$4 sm:$0xff]  }
 0x240   : > { %3909 = vmatprep.subr.bf16.mxu0 %v6437_v8  ;;  %4253 = vmatprep.subr.bf16.mxu1 %v6440_v9  ;;  %v6527_v8 = vld [vmem:[%s7037_s19 + $0xf44] ss:$16 sps:$4 sm:$0xff]   ;;  %v6530_v9 = vld [vmem:[%s7037_s19 + $0xf4c] ss:$16 sps:$4 sm:$0xff]  }
 0x243   : > { %3910 = vmatpush1.bf16.msra.mxu0 %v6435_v10  ;;  %4254 = vmatpush1.bf16.msra.mxu1 %v6438_v11  ;;  %v6525_v10 = vld [vmem:[%s7037_s19 + $0xf40] ss:$16 sps:$4 sm:$0xff]   ;;  %v6528_v11 = vld [vmem:[%s7037_s19 + $0xf48] ss:$16 sps:$4 sm:$0xff]  }
 0x244   : > { %3911 = vmatprep.subr.bf16.mxu0 %v6443_v12  ;;  %4255 = vmatprep.subr.bf16.mxu1 %v6446_v13  ;;  %v6533_v12 = vld [vmem:[%s7037_s19 + $0xf64] ss:$16 sps:$4 sm:$0xff]   ;;  %v6536_v13 = vld [vmem:[%s7037_s19 + $0xf6c] ss:$16 sps:$4 sm:$0xff]  }
 0x247   : > { %3912 = vmatpush1.bf16.msra.mxu0 %v6441_v14  ;;  %4256 = vmatpush1.bf16.msra.mxu1 %v6444_v17  ;;  %v6531_v14 = vld [vmem:[%s7037_s19 + $0xf60] ss:$16 sps:$4 sm:$0xff]   ;;  %v6534_v17 = vld [vmem:[%s7037_s19 + $0xf68] ss:$16 sps:$4 sm:$0xff]  }
 0x248   : > { %3913 = vmatprep.subr.bf16.mxu0 %v6449_v18  ;;  %4257 = vmatprep.subr.bf16.mxu1 %v6452_v21  ;;  %v6539_v18 = vld [vmem:[%s7037_s19 + $0xf84] ss:$16 sps:$4 sm:$0xff]   ;;  %v6542_v21 = vld [vmem:[%s7037_s19 + $0xf8c] ss:$16 sps:$4 sm:$0xff]  }
 0x24b   : > { %3914 = vmatpush1.bf16.msra.mxu0 %v6447_v16  ;;  %4258 = vmatpush1.bf16.msra.mxu1 %v6450_v23  ;;  %v6537_v16 = vld [vmem:[%s7037_s19 + $0xf80] ss:$16 sps:$4 sm:$0xff]   ;;  %v6540_v23 = vld [vmem:[%s7037_s19 + $0xf88] ss:$16 sps:$4 sm:$0xff]  }
 0x24c   : > { %3915 = vmatprep.subr.bf16.mxu0 %v6455_v24  ;;  %4259 = vmatprep.subr.bf16.mxu1 %v6458_v25  ;;  %v6545_v24 = vld [vmem:[%s7037_s19 + $0xfa4] ss:$16 sps:$4 sm:$0xff]   ;;  %v6548_v25 = vld [vmem:[%s7037_s19 + $0xfac] ss:$16 sps:$4 sm:$0xff]  }
 0x24f   : > { %3916 = vmatpush1.bf16.msra.mxu0 %v6453_v20  ;;  %4260 = vmatpush1.bf16.msra.mxu1 %v6456_v27  ;;  %v6543_v20 = vld [vmem:[%s7037_s19 + $0xfa0] ss:$16 sps:$4 sm:$0xff]   ;;  %v6546_v27 = vld [vmem:[%s7037_s19 + $0xfa8] ss:$16 sps:$4 sm:$0xff]  }
 0x250   : > { %3917 = vmatprep.subr.bf16.mxu0 %v6461_v28  ;;  %4261 = vmatprep.subr.bf16.mxu1 %v6464_v29  ;;  %v6551_v28 = vld [vmem:[%s7037_s19 + $0xfc4] ss:$16 sps:$4 sm:$0xff]   ;;  %v6554_v29 = vld [vmem:[%s7037_s19 + $0xfcc] ss:$16 sps:$4 sm:$0xff]  }
 0x253   : > { %3918 = vmatpush1.bf16.msra.mxu0 %v6459_v30  ;;  %4262 = vmatpush1.bf16.msra.mxu1 %v6462_v22  ;;  %v6549_v30 = vld [vmem:[%s7037_s19 + $0xfc0] ss:$16 sps:$4 sm:$0xff]   ;;  %v6552_v22 = vld [vmem:[%s7037_s19 + $0xfc8] ss:$16 sps:$4 sm:$0xff]  }
 0x254   : > { %3930 = vmatprep.subr.bf16.mxu0 %v6467_v32  ;;  %4274 = vmatprep.subr.bf16.mxu1 %v6470_v26  ;;  %v6557_v32 = vld [vmem:[%s7037_s19 + $0xfe4] ss:$16 sps:$4 sm:$0xff]   ;;  %v6560_v26 = vld [vmem:[%s7037_s19 + $0xfec] ss:$16 sps:$4 sm:$0xff]  }
 0x256   : > { %3920 = vmatmul.mubr.bf16.vlgmr.msra.gmra.mrb[0].mxu0 %v5081_v19  ;;  %4264 = vmatmul.mubr.bf16.vlgmr.msra.gmra.mrb[0].mxu1 %v5081_v19  ;;  %v6555_v19 = vld [vmem:[%s7037_s19 + $0xfe0] ss:$16 sps:$4 sm:$0xff]  }
 0x257   : > { %3931 = vmatpush1.bf16.msra.mxu0 %v6465_v35  ;;  %4275 = vmatpush1.bf16.msra.mxu1 %v6468_v36  ;;  %v6558_v35 = vld [vmem:[%s7037_s19 + $0xfe8] ss:$16 sps:$4 sm:$0xff]   ;;  %v6563_v36 = vld [vmem:[%s7052_s20 + $0x4] ss:$16 sps:$4 sm:$0xff]  }
 0x258   : > { %3932 = vmatprep.subr.bf16.mxu0 %v6473_v31  ;;  %4276 = vmatprep.subr.bf16.mxu1 %v6476_v15  ;;  %v6566_v31 = vld [vmem:[%s7052_s20 + $0xc] ss:$16 sps:$4 sm:$0xff]   ;;  %v5083_v15 = vcombine.low %v7604_v33, %v7609_v34  ;;  %v6570_v33 = vld [vmem:[%s7052_s20 + $0x28] ss:$16 sps:$4 sm:$0xff]   ;;  %v6575_v34 = vld [vmem:[%s7052_s20 + $0x44] ss:$16 sps:$4 sm:$0xff]  }
 0x259   : > { %3962 = vmatprep.mubr.bf16.mxu0 %v5084_v37  ;;  %4306 = vmatprep.mubr.bf16.mxu1 %v5084_v37  ;;  %v6561_v37 = vld [vmem:[%s7052_s20] ss:$16 sps:$4 sm:$0xff]  }
 0x25b   : > { %3933 = vmatpush1.bf16.msra.mxu0 %v6471_v38  ;;  %4277 = vmatpush1.bf16.msra.mxu1 %v6474_v39  ;;  %v6564_v38 = vld [vmem:[%s7052_s20 + $0x8] ss:$16 sps:$4 sm:$0xff]   ;;  %v6569_v39 = vld [vmem:[%s7052_s20 + $0x24] ss:$16 sps:$4 sm:$0xff]  }
 0x25c   : > { %3934 = vmatprep.subr.bf16.mxu0 %v6479_v40  ;;  %4278 = vmatprep.subr.bf16.mxu1 %v6482_v41  ;;  %v6572_v40 = vld [vmem:[%s7052_s20 + $0x2c] ss:$16 sps:$4 sm:$0xff]   ;;  %v6567_v41 = vld [vmem:[%s7052_s20 + $0x20] ss:$16 sps:$4 sm:$0xff]  }
 0x25f   : > { %3935 = vmatpush1.bf16.msra.mxu0 %v6477_v42  ;;  %4279 = vmatpush1.bf16.msra.mxu1 %v6480_v43  ;;  %v6578_v42 = vld [vmem:[%s7052_s20 + $0x4c] ss:$16 sps:$4 sm:$0xff]   ;;  %v6781_v43 = vmov 0  }
 0x260   : > { %3936 = vmatprep.subr.bf16.mxu0 %v6485_v44  ;;  %4280 = vmatprep.subr.bf16.mxu1 %v6488_v45  ;;  %v6573_v44 = vld [vmem:[%s7052_s20 + $0x40] ss:$16 sps:$4 sm:$0xff]   ;;  %v6576_v45 = vld [vmem:[%s7052_s20 + $0x48] ss:$16 sps:$4 sm:$0xff]  }
 0x263   : > { %3937 = vmatpush1.bf16.msra.mxu0 %v6483_v46  ;;  %4281 = vmatpush1.bf16.msra.mxu1 %v6486_v47  ;;  %v6581_v46 = vld [vmem:[%s7052_s20 + $0x64] ss:$16 sps:$4 sm:$0xff]   ;;  %v6584_v47 = vld [vmem:[%s7052_s20 + $0x6c] ss:$16 sps:$4 sm:$0xff]  }
 0x264   : > { %3938 = vmatprep.subr.bf16.mxu0 %v6491_v48  ;;  %4282 = vmatprep.subr.bf16.mxu1 %v6494_v49  ;;  %v6579_v48 = vld [vmem:[%s7052_s20 + $0x60] ss:$16 sps:$4 sm:$0xff]   ;;  %v6582_v49 = vld [vmem:[%s7052_s20 + $0x68] ss:$16 sps:$4 sm:$0xff]  }
 0x267   : > { %3939 = vmatpush1.bf16.msra.mxu0 %v6489_v50  ;;  %4283 = vmatpush1.bf16.msra.mxu1 %v6492_v51  ;;  %v6587_v50 = vld [vmem:[%s7052_s20 + $0x84] ss:$16 sps:$4 sm:$0xff]   ;;  %v6590_v51 = vld [vmem:[%s7052_s20 + $0x8c] ss:$16 sps:$4 sm:$0xff]  }
 0x268   : > { %3940 = vmatprep.subr.bf16.mxu0 %v6497_v52  ;;  %4284 = vmatprep.subr.bf16.mxu1 %v6500_v53  ;;  %v6585_v52 = vld [vmem:[%s7052_s20 + $0x80] ss:$16 sps:$4 sm:$0xff]   ;;  %v6588_v53 = vld [vmem:[%s7052_s20 + $0x88] ss:$16 sps:$4 sm:$0xff]  }
 0x26b   : > { %3941 = vmatpush1.bf16.msra.mxu0 %v6495_v54  ;;  %4285 = vmatpush1.bf16.msra.mxu1 %v6498_v55  ;;  %v6593_v54 = vld [vmem:[%s7052_s20 + $0xa4] ss:$16 sps:$4 sm:$0xff]   ;;  %v6596_v55 = vld [vmem:[%s7052_s20 + $0xac] ss:$16 sps:$4 sm:$0xff]  }
 0x26c   : > { %3942 = vmatprep.subr.bf16.mxu0 %v6503_v56  ;;  %4286 = vmatprep.subr.bf16.mxu1 %v6506_v57  ;;  %v6591_v56 = vld [vmem:[%s7052_s20 + $0xa0] ss:$16 sps:$4 sm:$0xff]   ;;  %v6594_v57 = vld [vmem:[%s7052_s20 + $0xa8] ss:$16 sps:$4 sm:$0xff]  }
 0x26f   : > { %3943 = vmatpush1.bf16.msra.mxu0 %v6501_v58  ;;  %4287 = vmatpush1.bf16.msra.mxu1 %v6504_v59  ;;  %v6599_v58 = vld [vmem:[%s7052_s20 + $0xc4] ss:$16 sps:$4 sm:$0xff]   ;;  %v6602_v59 = vld [vmem:[%s7052_s20 + $0xcc] ss:$16 sps:$4 sm:$0xff]  }
 0x270   : > { %3944 = vmatprep.subr.bf16.mxu0 %v6509_v60  ;;  %4288 = vmatprep.subr.bf16.mxu1 %v6512_v61  ;;  %v6597_v60 = vld [vmem:[%s7052_s20 + $0xc0] ss:$16 sps:$4 sm:$0xff]   ;;  %v6600_v61 = vld [vmem:[%s7052_s20 + $0xc8] ss:$16 sps:$4 sm:$0xff]  }
 0x273   : > { %3945 = vmatpush1.bf16.msra.mxu0 %v6507_v62  ;;  %4289 = vmatpush1.bf16.msra.mxu1 %v6510_v63  ;;  %v6605_v62 = vld [vmem:[%s7052_s20 + $0xe4] ss:$16 sps:$4 sm:$0xff]   ;;  %v6608_v63 = vld [vmem:[%s7052_s20 + $0xec] ss:$16 sps:$4 sm:$0xff]  }
 0x274   : > { %3946 = vmatprep.subr.bf16.mxu0 %v6515_v0  ;;  %4290 = vmatprep.subr.bf16.mxu1 %v6518_v1  ;;  %v6603_v0 = vld [vmem:[%s7052_s20 + $0xe0] ss:$16 sps:$4 sm:$0xff]   ;;  %v6606_v1 = vld [vmem:[%s7052_s20 + $0xe8] ss:$16 sps:$4 sm:$0xff]  }
 0x277   : > { %3947 = vmatpush1.bf16.msra.mxu0 %v6513_v2  ;;  %4291 = vmatpush1.bf16.msra.mxu1 %v6516_v3  ;;  %v6609_v2 = vld [vmem:[%s7788_s1] sm:$0xff]   ;;  %v6610_v3 = vld [vmem:[%s7788_s1 + $0x8] sm:$0xff]  }
 0x278   : > { %3948 = vmatprep.subr.bf16.mxu0 %v6521_v4  ;;  %4292 = vmatprep.subr.bf16.mxu1 %v6524_v5  ;;  %v6782_v4 = vmov 0.0   ;;  %v4848_v5 = vld [vmem:[#allocation2] sm:$0x1] }
 0x279   : > { %5733 = vpush %v4848_v5 }
 0x27b   : > { %3949 = vmatpush1.bf16.msra.mxu0 %v6519_v6  ;;  %4293 = vmatpush1.bf16.msra.mxu1 %v6522_v7  ;;  %v969_v6 = vlaneseq }
 0x27c   : > { %3950 = vmatprep.subr.bf16.mxu0 %v6527_v8  ;;  %4294 = vmatprep.subr.bf16.mxu1 %v6530_v9  ;;  %v7721_v9 = vld [vmem:[%s7045_s21] sm:$0xf] }
 0x27d   : > { %v7717_v7 = vshrl.u32 %v969_v6, 7 }
 0x27f   : > { %3951 = vmatpush1.bf16.msra.mxu0 %v6525_v10  ;;  %4295 = vmatpush1.bf16.msra.mxu1 %v6528_v11  ;;  %v979_v8 = vsub.s32 2, %v7717_v7  ;;  %v975_v10 = vsub.s32 1, %v7717_v7  ;;  %v983_v11 = vsub.s32 3, %v7717_v7 }
 0x280   : > { %3952 = vmatprep.subr.bf16.mxu0 %v6533_v12  ;;  %4296 = vmatprep.subr.bf16.mxu1 %v6536_v13 }
 0x281   : > { %v980_v12 = vrot.slane %v7721_v9, %v979_v8  ;;  %v976_v13 = vrot.slane %v7721_v9, %v975_v10 }
 0x283   : > { %3953 = vmatpush1.bf16.msra.mxu0 %v6531_v14  ;;  %4297 = vmatpush1.bf16.msra.mxu1 %v6534_v17  ;;  %v984_v14 = vrot.slane %v7721_v9, %v983_v11 }
 0x284   : > { %3954 = vmatprep.subr.bf16.mxu0 %v6539_v18  ;;  %4298 = vmatprep.subr.bf16.mxu1 %v6542_v21 }
 0x287   : > { %3955 = vmatpush1.bf16.msra.mxu0 %v6537_v16  ;;  %4299 = vmatpush1.bf16.msra.mxu1 %v6540_v23 }
 0x288   : > { %3956 = vmatprep.subr.bf16.mxu0 %v6545_v24  ;;  %4300 = vmatprep.subr.bf16.mxu1 %v6548_v25 }
 0x28b   : > { %3957 = vmatpush1.bf16.msra.mxu0 %v6543_v20  ;;  %4301 = vmatpush1.bf16.msra.mxu1 %v6546_v27 }
 0x28c   : > { %3958 = vmatprep.subr.bf16.mxu0 %v6551_v28  ;;  %4302 = vmatprep.subr.bf16.mxu1 %v6554_v29 }
 0x28f   : > { %3959 = vmatpush1.bf16.msra.mxu0 %v6549_v30  ;;  %4303 = vmatpush1.bf16.msra.mxu1 %v6552_v22 }
 0x290   : > { %3960 = vmatprep.subr.bf16.mxu0 %v6557_v32  ;;  %4304 = vmatprep.subr.bf16.mxu1 %v6560_v26  ;;  %v4361_v26 = vld [vmem:[%s7055_s10] sm:$0xf] }
 0x293   : > { %3961 = vmatpush1.bf16.msra.mxu0 %v6555_v19  ;;  %4305 = vmatpush1.bf16.msra.mxu1 %v6558_v35  ;;  %v971_v19 = vsub.s32 0, %v7717_v7 }
 0x294   : > { %4555 = vmatprep.subr.bf16.mxu0 %v6563_v36  ;;  %4608 = vmatprep.subr.bf16.mxu1 %v6566_v31  ;;  %v4374_v36 = vrot.slane %v4361_v26, %v979_v8  ;;  %v4370_v31 = vrot.slane %v4361_v26, %v975_v10 }
 0x295   : > { %v4366_v35 = vrot.slane %v4361_v26, %v971_v19 }
 0x296   : > { %3963 = vmatmul.mubr.bf16.vlgmr.msra.gmra.mrb[0].mxu0 %v5083_v15  ;;  %4307 = vmatmul.mubr.bf16.vlgmr.msra.gmra.mrb[0].mxu1 %v5083_v15  ;;  %v4378_v15 = vrot.slane %v4361_v26, %v983_v11 }
 0x297   : > { %4556 = vmatpush1.bf16.msra.mxu0 %v6561_v37  ;;  %4609 = vmatpush1.bf16.msra.mxu1 %v6564_v38 }
 0x298   : > { %4557 = vmatprep.subr.bf16.mxu0 %v6569_v39  ;;  %4610 = vmatprep.subr.bf16.mxu1 %v6572_v40 }
 0x299   : > { %4587 = vmatprep.mubr.bf16.mxu0 %v6781_v43  ;;  %4640 = vmatprep.mubr.bf16.mxu1 %v6781_v43 }
 0x29b   : > { %4558 = vmatpush1.bf16.msra.mxu0 %v6567_v41  ;;  %4611 = vmatpush1.bf16.msra.mxu1 %v6570_v33 }
 0x29c   : > { %4559 = vmatprep.subr.bf16.mxu0 %v6575_v34  ;;  %4612 = vmatprep.subr.bf16.mxu1 %v6578_v42 }
 0x29f   : > { %4560 = vmatpush1.bf16.msra.mxu0 %v6573_v44  ;;  %4613 = vmatpush1.bf16.msra.mxu1 %v6576_v45 }
 0x2a0   : > { %4561 = vmatprep.subr.bf16.mxu0 %v6581_v46  ;;  %4614 = vmatprep.subr.bf16.mxu1 %v6584_v47 }
 0x2a3   : > { %4562 = vmatpush1.bf16.msra.mxu0 %v6579_v48  ;;  %4615 = vmatpush1.bf16.msra.mxu1 %v6582_v49 }
 0x2a4   : > { %4563 = vmatprep.subr.bf16.mxu0 %v6587_v50  ;;  %4616 = vmatprep.subr.bf16.mxu1 %v6590_v51 }
 0x2a7   : > { %4564 = vmatpush1.bf16.msra.mxu0 %v6585_v52  ;;  %4617 = vmatpush1.bf16.msra.mxu1 %v6588_v53 }
 0x2a8   : > { %4565 = vmatprep.subr.bf16.mxu0 %v6593_v54  ;;  %4618 = vmatprep.subr.bf16.mxu1 %v6596_v55 }
 0x2aa   : > { %s5734_s14 = spop %5733 }
 0x2ab   : > { %4566 = vmatpush1.bf16.msra.mxu0 %v6591_v56  ;;  %4619 = vmatpush1.bf16.msra.mxu1 %v6594_v57 }
 0x2ac   : > { %4567 = vmatprep.subr.bf16.mxu0 %v6599_v58  ;;  %4620 = vmatprep.subr.bf16.mxu1 %v6602_v59 }
 0x2af   : > { %4568 = vmatpush1.bf16.msra.mxu0 %v6597_v60  ;;  %4621 = vmatpush1.bf16.msra.mxu1 %v6600_v61 }
 0x2b0   : > { %4569 = vmatprep.subr.bf16.mxu0 %v6605_v62  ;;  %4622 = vmatprep.subr.bf16.mxu1 %v6608_v63 }
 0x2b3   : > { %4570 = vmatpush1.bf16.msra.mxu0 %v6603_v0  ;;  %4623 = vmatpush1.bf16.msra.mxu1 %v6606_v1 }
 0x2b6   : > { %4588 = vmatmul.mubr.bf16.vlgmr.msra.gmra.mrb[4].mxu0 %v6609_v2  ;;  %4641 = vmatmul.mubr.bf16.vlgmr.msra.gmra.mrb[4].mxu1 %v6609_v2 }
 0x2b7   : > { %4597 = vmatprep.mubr.bf16.mxu0 %v6781_v43  ;;  %4650 = vmatprep.mubr.bf16.mxu1 %v6781_v43 }
 0x2be   : > { %4598 = vmatmul.mubr.bf16.gmra.mrb[8].mxu0 %v6610_v3  ;;  %4651 = vmatmul.mubr.bf16.gmra.mrb[8].mxu1 %v6610_v3 }
 0x2bf   : > { %4750 = vmatprep.mubr.f32.mxu0 %v6782_v4  ;;  %4827 = vmatprep.mubr.f32.mxu1 %v6782_v4 }
 0x369   : > { %v7728_v17 = vpop.f32.mrb[0].mxu0  ;;  %v4308_v18 = vpop.f32.mrb[0].mxu1 }
 0x36a   : > { %v7730_v21 = vadd.f32 %v4308_v18, %v980_v12  ;;  %v3966_v16 = vpop.f32.mrb[1].mxu0  ;;  %v4310_v23 = vpop.f32.mrb[1].mxu1 }
 0x36b   : > { %v7732_v24 = vadd.f32 %v3966_v16, %v976_v13  ;;  %v7734_v25 = vadd.f32 %v4310_v23, %v984_v14  ;;  %v7736_v20 = vpop.f32.mrb[2].mxu0  ;;  %v4312_v27 = vpop.f32.mrb[2].mxu1 }
 0x36c   : > { %v7738_v28 = vadd.f32 %v4312_v27, %v980_v12  ;;  %v3970_v29 = vpop.f32.mrb[3].mxu0  ;;  %v4314_v30 = vpop.f32.mrb[3].mxu1 }
 0x36d   : > { %v7740_v22 = vadd.f32 %v3970_v29, %v976_v13  ;;  %v7742_v32 = vadd.f32 %v4314_v30, %v984_v14 }
 0x389   : > { %v4589_v37 = vpop.f32.mrb[4].mxu0  ;;  %v4642_v38 = vpop.f32.mrb[4].mxu1 }
 0x38a   : > { %v4590_v39 = vadd.f32 %v4589_v37, %v4366_v35  ;;  %v4643_v40 = vadd.f32 %v4642_v38, %v4374_v36  ;;  %v4591_v41 = vpop.f32.mrb[5].mxu0  ;;  %v4644_v33 = vpop.f32.mrb[5].mxu1 }
 0x38b   : > { %v4592_v34 = vadd.f32 %v4591_v41, %v4370_v31  ;;  %v4645_v42 = vadd.f32 %v4644_v33, %v4378_v15  ;;  %v4593_v43 = vpop.f32.mrb[6].mxu0  ;;  %v4646_v44 = vpop.f32.mrb[6].mxu1 }
 0x38c   : > { %v4594_v45 = vadd.f32 %v4593_v43, %v4366_v35  ;;  %v4647_v46 = vadd.f32 %v4646_v44, %v4374_v36  ;;  %v4595_v47 = vpop.f32.mrb[7].mxu0  ;;  %v4648_v48 = vpop.f32.mrb[7].mxu1  ;;  %v4661_v51 = vmax.f32 %v4590_v39, 0.0  ;;  %v4663_v52 = vmax.f32 %v4643_v40, 0.0 }
 0x38d   : > { %v4596_v49 = vadd.f32 %v4595_v47, %v4370_v31  ;;  %v4649_v50 = vadd.f32 %v4648_v48, %v4378_v15  ;;  %v4662_v55 = vmax.f32 %v4592_v34, 0.0  ;;  %v4664_v56 = vmax.f32 %v4645_v42, 0.0 }
 0x38e   : > { %v4665_v53 = vmax.f32 %v4594_v45, 0.0  ;;  %v4667_v54 = vmax.f32 %v4647_v46, 0.0  ;;  %v4319_v44 = vmax.f32 %v7730_v21, 0.0  ;;  %v4320_v46 = vmax.f32 %v7734_v25, 0.0 }
 0x38f   : > { %v4666_v57 = vmax.f32 %v4596_v49, 0.0  ;;  %v4668_v58 = vmax.f32 %v4649_v50, 0.0  ;;  %v4850_v49 = vstv %s5734_s14 }
 0x390   : > { %v5655_v59 = vpack.c.bf16 %v4665_v53, %v4661_v51  ;;  %v5663_v60 = vpack.c.bf16 %v4667_v54, %v4663_v52  ;;  %v4323_v53 = vmax.f32 %v7738_v28, 0.0 }
 0x391   : > { %v5653_v61 = vpack.c.bf16 %v4666_v57, %v4662_v55  ;;  %v5661_v62 = vpack.c.bf16 %v4668_v58, %v4664_v56  ;;  %v4599_v63 = vpop.f32.mrb[8].mxu0  ;;  %v4652_v0 = vpop.f32.mrb[8].mxu1 }
 0x392   : > { %v4600_v1 = vadd.f32 %v4599_v63, %v4366_v35  ;;  %v4653_v2 = vadd.f32 %v4652_v0, %v4374_v36  ;;  %v4601_v3 = vpop.f32.mrb[9].mxu0  ;;  %v4654_v5 = vpop.f32.mrb[9].mxu1 }
 0x393   : > { %v4602_v6 = vadd.f32 %v4601_v3, %v4370_v31  ;;  %v4655_v8 = vadd.f32 %v4654_v5, %v4378_v15  ;;  %v4603_v10 = vpop.f32.mrb[10].mxu0  ;;  %v4656_v11 = vpop.f32.mrb[10].mxu1  ;;  %5654 = vmatprep.subr.bf16.mxu0 %v5653_v61  ;;  %5662 = vmatprep.subr.bf16.mxu1 %v5661_v62 }
 0x394   : > { %v4604_v12 = vadd.f32 %v4603_v10, %v4366_v35  ;;  %v4657_v13 = vadd.f32 %v4656_v11, %v4374_v36  ;;  %v4605_v14 = vpop.f32.mrb[11].mxu0  ;;  %v4658_v18 = vpop.f32.mrb[11].mxu1  ;;  %5656 = vmatpush1.bf16.msra.mxu0 %v5655_v59  ;;  %5664 = vmatpush1.bf16.msra.mxu1 %v5663_v60  ;;  %v4669_v27 = vmax.f32 %v4600_v1, 0.0  ;;  %v4671_v29 = vmax.f32 %v4653_v2, 0.0  ;;  %v4677_v35 = vld [vmem:[%s7793_s6] sm:$0xff]  ;;  %v4678_v36 = vld [vmem:[%s7793_s6 + $0x8] sm:$0xff] }
 0x395   : > { %v4606_v16 = vadd.f32 %v4605_v14, %v4370_v31  ;;  %v4659_v23 = vadd.f32 %v4658_v18, %v4378_v15  ;;  %v4670_v37 = vmax.f32 %v4602_v6, 0.0  ;;  %v4672_v38 = vmax.f32 %v4655_v8, 0.0 }
 0x396   : > { %v4673_v30 = vmax.f32 %v4604_v12, 0.0  ;;  %v4675_v26 = vmax.f32 %v4657_v13, 0.0  ;;  %v972_v31 = vrot.slane %v7721_v9, %v971_v19 }
 0x397   : > { %v4674_v39 = vmax.f32 %v4606_v16, 0.0  ;;  %v4676_v40 = vmax.f32 %v4659_v23, 0.0 }
 0x398   : > { %v5659_v41 = vpack.c.bf16 %v4673_v30, %v4669_v27  ;;  %v5667_v33 = vpack.c.bf16 %v4675_v26, %v4671_v29  ;;  %v5669_v15 = vadd.f32 %v7728_v17, %v972_v31  ;;  %v5671_v45 = vadd.f32 %v7736_v20, %v972_v31 }
 0x399   : > { %v5657_v34 = vpack.c.bf16 %v4674_v39, %v4670_v37  ;;  %v5665_v42 = vpack.c.bf16 %v4676_v40, %v4672_v38  ;;  %v4322_v20 = vmax.f32 %v7740_v22, 0.0 }
 0x39a   : > { %v4317_v43 = vmax.f32 %v5669_v15, 0.0  ;;  %v4321_v52 = vmax.f32 %v5671_v45, 0.0 }
 0x39b   : > { %5658 = vmatprep.subr.bf16.mxu0 %v5657_v34  ;;  %5666 = vmatprep.subr.bf16.mxu1 %v5665_v42 }
 0x39c   : > { %5660 = vmatpush1.bf16.msra.mxu0 %v5659_v41  ;;  %5668 = vmatpush1.bf16.msra.mxu1 %v5667_v33 }
 0x39f   : > { %5631 = vmatmul.mubr.msk.f32.vlgmr.msra.gmra.mrb[12].mxu0 %vm4679_vm0, %v4677_v35  ;;  %5633 = vmatmul.mubr.msk.f32.vlgmr.msra.gmra.mrb[12].mxu1 %vm4679_vm0, %v4677_v35 }
 0x3a0   : > { %4756 = vmatprep.mubr.f32.mxu0 %v6782_v4  ;;  %4833 = vmatprep.mubr.f32.mxu1 %v6782_v4  ;;  %v4318_v4 = vmax.f32 %v7732_v24, 0.0  ;;  %v4324_v24 = vmax.f32 %v7742_v32, 0.0 }
 0x3a3   : > { %5632 = vmatmul.mubr.msk.f32.gmra.mrb[14].mxu0 %vm4679_vm0, %v4678_v36  ;;  %5634 = vmatmul.mubr.msk.f32.gmra.mrb[14].mxu1 %vm4679_vm0, %v4678_v36 }
 0x472   : > { %v4752_v47 = vpop.f32.mrb[12].mxu0  ;;  %v4829_v48 = vpop.f32.mrb[12].mxu1 }
 0x473   : > { %v4840_v50 = vmul.f32 %v4752_v47, %v4317_v43  ;;  %v4842_v7 = vmul.f32 %v4829_v48, %v4319_v44  ;;  %v4754_v51 = vpop.f32.mrb[13].mxu0  ;;  %v4831_v9 = vpop.f32.mrb[13].mxu1 }
 0x474   : > { %v4841_v19 = vmul.f32 %v4754_v51, %v4318_v4  ;;  %v4843_v17 = vmul.f32 %v4831_v9, %v4320_v46 }
 0x475   : > { %v4851_v21 = vadd.f32 %v4850_v49, %v4840_v50  ;;  %v4853_v54 = vadd.f32 %v4850_v49, %v4842_v7 }
 0x476   : > { %v4852_v25 = vadd.f32 %v4850_v49, %v4841_v19  ;;  %v4854_v55 = vadd.f32 %v4850_v49, %v4843_v17  ;;  %v4758_v56 = vpop.f32.mrb[14].mxu0  ;;  %v4835_v57 = vpop.f32.mrb[14].mxu1 }
 0x477   : > { %v4844_v58 = vmul.f32 %v4758_v56, %v4321_v52  ;;  %v4846_v59 = vmul.f32 %v4835_v57, %v4323_v53  ;;  %v4760_v60 = vpop.f32.mrb[15].mxu0  ;;  %v4837_v61 = vpop.f32.mrb[15].mxu1 }
 0x478   : > { %v5648_v62 = vpack.c.bf16 %v4852_v25, %v4851_v21  ;;  %v5649_v63 = vpack.c.bf16 %v4854_v55, %v4853_v54  ;;  %v4845_v0 = vmul.f32 %v4760_v60, %v4322_v20  ;;  %v4847_v1 = vmul.f32 %v4837_v61, %v4324_v24  ;;  %4893 = sbr.rel (!%p7815_p10) target bundleno = 1159 (0x487), region = 72 }
 0x479   : > { %v4855_v2 = vadd.f32 %v4850_v49, %v4844_v58  ;;  %v4857_v28 = vadd.f32 %v4850_v49, %v4846_v59 }
 0x47a   : > { %v4856_v3 = vadd.f32 %v4850_v49, %v4845_v0  ;;  %4883 = vst [vmem:[%s434_s29] sm:$0xff] %v5648_v62  ;;  %4884 = vst [vmem:[%s434_s29 + $0x8] sm:$0xff] %v5649_v63  ;;  %v4858_v22 = vadd.f32 %v4850_v49, %v4847_v1 }
 0x47c   : > { %v5650_v32 = vpack.c.bf16 %v4856_v3, %v4855_v2  ;;  %v5651_v5 = vpack.c.bf16 %v4858_v22, %v4857_v28 }
 0x47e   : > { %4885 = vst [vmem:[%s434_s29 + $0x10] sm:$0xff] %v5650_v32  ;;  %4886 = vst [vmem:[%s434_s29 + $0x18] sm:$0xff] %v5651_v5 }
 0x481   : > { %v4909_v6 = vld [vmem:[%s434_s29] sm:$0xff]  ;;  %v4911_v8 = vld [vmem:[%s434_s29 + $0x8] sm:$0xff] }
 0x482   : > { %4910 = vst [vmem:[%s4896_s22] sm:$0xff] %v4909_v6  ;;  %4912 = vst [vmem:[%s4896_s22 + $0x8] sm:$0xff] %v4911_v8 }
 0x485   : > { %v4913_v10 = vld [vmem:[%s434_s29 + $0x10] sm:$0xff]  ;;  %v4915_v11 = vld [vmem:[%s434_s29 + $0x18] sm:$0xff] }
 0x486   : > { %4914 = vst [vmem:[%s4896_s22 + $0x40] sm:$0xff] %v4913_v10  ;;  %4916 = vst [vmem:[%s4896_s22 + $0x48] sm:$0xff] %v4915_v11 }
 0x487 PF: > { %s7816_s16 = sld [smem:[#allocation14_spill]]  ;;  %p26_p9 = scmp.ge.s32.totalorder %s6853_s11, 6  }
 0x488   : > { %s7817_s29 = smov %s6765_s30  ;;  %s7818_s30 = smov %s6769_s9 }
 0x489   : > { %s7820_s10 = smov %s6853_s11  ;;  %28 = sbr.rel (!%p26_p9) target bundleno = 10 (0xa), region = 152 }
 0x48d   : > { %s7819_s9 = smov %s7816_s16 }
 0x490   :  { %4932 = vsyncpa [#allocation4], 1 }
 0x491   :  { %4934 = vsyncpa [#allocation4 + $0x1], 1 }
 0x492   :  { %4935 = vsyncpa [#allocation6], 1 }
 0x493   :  { %4937 = vsyncpa [#allocation6 + $0x1], 1 }
 0x494   :  { %4938 = vsyncpa [#allocation9], 1 }
 0x495   :  { %4940 = vsyncpa [#allocation9 + $0x1], 1 }

</bundles_post_ra>
